<compile_context>
chip_gen: v7x
topology: tpu7x:2x2x1
jax: 0.10.0
libtpu: 0.0.40
codegen_flags: <defaults>
</compile_context>

<pallas_src>
import numpy as np
import jax
import jax.numpy as jnp
from jax import lax
from jax.experimental import pallas as pl
from jax.experimental.pallas import tpu as pltpu

BN_EPS = 1e-5  # PyTorch BatchNorm1d default


# --------------------------------------------------------------------------
# Kernel
# --------------------------------------------------------------------------
def _var_merged_v3_kernel(x_ref, w1e_ref, w2e_ref, fc1w_ref, fc2w_ref,
                          fc3wt_ref, vec_ref, out_ref):
    f32 = jnp.float32
    # In-kernel cast (VPU): input arrives in its native dtype, no extra HBM pass.
    xb = x_ref[...].astype(jnp.bfloat16)                          # (T, 20*L)

    # conv1 (kernel spans full height) for all 9 output positions as ONE
    # banded matmul, + bias + ReLU  ->  (T, 72) f32   [72 = 9 pos * 8 ch]
    h1 = jnp.maximum(
        jnp.dot(xb, w1e_ref[...], preferred_element_type=f32)
        + vec_ref[0:1, 0:72], 0.0)

    # pool1: MaxPool2d((1,2), stride 1) == max of two lane slices -> (T, 64)
    # (pltpu.roll(h1, -8, -1) is an alternative if the slice lowers to a copy)
    h1p = jnp.maximum(h1[:, 0:64], h1[:, 8:72]).astype(jnp.bfloat16)

    # conv2 (kernel (1,2)), all 7 positions, as ONE block-banded matmul -> (T, 112)
    h2 = jnp.maximum(
        jnp.dot(h1p, w2e_ref[...], preferred_element_type=f32)
        + vec_ref[1:2, 0:112], 0.0)

    # pool2 -> (T, 96)   [96 = 6 pos * 16 ch, position-major]
    h2p = jnp.maximum(h2[:, 0:96], h2[:, 16:112]).astype(jnp.bfloat16)

    # fc1 + ReLU + bn1 (eval-mode folded affine).
    z1 = jnp.maximum(
        jnp.dot(h2p, fc1w_ref[...], preferred_element_type=f32)
        + vec_ref[2:3, 0:50], 0.0)
    z1 = (z1 * vec_ref[3:4, 0:50] + vec_ref[4:5, 0:50]).astype(jnp.bfloat16)
    # TODO(synk): Dropout(0.4) is identity in eval/inference mode (not emitted).

    # fc2 + ReLU + bn2
    z2 = jnp.maximum(
        jnp.dot(z1, fc2w_ref[...], preferred_element_type=f32)
        + vec_ref[5:6, 0:10], 0.0)
    z2 = (z2 * vec_ref[6:7, 0:10] + vec_ref[7:8, 0:10]).astype(jnp.bfloat16)

    # fc3 + ReLU directly in (class, batch) layout so the output is lane-dense.
    z3t = lax.dot_general(fc3wt_ref[...], z2, (((1,), (1,)), ((), ())),
                          preferred_element_type=f32)             # (2, T)
    z3t = jnp.maximum(z3t + vec_ref[0:2, 127:128], 0.0)

    # softmax + argmax over the 2 classes (first-max-wins like torch.argmax)
    l0 = z3t[0:1, :]
    l1 = z3t[1:2, :]
    mx = jnp.maximum(l0, l1)
    e0 = jnp.exp(l0 - mx)
    e1 = jnp.exp(l1 - mx)
    inv = pl.reciprocal(e0 + e1, approx=True)                     # EUP slot

    # Direct sublane-slice stores (no concatenate temp, no dead zero rows).
    out_ref[0:2, :] = z3t
    out_ref[2:3, :] = e0 * inv
    out_ref[3:4, :] = e1 * inv
    out_ref[4:5, :] = jnp.where(l1 > l0, 1.0, 0.0).astype(f32)
    # rows 5-7 of the packed slab are never read -> intentionally unwritten.


# --------------------------------------------------------------------------
# Parameter preparation (host side, done once)
# --------------------------------------------------------------------------
def init_torch_like_params(key, seq_len):
    """Random parameters with the exact shapes of the PyTorch module (eval)."""
    k1 = seq_len - 8
    ks = jax.random.split(key, 10)
    rnd = lambda k, s: jax.random.normal(k, s, jnp.float32) * 0.1
    return dict(
        conv1_w=rnd(ks[0], (8, 1, 20, k1)), conv1_b=rnd(ks[1], (8,)),
        conv2_w=rnd(ks[2], (16, 8, 1, 2)), conv2_b=rnd(ks[3], (16,)),
        fc1_w=rnd(ks[4], (50, 96)), fc1_b=rnd(ks[5], (50,)),
        bn1_gamma=jnp.ones((50,)), bn1_beta=jnp.zeros((50,)),
        bn1_mean=jnp.zeros((50,)), bn1_var=jnp.ones((50,)),
        fc2_w=rnd(ks[6], (10, 50)), fc2_b=rnd(ks[7], (10,)),
        bn2_gamma=jnp.ones((10,)), bn2_beta=jnp.zeros((10,)),
        bn2_mean=jnp.zeros((10,)), bn2_var=jnp.ones((10,)),
        fc3_w=rnd(ks[8], (2, 10)), fc3_b=rnd(ks[9], (2,)),
    )


def prepare_params(tp, seq_len):
    """Fold the PyTorch parameters into the fused / banded / bf16 kernel form."""
    L = seq_len
    k1 = L - 8
    f = lambda a: np.asarray(a, np.float32)

    # conv1 -> banded (20*L, 72): columns for output pos j use rows aa*L+j..+k1.
    w1 = f(tp['conv1_w'])                                  # (8, 1, 20, k1)
    w1e = np.zeros((20 * L, 9 * 8), np.float32)
    for j in range(9):
        for aa in range(20):
            w1e[aa * L + j: aa * L + j + k1, j * 8:(j + 1) * 8] = w1[:, 0, aa, :].T

    # conv2 (both taps, all 7 positions) -> block-banded (64, 112).
    w2 = f(tp['conv2_w'])                                  # (16, 8, 1, 2)
    w2e = np.zeros((8 * 8, 7 * 16), np.float32)
    for j in range(7):
        for t in range(2):
            w2e[(j + t) * 8:(j + t + 1) * 8, j * 16:(j + 1) * 16] = w2[:, :, 0, t].T

    # fc1: torch's .view flattens channel-major (c*6 + w); kernel features are
    # position-major (w*16 + c) -> permute fc1 weight rows accordingly.
    perm = np.array([c * 6 + w for w in range(6) for c in range(16)])
    fc1w = f(tp['fc1_w']).T[perm]                          # (96, 50)

    def bn_fold(gamma, beta, mean, var):
        s = f(gamma) / np.sqrt(f(var) + BN_EPS)
        return s, f(beta) - f(mean) * s

    bn1s, bn1b = bn_fold(tp['bn1_gamma'], tp['bn1_beta'], tp['bn1_mean'], tp['bn1_var'])
    bn2s, bn2b = bn_fold(tp['bn2_gamma'], tp['bn2_beta'], tp['bn2_mean'], tp['bn2_var'])

    # All tiny per-feature vectors packed into ONE (8, 128) f32 slab:
    #  row 0 lanes 0:72  conv1 bias (tiled x9)   | row 0 lane 127  fc3_b[0]
    #  row 1 lanes 0:112 conv2 bias (tiled x7)   | row 1 lane 127  fc3_b[1]
    #  row 2 fc1_b   row 3 bn1 scale  row 4 bn1 shift
    #  row 5 fc2_b   row 6 bn2 scale  row 7 bn2 shift
    vec = np.zeros((8, 128), np.float32)
    vec[0, :72] = np.tile(f(tp['conv1_b']), 9)
    vec[1, :112] = np.tile(f(tp['conv2_b']), 7)
    vec[2, :50] = f(tp['fc1_b'])
    vec[3, :50] = bn1s
    vec[4, :50] = bn1b
    vec[5, :10] = f(tp['fc2_b'])
    vec[6, :10] = bn2s
    vec[7, :10] = bn2b
    vec[0, 127] = f(tp['fc3_b'])[0]
    vec[1, 127] = f(tp['fc3_b'])[1]

    bf = lambda a: jnp.asarray(a, jnp.bfloat16)
    return dict(
        w1e=bf(w1e), w2e=bf(w2e), fc1w=bf(fc1w),
        fc2w=bf(f(tp['fc2_w']).T),                 # (50, 10)
        fc3wt=bf(f(tp['fc3_w'])),                  # (2, 10): already (out, in)
        vec=jnp.asarray(vec, jnp.float32),
    )


_PARAM_ORDER = ['w1e', 'w2e', 'fc1w', 'fc2w', 'fc3wt', 'vec']


# --------------------------------------------------------------------------
# Wrapper
# --------------------------------------------------------------------------
def _round_up(v, m):
    return ((v + m - 1) // m) * m


def _tpu_vmem_capacity_bytes():
    """Physical per-core VMEM; conservative 64 MiB (v7x) if detection fails."""
    try:
        info = pltpu.get_tpu_info()
        for attr in ("vmem_capacity_bytes", "vmem_size_bytes", "vmem_bytes"):
            v = getattr(info, attr, None)
            if v:
                return int(v)
    except Exception:
        pass
    return 64 << 20


def var_merged_v3_forward(x, kparams, seq_len, tile_n=None, vmem_limit_bytes=None):
    """x: (N, 1, 20, seq_len) NCHW, any float dtype.  Returns (logits, preds, probs)."""
    n = x.shape[0]
    L = seq_len
    # Metadata-only reshape; NO host-side cast / pad (cast happens in-kernel,
    # the ragged last tile is handled by Pallas boundary masking).
    x_flat = x.reshape(n, 20 * L)

    vmem_cap = _tpu_vmem_capacity_bytes()
    if tile_n is None:
        # 128 MiB VMEM parts (v5e/v6e): big tiles; 64 MiB parts (v7x): smaller.
        tile_n = 8192 if vmem_cap >= (100 << 20) else 2048
    # Ensure >=2 grid steps so the "parallel" axis shards across v7x's 2 TCs,
    # and keep the tile a multiple of 128 (lane-dense output stores).
    if n > 128:
        tile_n = min(tile_n, _round_up(pl.cdiv(n, 2), 128))
    tile_n = max(128, (tile_n // 128) * 128)
    assert tile_n % 128 == 0, "tile_n must be a multiple of 128"

    if vmem_limit_bytes is None:
        # ~10 KB live VMEM per batch row across the pipeline (incl. double-
        # buffered f32 input), plus slack; never exceed physical minus headroom.
        need = tile_n * 10 * 1024 + (4 << 20)
        vmem_limit_bytes = int(min(max(32 << 20, need), vmem_cap - (8 << 20)))

    ws = [kparams[k] for k in _PARAM_ORDER]
    grid = (pl.cdiv(n, tile_n),)

    in_specs = [pl.BlockSpec((tile_n, 20 * L), lambda i: (i, 0))]
    in_specs += [pl.BlockSpec(w.shape, lambda i: (0, 0)) for w in ws]  # resident
    out_specs = pl.BlockSpec((8, tile_n), lambda i: (0, i))

    macs = 20 * L * 72 + 64 * 112 + 96 * 50 + 50 * 10 + 10 * 2
    n_eff = grid[0] * tile_n
    cost = pl.CostEstimate(
        flops=int(2 * macs * n_eff),
        transcendentals=int(2 * n_eff),
        bytes_accessed=int(x_flat.size * x_flat.dtype.itemsize
                           + sum(w.size * w.dtype.itemsize for w in ws)
                           + 8 * n * 4))

    out = pl.pallas_call(
        _var_merged_v3_kernel,
        grid=grid,
        in_specs=in_specs,
        out_specs=out_specs,
        out_shape=jax.ShapeDtypeStruct((8, n), jnp.float32),
        compiler_params=pltpu.CompilerParams(
            dimension_semantics=("parallel",),          # megacore on v7x
            vmem_limit_bytes=vmem_limit_bytes),
        cost_estimate=cost,
    )(x_flat, *ws)

    logits = out[0:2, :].T                               # (N, 2)
    probs = out[2:4, :].T                                # (N, 2)
    preds = out[4, :].astype(jnp.int32)                  # (N,)
    return logits, preds, probs


# --------------------------------------------------------------------------
# Plain-JAX reference (mirrors the PyTorch eval forward, with the same bf16
# quantization points as the kernel so results are directly comparable).
# --------------------------------------------------------------------------
def reference_forward(x, tp, seq_len):
    n = x.shape[0]
    L = seq_len
    k1 = L - 8
    bf = lambda a: a.astype(jnp.bfloat16).astype(jnp.float32)

    xq = bf(x[:, 0].astype(jnp.float32))                  # (N, 20, L)
    w1 = bf(tp['conv1_w'])[:, 0]                          # (8, 20, k1)
    c1 = jnp.stack([jnp.einsum('nap,cap->nc', xq[:, :, j:j + k1], w1)
                    for j in range(9)], axis=2)           # (N, 8, 9)
    c1 = jnp.maximum(c1 + tp['conv1_b'][None, :, None], 0.0)
    p1 = bf(jnp.maximum(c1[:, :, :8], c1[:, :, 1:9]))     # (N, 8, 8)

    w2 = bf(tp['conv2_w'])[:, :, 0]                       # (16, 8, 2)
    c2 = jnp.stack([jnp.einsum('nk,ck->nc', p1[:, :, j], w2[:, :, 0])
                    + jnp.einsum('nk,ck->nc', p1[:, :, j + 1], w2[:, :, 1])
                    for j in range(7)], axis=2)           # (N, 16, 7)
    c2 = jnp.maximum(c2 + tp['conv2_b'][None, :, None], 0.0)
    p2 = bf(jnp.maximum(c2[:, :, :6], c2[:, :, 1:7]))     # (N, 16, 6)
    flat = p2.reshape(n, 96)                              # channel-major (torch .view)

    def bn(v, g, b, m, var):
        s = g / jnp.sqrt(var + BN_EPS)
        return v * s + (b - m * s)

    z1 = jnp.maximum(flat @ bf(tp['fc1_w']).T + tp['fc1_b'], 0.0)
    z1 = bf(bn(z1, tp['bn1_gamma'], tp['bn1_beta'], tp['bn1_mean'], tp['bn1_var']))
    z2 = jnp.maximum(z1 @ bf(tp['fc2_w']).T + tp['fc2_b'], 0.0)
    z2 = bf(bn(z2, tp['bn2_gamma'], tp['bn2_beta'], tp['bn2_mean'], tp['bn2_var']))
    z3 = jnp.maximum(z2 @ bf(tp['fc3_w']).T + tp['fc3_b'], 0.0)
    preds = jnp.argmax(z3, axis=1).astype(jnp.int32)
    probs = jax.nn.softmax(z3, axis=1)
    return z3, preds, probs


# --------------------------------------------------------------------------
if __name__ == "__main__":
    seq_len = 13            # CDR3 length L in {12,...,16}; conv1 width = L - 8
    batch = 900             # non-multiple of 128 -> exercises the ragged tile;
                            # tile auto-clamps to 512 -> 2-step "parallel" grid
    key = jax.random.PRNGKey(0)
    kx, kp = jax.random.split(key)

    x = jax.random.normal(kx, (batch, 1, 20, seq_len), jnp.float32)  # NCHW
    tparams = init_torch_like_params(kp, seq_len)
    kparams = prepare_params(tparams, seq_len)

    logits, preds, probs = var_merged_v3_forward(x, kparams, seq_len)
    jax.block_until_ready((logits, preds, probs))

    ref_logits, ref_preds, ref_probs = reference_forward(x, tparams, seq_len)

    assert logits.shape == (batch, 2) and preds.shape == (batch,) and probs.shape == (batch, 2)
    assert bool(jnp.allclose(logits, ref_logits, atol=2e-3, rtol=2e-3)), "logits mismatch"
    assert bool(jnp.allclose(probs, ref_probs, atol=4e-3)), "probabilities mismatch"
    margin = jnp.abs(ref_logits[:, 1] - ref_logits[:, 0])
    assert bool(jnp.all((preds == ref_preds) | (margin < 1e-3))), "predictions mismatch"

    print("KERNEL_OK")
</pallas_src>

<mosaic_0001>
module attributes {stable_mosaic.version = 11 : i64} {
  func.func @_var_merged_v3_kernel(%arg0: i32, %arg1: memref<512x260xf32, #tpu.memory_space<vmem>>, %arg2: memref<260x72xbf16, #tpu.memory_space<vmem>>, %arg3: memref<64x112xbf16, #tpu.memory_space<vmem>>, %arg4: memref<96x50xbf16, #tpu.memory_space<vmem>>, %arg5: memref<50x10xbf16, #tpu.memory_space<vmem>>, %arg6: memref<2x10xbf16, #tpu.memory_space<vmem>>, %arg7: memref<8x128xf32, #tpu.memory_space<vmem>>, %arg8: memref<8x512xf32, #tpu.memory_space<vmem>>) attributes {dimension_semantics = [#tpu.dimension_semantics<parallel>], iteration_bounds = array<i64: 2>, scalar_prefetch = 0 : i64, scratch_operands = 0 : i64, tpu.core_type = #tpu.core_type<tc>, window_params = [{transform_indices = @transform_0, window_bounds = array<i64: 512, 260>}, {pipeline_mode = #tpu.pipeline_mode<synchronous>, transform_indices = @transform_1, window_bounds = array<i64: 260, 72>}, {pipeline_mode = #tpu.pipeline_mode<synchronous>, transform_indices = @transform_2, window_bounds = array<i64: 64, 112>}, {pipeline_mode = #tpu.pipeline_mode<synchronous>, transform_indices = @transform_3, window_bounds = array<i64: 96, 50>}, {pipeline_mode = #tpu.pipeline_mode<synchronous>, transform_indices = @transform_4, window_bounds = array<i64: 50, 10>}, {pipeline_mode = #tpu.pipeline_mode<synchronous>, transform_indices = @transform_5, window_bounds = array<i64: 2, 10>}, {pipeline_mode = #tpu.pipeline_mode<synchronous>, transform_indices = @transform_6, window_bounds = array<i64: 8, 128>}, {transform_indices = @transform_7, window_bounds = array<i64: 8, 512>}]} {
    %c0 = arith.constant 0 : index
    %c0_0 = arith.constant 0 : index
    %0 = vector.load %arg1[%c0, %c0_0] : memref<512x260xf32, #tpu.memory_space<vmem>>, vector<512x260xf32>
    %1 = arith.truncf %0 : vector<512x260xf32> to vector<512x260xbf16>
    %c0_1 = arith.constant 0 : index
    %c0_2 = arith.constant 0 : index
    %2 = vector.load %arg2[%c0_1, %c0_2] : memref<260x72xbf16, #tpu.memory_space<vmem>>, vector<260x72xbf16>
    %cst = arith.constant dense<0.000000e+00> : vector<512x72xf32>
    %3 = tpu.matmul %1, %2, %cst {dimension_numbers = #tpu.dot_dimension_numbers<[1], [0], [0], [1], [0, 0, 1, 1], [], []>} : vector<512x260xbf16>, vector<260x72xbf16>, vector<512x72xf32> -> vector<512x72xf32>
    %c0_3 = arith.constant 0 : index
    %c0_4 = arith.constant 0 : index
    %4 = vector.load %arg7[%c0_3, %c0_4] : memref<8x128xf32, #tpu.memory_space<vmem>>, vector<1x72xf32>
    %5 = vector.broadcast %4 : vector<1x72xf32> to vector<512x72xf32>
    %6 = arith.addf %3, %5 : vector<512x72xf32>
    %cst_5 = arith.constant 0.000000e+00 : f32
    %7 = vector.broadcast %cst_5 : f32 to vector<512x72xf32>
    %8 = arith.maximumf %6, %7 : vector<512x72xf32>
    %9 = vector.extract_strided_slice %8 {offsets = [0, 0], sizes = [512, 64], strides = [1, 1]} : vector<512x72xf32> to vector<512x64xf32>
    %10 = vector.extract_strided_slice %8 {offsets = [0, 8], sizes = [512, 64], strides = [1, 1]} : vector<512x72xf32> to vector<512x64xf32>
    %11 = arith.maximumf %9, %10 : vector<512x64xf32>
    %12 = arith.truncf %11 : vector<512x64xf32> to vector<512x64xbf16>
    %c0_6 = arith.constant 0 : index
    %c0_7 = arith.constant 0 : index
    %13 = vector.load %arg3[%c0_6, %c0_7] : memref<64x112xbf16, #tpu.memory_space<vmem>>, vector<64x112xbf16>
    %cst_8 = arith.constant dense<0.000000e+00> : vector<512x112xf32>
    %14 = tpu.matmul %12, %13, %cst_8 {dimension_numbers = #tpu.dot_dimension_numbers<[1], [0], [0], [1], [0, 0, 1, 1], [], []>} : vector<512x64xbf16>, vector<64x112xbf16>, vector<512x112xf32> -> vector<512x112xf32>
    %c1 = arith.constant 1 : index
    %c0_9 = arith.constant 0 : index
    %15 = vector.load %arg7[%c1, %c0_9] : memref<8x128xf32, #tpu.memory_space<vmem>>, vector<1x112xf32>
    %16 = vector.broadcast %15 : vector<1x112xf32> to vector<512x112xf32>
    %17 = arith.addf %14, %16 : vector<512x112xf32>
    %cst_10 = arith.constant 0.000000e+00 : f32
    %18 = vector.broadcast %cst_10 : f32 to vector<512x112xf32>
    %19 = arith.maximumf %17, %18 : vector<512x112xf32>
    %20 = vector.extract_strided_slice %19 {offsets = [0, 0], sizes = [512, 96], strides = [1, 1]} : vector<512x112xf32> to vector<512x96xf32>
    %21 = vector.extract_strided_slice %19 {offsets = [0, 16], sizes = [512, 96], strides = [1, 1]} : vector<512x112xf32> to vector<512x96xf32>
    %22 = arith.maximumf %20, %21 : vector<512x96xf32>
    %23 = arith.truncf %22 : vector<512x96xf32> to vector<512x96xbf16>
    %c0_11 = arith.constant 0 : index
    %c0_12 = arith.constant 0 : index
    %24 = vector.load %arg4[%c0_11, %c0_12] : memref<96x50xbf16, #tpu.memory_space<vmem>>, vector<96x50xbf16>
    %cst_13 = arith.constant dense<0.000000e+00> : vector<512x50xf32>
    %25 = tpu.matmul %23, %24, %cst_13 {dimension_numbers = #tpu.dot_dimension_numbers<[1], [0], [0], [1], [0, 0, 1, 1], [], []>} : vector<512x96xbf16>, vector<96x50xbf16>, vector<512x50xf32> -> vector<512x50xf32>
    %c2 = arith.constant 2 : index
    %c0_14 = arith.constant 0 : index
    %26 = vector.load %arg7[%c2, %c0_14] : memref<8x128xf32, #tpu.memory_space<vmem>>, vector<1x50xf32>
    %27 = vector.broadcast %26 : vector<1x50xf32> to vector<512x50xf32>
    %28 = arith.addf %25, %27 : vector<512x50xf32>
    %cst_15 = arith.constant 0.000000e+00 : f32
    %29 = vector.broadcast %cst_15 : f32 to vector<512x50xf32>
    %30 = arith.maximumf %28, %29 : vector<512x50xf32>
    %c3 = arith.constant 3 : index
    %c0_16 = arith.constant 0 : index
    %31 = vector.load %arg7[%c3, %c0_16] : memref<8x128xf32, #tpu.memory_space<vmem>>, vector<1x50xf32>
    %32 = vector.broadcast %31 : vector<1x50xf32> to vector<512x50xf32>
    %33 = arith.mulf %30, %32 : vector<512x50xf32>
    %c4 = arith.constant 4 : index
    %c0_17 = arith.constant 0 : index
    %34 = vector.load %arg7[%c4, %c0_17] : memref<8x128xf32, #tpu.memory_space<vmem>>, vector<1x50xf32>
    %35 = vector.broadcast %34 : vector<1x50xf32> to vector<512x50xf32>
    %36 = arith.addf %33, %35 : vector<512x50xf32>
    %37 = arith.truncf %36 : vector<512x50xf32> to vector<512x50xbf16>
    %c0_18 = arith.constant 0 : index
    %c0_19 = arith.constant 0 : index
    %38 = vector.load %arg5[%c0_18, %c0_19] : memref<50x10xbf16, #tpu.memory_space<vmem>>, vector<50x10xbf16>
    %cst_20 = arith.constant dense<0.000000e+00> : vector<512x10xf32>
    %39 = tpu.matmul %37, %38, %cst_20 {dimension_numbers = #tpu.dot_dimension_numbers<[1], [0], [0], [1], [0, 0, 1, 1], [], []>} : vector<512x50xbf16>, vector<50x10xbf16>, vector<512x10xf32> -> vector<512x10xf32>
    %c5 = arith.constant 5 : index
    %c0_21 = arith.constant 0 : index
    %40 = vector.load %arg7[%c5, %c0_21] : memref<8x128xf32, #tpu.memory_space<vmem>>, vector<1x10xf32>
    %41 = vector.broadcast %40 : vector<1x10xf32> to vector<512x10xf32>
    %42 = arith.addf %39, %41 : vector<512x10xf32>
    %cst_22 = arith.constant 0.000000e+00 : f32
    %43 = vector.broadcast %cst_22 : f32 to vector<512x10xf32>
    %44 = arith.maximumf %42, %43 : vector<512x10xf32>
    %c6 = arith.constant 6 : index
    %c0_23 = arith.constant 0 : index
    %45 = vector.load %arg7[%c6, %c0_23] : memref<8x128xf32, #tpu.memory_space<vmem>>, vector<1x10xf32>
    %46 = vector.broadcast %45 : vector<1x10xf32> to vector<512x10xf32>
    %47 = arith.mulf %44, %46 : vector<512x10xf32>
    %c7 = arith.constant 7 : index
    %c0_24 = arith.constant 0 : index
    %48 = vector.load %arg7[%c7, %c0_24] : memref<8x128xf32, #tpu.memory_space<vmem>>, vector<1x10xf32>
    %49 = vector.broadcast %48 : vector<1x10xf32> to vector<512x10xf32>
    %50 = arith.addf %47, %49 : vector<512x10xf32>
    %51 = arith.truncf %50 : vector<512x10xf32> to vector<512x10xbf16>
    %c0_25 = arith.constant 0 : index
    %c0_26 = arith.constant 0 : index
    %52 = vector.load %arg6[%c0_25, %c0_26] : memref<2x10xbf16, #tpu.memory_space<vmem>>, vector<2x10xbf16>
    %cst_27 = arith.constant dense<0.000000e+00> : vector<2x512xf32>
    %53 = tpu.matmul %52, %51, %cst_27 {dimension_numbers = #tpu.dot_dimension_numbers<[1], [1], [0], [0], [0, 0, 1, 0], [], []>} : vector<2x10xbf16>, vector<512x10xbf16>, vector<2x512xf32> -> vector<2x512xf32>
    %c0_28 = arith.constant 0 : index
    %c127 = arith.constant 127 : index
    %54 = vector.load %arg7[%c0_28, %c127] : memref<8x128xf32, #tpu.memory_space<vmem>>, vector<2x1xf32>
    %55 = vector.broadcast %54 : vector<2x1xf32> to vector<2x512xf32>
    %56 = arith.addf %53, %55 : vector<2x512xf32>
    %cst_29 = arith.constant 0.000000e+00 : f32
    %57 = vector.broadcast %cst_29 : f32 to vector<2x512xf32>
    %58 = arith.maximumf %56, %57 : vector<2x512xf32>
    %59 = vector.extract_strided_slice %58 {offsets = [0, 0], sizes = [1, 512], strides = [1, 1]} : vector<2x512xf32> to vector<1x512xf32>
    %60 = vector.extract_strided_slice %58 {offsets = [1, 0], sizes = [1, 512], strides = [1, 1]} : vector<2x512xf32> to vector<1x512xf32>
    %61 = arith.maximumf %59, %60 : vector<1x512xf32>
    %62 = arith.subf %59, %61 : vector<1x512xf32>
    %63 = math.exp %62 : vector<1x512xf32>
    %64 = arith.subf %60, %61 : vector<1x512xf32>
    %65 = math.exp %64 : vector<1x512xf32>
    %66 = arith.addf %63, %65 : vector<1x512xf32>
    %67 = tpu.reciprocal %66 {approx = true} : vector<1x512xf32> -> vector<1x512xf32>
    %c0_30 = arith.constant 0 : index
    %c0_31 = arith.constant 0 : index
    %68 = vector.load %arg8[%c0_30, %c0_31] : memref<8x512xf32, #tpu.memory_space<vmem>>, vector<2x512xf32>
    tpu.vector_store %arg8[%c0_30, %c0_31], %58 {strides = array<i32>} : memref<8x512xf32, #tpu.memory_space<vmem>>, vector<2x512xf32>,
    %69 = arith.mulf %63, %67 : vector<1x512xf32>
    %c2_32 = arith.constant 2 : index
    %c0_33 = arith.constant 0 : index
    %70 = vector.load %arg8[%c2_32, %c0_33] : memref<8x512xf32, #tpu.memory_space<vmem>>, vector<1x512xf32>
    tpu.vector_store %arg8[%c2_32, %c0_33], %69 {strides = array<i32>} : memref<8x512xf32, #tpu.memory_space<vmem>>, vector<1x512xf32>,
    %71 = arith.mulf %65, %67 : vector<1x512xf32>
    %c3_34 = arith.constant 3 : index
    %c0_35 = arith.constant 0 : index
    %72 = vector.load %arg8[%c3_34, %c0_35] : memref<8x512xf32, #tpu.memory_space<vmem>>, vector<1x512xf32>
    tpu.vector_store %arg8[%c3_34, %c0_35], %71 {strides = array<i32>} : memref<8x512xf32, #tpu.memory_space<vmem>>, vector<1x512xf32>,
    %73 = arith.cmpf ogt, %60, %59 : vector<1x512xf32>
    %cst_36 = arith.constant 1.000000e+00 : f32
    %cst_37 = arith.constant 0.000000e+00 : f32
    %74 = vector.broadcast %cst_36 : f32 to vector<1x512xf32>
    %75 = vector.broadcast %cst_37 : f32 to vector<1x512xf32>
    %76 = arith.select %73, %74, %75 : vector<1x512xi1>, vector<1x512xf32>
    %c4_38 = arith.constant 4 : index
    %c0_39 = arith.constant 0 : index
    %77 = vector.load %arg8[%c4_38, %c0_39] : memref<8x512xf32, #tpu.memory_space<vmem>>, vector<1x512xf32>
    tpu.vector_store %arg8[%c4_38, %c0_39], %76 {strides = array<i32>} : memref<8x512xf32, #tpu.memory_space<vmem>>, vector<1x512xf32>,
    return
  }
  func.func @transform_0(%arg0: i32) -> (i32, i32) {
    %c0_i32 = arith.constant 0 : i32
    %c0_i32_0 = arith.constant 0 : i32
    return %arg0, %c0_i32 : i32, i32
  }
  func.func @transform_1(%arg0: i32) -> (i32, i32) {
    %c0_i32 = arith.constant 0 : i32
    %c0_i32_0 = arith.constant 0 : i32
    %c0_i32_1 = arith.constant 0 : i32
    return %c0_i32, %c0_i32_0 : i32, i32
  }
  func.func @transform_2(%arg0: i32) -> (i32, i32) {
    %c0_i32 = arith.constant 0 : i32
    %c0_i32_0 = arith.constant 0 : i32
    %c0_i32_1 = arith.constant 0 : i32
    return %c0_i32, %c0_i32_0 : i32, i32
  }
  func.func @transform_3(%arg0: i32) -> (i32, i32) {
    %c0_i32 = arith.constant 0 : i32
    %c0_i32_0 = arith.constant 0 : i32
    %c0_i32_1 = arith.constant 0 : i32
    return %c0_i32, %c0_i32_0 : i32, i32
  }
  func.func @transform_4(%arg0: i32) -> (i32, i32) {
    %c0_i32 = arith.constant 0 : i32
    %c0_i32_0 = arith.constant 0 : i32
    %c0_i32_1 = arith.constant 0 : i32
    return %c0_i32, %c0_i32_0 : i32, i32
  }
  func.func @transform_5(%arg0: i32) -> (i32, i32) {
    %c0_i32 = arith.constant 0 : i32
    %c0_i32_0 = arith.constant 0 : i32
    %c0_i32_1 = arith.constant 0 : i32
    return %c0_i32, %c0_i32_0 : i32, i32
  }
  func.func @transform_6(%arg0: i32) -> (i32, i32) {
    %c0_i32 = arith.constant 0 : i32
    %c0_i32_0 = arith.constant 0 : i32
    %c0_i32_1 = arith.constant 0 : i32
    return %c0_i32, %c0_i32_0 : i32, i32
  }
  func.func @transform_7(%arg0: i32) -> (i32, i32) {
    %c0_i32 = arith.constant 0 : i32
    %c0_i32_0 = arith.constant 0 : i32
    return %c0_i32, %arg0 : i32, i32
  }
}

</mosaic_0001>

<bundles_post_ra>
// kernel: tpu_custom_call.1
= control target key start
LH: loop header
LB: loop body
LE: loop exit
PB: predicated region body
PF: predicated region fallthrough
CT: control target
= control target key end

     0   :  { %12 = vsyncpa [#allocation3], 0  ;;  %s8171_s0 = inlined_call_operand.vmem [shape: f32[900,260], index: 0, kind: input, shape index: {}]   ;;  %s8172_s1 = inlined_call_operand.vmem [shape: bf16[260,72], index: 1, kind: input, shape index: {}]   ;;  %s8173_s2 = inlined_call_operand.vmem [shape: bf16[64,112], index: 2, kind: input, shape index: {}]   ;;  %s8174_s3 = inlined_call_operand.vmem [shape: bf16[96,50], index: 3, kind: input, shape index: {}]   ;;  %s8175_s4 = inlined_call_operand.vmem [shape: bf16[50,10], index: 4, kind: input, shape index: {}]   ;;  %s8176_s5 = inlined_call_operand.vmem [shape: bf16[2,10], index: 5, kind: input, shape index: {}]   ;;  %s8177_s6 = inlined_call_operand.vmem [shape: f32[8,128], index: 6, kind: input, shape index: {}]   ;;  %s8178_s7 = inlined_call_operand.hbm [shape: f32[8,900], index: 7, kind: output, shape index: {}]  }
   0x1   :  { %14 = vsyncpa [#allocation3 + $0x1], 0  ;;  %s5679_s24 = smov 0   ;;  %s5681_s25 = smov 0  }
   0x2   :  { %s5683_s26 = smov 0   ;;  %s5685_s27 = smov 0  }
   0x3 LB: > { %s5700_s28 = sadd.s32 4294967295, %s5630_s27   ;;  %s4477_s29 = sadd.s32 4294967294, %s5630_s27   ;;  %s5630_s27 = sphi %s5685_s27, %s8366_s27   ;;  %s5626_s26 = sphi %s5683_s26, %s8365_s26   ;;  %s5622_s25 = sphi %s5681_s25, %s8364_s25   ;;  %s5618_s24 = sphi %s5679_s24, %s8363_s24  }
   0x4   : > { %s5704_s30 = sadd.s32 1, %s5630_s27   ;;  %s179_s8 = sadd.s32 1, %s5626_s26 }
   0x5   : > { %s176_s9 = ssub.s32 %s5630_s27, %s5704_s30  ;;  %p189_p0 = scmp.ne.s32.totalorder %s5626_s26, %s5622_s25 }
   0x6   : > { %p177_p1 = scmp.eq.s32.totalorder %s176_s9, 0  ;;  %p190_p2 = scmp.eq.s32.totalorder %s5700_s28, 1 }
   0x7   : > { %p195_p3 = scmp.ne.s32.totalorder %s5622_s25, %s5618_s24  ;;  %p196_p4 = scmp.eq.s32.totalorder %s4477_s29, 1 }
   0x8   : > { %s5715_s10 = scalar_select %p177_p1, %s5626_s26, %s179_s8  }
   0x9   : > { %p5717_p5 = por %p190_p2, %p189_p0  ;;  %p5721_p6 = por %p196_p4, %p195_p3 }
   0xa   : > { %p4480_p7 = scmp.ge.s32.totalorder %s5630_s27, 1  ;;  %p252_p8 = scmp.lt.s32.totalorder %s5630_s27, 3 }
   0xc   : > { %p253_p9 = pnand %p4480_p7, %p252_p8 }
   0xe   : > { %256 = sbr.rel (%p253_p9) target bundleno = 1766 (0x6e6), region = 48 }
  0x15   : > { %v5512_v0 = vld [vmem:[%s8172_s1] sm:$0xff]   ;;  %v5632_v1 = vmov 0   ;;  %v5513_v2 = vld [vmem:[%s8172_s1 + $0x8] sm:$0xff]   ;;  %s4482_s17 = sshll.u32 %s5700_s28, 6  ;;  %v5514_v3 = vld [vmem:[%s8172_s1 + $0x10] sm:$0xff]   ;;  %vm831_vm0 = vcmask 1041408  }
  0x16   : > { %835 = vmatprep.subr.bf16.mxu0 %v5632_v1  ;;  %p296_p10 = scmp.lt.s32.totalorder %s4482_s17, 112  ;;  %v5515_v4 = vld [vmem:[%s8172_s1 + $0x18] sm:$0xff]   ;;  %v5516_v5 = vld [vmem:[%s8172_s1 + $0x20] sm:$0xff]   ;;  %v5517_v8 = vld [vmem:[%s8172_s1 + $0x28] sm:$0xff]   ;;  %vm734_vm1 = vcmask 31744   ;;  %s5633_s22 = smov 120  }
  0x17   : > { %836 = vmatpush1.bf16.msra.mxu0 %v5512_v0  ;;  %v5528_v6 = vld [vmem:[%s8172_s1 + $0x80] ss:$0 sps:$4 sm:$0x33]   ;;  %v5518_v18 = vld [vmem:[%s8172_s1 + $0x30] sm:$0xff]   ;;  %v5519_v24 = vld [vmem:[%s8172_s1 + $0x38] sm:$0xff]   ;;  %vm1866_vm2 = vcmask 523264  }
  0x18   : > { %837 = vmatprep.subr.bf16.mxu0 %v5632_v1  ;;  %s8368_s17 = smov (!%p296_p10, %s4482_s17), 112  ;;  %5127 = vmatprep.subr.msk.bf16.mxu1 %vm831_vm0, %v5528_v6  ;;  %v833_v10 = vsel %vm831_vm0, %v5528_v6, 0  ;;  %v5520_v29 = vld [vmem:[%s8172_s1 + $0x40] sm:$0xff]   ;;  %v5521_v34 = vld [vmem:[%s8172_s1 + $0x48] sm:$0xff]   ;;  %v5522_v37 = vld [vmem:[%s8172_s1 + $0x50] sm:$0xff]   ;;  %s5634_s29 = smov 112  }
  0x19   : > { %s5145_s20 = smul.u32 24, %s8368_s17  ;;  %4842 = vmatpush3.bf16.msra.mxu1 %v833_v10  ;;  %v5523_v42 = vld [vmem:[%s8172_s1 + $0x58] sm:$0xff]   ;;  %v5524_v45 = vld [vmem:[%s8172_s1 + $0x60] sm:$0xff]   ;;  %v5525_v50 = vld [vmem:[%s8172_s1 + $0x68] sm:$0xff]   ;;  %vm2721_vm3 = vcmask 785408   ;;  %vm3471_vm4 = vcmask 1040384  }
  0x1a   : > { %v5526_v53 = vld [vmem:[%s8172_s1 + $0x70] sm:$0xff]   ;;  %v5527_v58 = vld [vmem:[%s8172_s1 + $0x78] sm:$0xff]   ;;  %vm3374_vm5 = vcmask 408576   ;;  %vm4005_vm6 = vcmask 80896   ;;  %s5638_s17 = smov [#allocation2]  }
  0x1b   : > { %838 = vmatpush1.bf16.msra.mxu0 %v5513_v2  ;;  %s5747_s8 = scalar_lea.vmem %s8171_s0, %s5145_s20  ;;  %s5572_s18 = sshll.u32 %s5638_s17, 4  ;;  %s5573_s18 = int_to_ptr.vmem [resolvable:$false] %s5572_s18 }
  0x1c   : > { %839 = vmatprep.subr.bf16.mxu0 %v5632_v1  ;;  %v310_v7 = vld [vmem:[%s5747_s8 + $0x8] sm:$0xff]  ;;  %v313_v9 = vld [vmem:[%s5747_s8 + $0x20] sm:$0xff]  ;;  %v311_v12 = vld [vmem:[%s5747_s8 + $0x10] sm:$0xff]  ;;  %s5574_s19 = scalar_lea.vmem %s5573_s18, 1024 }
  0x1d   : > { %v502_v11 = vpack.c.bf16 %v313_v9, %v310_v7  ;;  %v314_v13 = vld [vmem:[%s5747_s8 + $0x28] sm:$0xff]  ;;  %v317_v14 = vld [vmem:[%s5747_s8 + $0x40] sm:$0xff]  ;;  %v320_v16 = vld [vmem:[%s5747_s8 + $0x58] sm:$0xff] }
  0x1e   : > { %v503_v15 = vpack.c.bf16 %v314_v13, %v311_v12  ;;  %v506_v17 = vpack.c.bf16 %v320_v16, %v317_v14  ;;  %v323_v19 = vld [vmem:[%s5747_s8 + $0x70] sm:$0xff]  ;;  %v326_v20 = vld [vmem:[%s5747_s8 + $0x88] sm:$0xff]  ;;  %v329_v22 = vld [vmem:[%s5747_s8 + $0xa0] sm:$0xff] }
  0x1f   : > { %840 = vmatpush1.bf16.msra.mxu0 %v5514_v3  ;;  %867 = vmatprep.mubr.bf16.mxu0 %v502_v11  ;;  %v509_v21 = vpack.c.bf16 %v326_v20, %v323_v19  ;;  %v332_v23 = vld [vmem:[%s5747_s8 + $0xb8] sm:$0xff]  ;;  %v335_v26 = vld [vmem:[%s5747_s8 + $0xd0] sm:$0xff]  ;;  %v338_v27 = vld [vmem:[%s5747_s8 + $0xe8] sm:$0xff] }
  0x20   : > { %841 = vmatprep.subr.bf16.mxu0 %v5632_v1  ;;  %4843 = vmatprep.mubr.msk.bf16.mxu1 %vm734_vm1, %v503_v15  ;;  %v512_v25 = vpack.c.bf16 %v332_v23, %v329_v22  ;;  %v515_v28 = vpack.c.bf16 %v338_v27, %v335_v26  ;;  %v341_v30 = vld [vmem:[%s5747_s8 + $0x100] sm:$0xff]  ;;  %v344_v31 = vld [vmem:[%s5747_s8 + $0x118] sm:$0xff]  ;;  %v347_v32 = vld [vmem:[%s5747_s8 + $0x130] sm:$0xff] }
  0x21   : > { %4844 = vmatmul.mubr.msk.bf16.vlgmr.msra.gmra.mrb[0].mxu1 %vm734_vm1, %v506_v17  ;;  %v350_v33 = vld [vmem:[%s5747_s8 + $0x148] sm:$0xff]  ;;  %v518_v35 = vpack.c.bf16 %v344_v31, %v341_v30  ;;  %v353_v38 = vld [vmem:[%s5747_s8 + $0x160] sm:$0xff]  ;;  %v356_v39 = vld [vmem:[%s5747_s8 + $0x178] sm:$0xff] }
  0x22   : > { %4847 = vmatprep.mubr.msk.bf16.mxu1 %vm734_vm1, %v509_v21  ;;  %v521_v36 = vpack.c.bf16 %v350_v33, %v347_v32  ;;  %v359_v40 = vld [vmem:[%s5747_s8 + $0x190] sm:$0xff]  ;;  %v362_v41 = vld [vmem:[%s5747_s8 + $0x1a8] sm:$0xff]  ;;  %v524_v43 = vpack.c.bf16 %v356_v39, %v353_v38  ;;  %v365_v46 = vld [vmem:[%s5747_s8 + $0x1c0] sm:$0xff] }
  0x23   : > { %842 = vmatpush1.bf16.msra.mxu0 %v5515_v4  ;;  %v527_v44 = vpack.c.bf16 %v362_v41, %v359_v40  ;;  %v368_v47 = vld [vmem:[%s5747_s8 + $0x1d8] sm:$0xff]  ;;  %v371_v48 = vld [vmem:[%s5747_s8 + $0x1f0] sm:$0xff]  ;;  %v374_v49 = vld [vmem:[%s5747_s8 + $0x208] sm:$0xff] }
  0x24   : > { %843 = vmatprep.subr.bf16.mxu0 %v5632_v1  ;;  %v530_v51 = vpack.c.bf16 %v368_v47, %v365_v46  ;;  %v533_v52 = vpack.c.bf16 %v374_v49, %v371_v48  ;;  %v377_v54 = vld [vmem:[%s5747_s8 + $0x220] sm:$0xff]  ;;  %v380_v55 = vld [vmem:[%s5747_s8 + $0x238] sm:$0xff]  ;;  %v383_v56 = vld [vmem:[%s5747_s8 + $0x250] sm:$0xff] }
  0x25   : > { %v386_v57 = vld [vmem:[%s5747_s8 + $0x268] sm:$0xff]  ;;  %v309_v59 = vld [vmem:[%s5747_s8] sm:$0xff]  ;;  %v312_v60 = vld [vmem:[%s5747_s8 + $0x18] sm:$0xff]  ;;  %v536_v61 = vpack.c.bf16 %v380_v55, %v377_v54 }
  0x26   : > { %v316_v62 = vld [vmem:[%s5747_s8 + $0x38] sm:$0xff]  ;;  %v319_v63 = vld [vmem:[%s5747_s8 + $0x50] sm:$0xff]  ;;  %v539_v0 = vpack.c.bf16 %v386_v57, %v383_v56  ;;  %v501_v2 = vpack.c.bf16 %v312_v60, %v309_v59  ;;  %v389_v4 = vld [vmem:[%s5747_s8 + $0x280] sm:$0xff] }
  0x27   : > { %844 = vmatpush1.bf16.msra.mxu0 %v5516_v5  ;;  %v505_v3 = vpack.c.bf16 %v319_v63, %v316_v62  ;;  %v392_v5 = vld [vmem:[%s5747_s8 + $0x298] sm:$0xff]  ;;  %v395_v6 = vld [vmem:[%s5747_s8 + $0x2b0] sm:$0xff]  ;;  %v322_v10 = vld [vmem:[%s5747_s8 + $0x68] sm:$0xff] }
  0x28   : > { %845 = vmatprep.subr.bf16.mxu0 %v5632_v1  ;;  %v315_v7 = vld [vmem:[%s5747_s8 + $0x30] sm:$0xff]  ;;  %v542_v9 = vpack.c.bf16 %v392_v5, %v389_v4  ;;  %v325_v11 = vld [vmem:[%s5747_s8 + $0x80] sm:$0xff]  ;;  %v404_v16 = vld [vmem:[%s5747_s8 + $0x2f8] sm:$0xff] }
  0x29   : > { %4848 = vmatmul.mubr.msk.bf16.gmra.mrb[4].mxu1 %vm734_vm1, %v512_v25  ;;  %v508_v14 = vpack.c.bf16 %v325_v11, %v322_v10  ;;  %v401_v15 = vld [vmem:[%s5747_s8 + $0x2e0] sm:$0xff]  ;;  %v407_v17 = vld [vmem:[%s5747_s8 + $0x310] sm:$0xff]  ;;  %v324_v20 = vld [vmem:[%s5747_s8 + $0x78] sm:$0xff] }
  0x2a   : > { %4851 = vmatprep.mubr.msk.bf16.mxu1 %vm734_vm1, %v515_v28  ;;  %v321_v19 = vld [vmem:[%s5747_s8 + $0x60] sm:$0xff]  ;;  %v548_v21 = vpack.c.bf16 %v404_v16, %v401_v15  ;;  %v328_v22 = vld [vmem:[%s5747_s8 + $0x98] sm:$0xff]  ;;  %v331_v23 = vld [vmem:[%s5747_s8 + $0xb0] sm:$0xff] }
  0x2b   : > { %846 = vmatpush1.bf16.msra.mxu0 %v5517_v8  ;;  %v318_v8 = vld [vmem:[%s5747_s8 + $0x48] sm:$0xff]  ;;  %v507_v25 = vpack.c.bf16 %v324_v20, %v321_v19  ;;  %v511_v26 = vpack.c.bf16 %v331_v23, %v328_v22  ;;  %v413_v27 = vld [vmem:[%s5747_s8 + $0x340] sm:$0xff]  ;;  %v416_v28 = vld [vmem:[%s5747_s8 + $0x358] sm:$0xff] }
  0x2c   : > { %847 = vmatprep.subr.bf16.mxu0 %v5632_v1  ;;  %v504_v13 = vpack.c.bf16 %v318_v8, %v315_v7  ;;  %v422_v30 = vld [vmem:[%s5747_s8 + $0x388] sm:$0xff]  ;;  %v327_v31 = vld [vmem:[%s5747_s8 + $0x90] sm:$0xff]  ;;  %v554_v33 = vpack.c.bf16 %v416_v28, %v413_v27  ;;  %v425_v39 = vld [vmem:[%s5747_s8 + $0x3a0] sm:$0xff] }
  0x2d   : > { %v330_v32 = vld [vmem:[%s5747_s8 + $0xa8] sm:$0xff]  ;;  %v428_v40 = vld [vmem:[%s5747_s8 + $0x3b8] sm:$0xff]  ;;  %v333_v41 = vld [vmem:[%s5747_s8 + $0xc0] sm:$0xff] }
  0x2e   : > { %v431_v48 = vld [vmem:[%s5747_s8 + $0x3d0] sm:$0xff]  ;;  %v434_v49 = vld [vmem:[%s5747_s8 + $0x3e8] sm:$0xff]  ;;  %v349_v57 = vld [vmem:[%s5747_s8 + $0x140] sm:$0xff] }
  0x2f   : > { %848 = vmatpush1.bf16.msra.mxu0 %v5518_v18  ;;  %v410_v18 = vld [vmem:[%s5747_s8 + $0x328] sm:$0xff]  ;;  %v345_v60 = vld [vmem:[%s5747_s8 + $0x120] sm:$0xff]  ;;  %v352_v62 = vld [vmem:[%s5747_s8 + $0x158] sm:$0xff] }
  0x30   : > { %849 = vmatprep.subr.bf16.mxu0 %v5632_v1  ;;  %v342_v54 = vld [vmem:[%s5747_s8 + $0x108] sm:$0xff]  ;;  %v355_v63 = vld [vmem:[%s5747_s8 + $0x170] sm:$0xff]  ;;  %v361_v11 = vld [vmem:[%s5747_s8 + $0x1a0] sm:$0xff] }
  0x31   : > { %4852 = vmatmul.mubr.msk.bf16.gmra.mrb[8].mxu1 %vm734_vm1, %v518_v35  ;;  %v337_v35 = vld [vmem:[%s5747_s8 + $0xe0] sm:$0xff]  ;;  %v346_v56 = vld [vmem:[%s5747_s8 + $0x128] sm:$0xff]  ;;  %v351_v8 = vld [vmem:[%s5747_s8 + $0x150] sm:$0xff] }
  0x32   : > { %4855 = vmatprep.mubr.msk.bf16.mxu1 %vm734_vm1, %v521_v36  ;;  %v520_v59 = vpack.c.bf16 %v349_v57, %v346_v56  ;;  %v446_v4 = vld [vmem:[%s5747_s8 + $0x448] sm:$0xff]  ;;  %v360_v15 = vld [vmem:[%s5747_s8 + $0x198] sm:$0xff]  ;;  %v455_v20 = vld [vmem:[%s5747_s8 + $0x490] sm:$0xff] }
  0x33   : > { %850 = vmatpush1.bf16.msra.mxu0 %v5519_v24  ;;  %v551_v24 = vpack.c.bf16 %v410_v18, %v407_v17  ;;  %v358_v10 = vld [vmem:[%s5747_s8 + $0x188] sm:$0xff]  ;;  %v364_v16 = vld [vmem:[%s5747_s8 + $0x1b8] sm:$0xff]  ;;  %v367_v17 = vld [vmem:[%s5747_s8 + $0x1d0] sm:$0xff] }
  0x34   : > { %851 = vmatprep.subr.bf16.mxu0 %v5632_v1  ;;  %v529_v19 = vpack.c.bf16 %v367_v17, %v364_v16  ;;  %v461_v23 = vld [vmem:[%s5747_s8 + $0x4c0] sm:$0xff]  ;;  %v366_v27 = vld [vmem:[%s5747_s8 + $0x1c8] sm:$0xff]  ;;  %v479_v56 = vld [vmem:[%s5747_s8 + $0x550] sm:$0xff] }
  0x35   : > { %v370_v28 = vld [vmem:[%s5747_s8 + $0x1e8] sm:$0xff]  ;;  %v399_v16 = vld [vmem:[%s5747_s8 + $0x2d0] sm:$0xff] }
  0x36   : > { %v482_v57 = vld [vmem:[%s5747_s8 + $0x568] sm:$0xff] }
  0x37   : > { %852 = vmatpush1.bf16.msra.mxu0 %v5520_v29  ;;  %v419_v29 = vld [vmem:[%s5747_s8 + $0x370] sm:$0xff]  ;;  %v402_v17 = vld [vmem:[%s5747_s8 + $0x2e8] sm:$0xff] }
  0x38   : > { %853 = vmatprep.subr.bf16.mxu0 %v5632_v1  ;;  %v557_v36 = vpack.c.bf16 %v422_v30, %v419_v29  ;;  %v373_v29 = vld [vmem:[%s5747_s8 + $0x200] sm:$0xff] }
  0x39   : > { %4856 = vmatmul.mubr.msk.bf16.gmra.mrb[12].mxu1 %vm734_vm1, %v524_v43  ;;  %v560_v43 = vpack.c.bf16 %v428_v40, %v425_v39  ;;  %v470_v39 = vld [vmem:[%s5747_s8 + $0x508] sm:$0xff] }
  0x3a   : > { %4859 = vmatprep.mubr.msk.bf16.mxu1 %vm734_vm1, %v527_v44  ;;  %v340_v44 = vld [vmem:[%s5747_s8 + $0xf8] sm:$0xff] }
  0x3b   : > { %854 = vmatpush1.bf16.msra.mxu0 %v5521_v34  ;;  %v334_v34 = vld [vmem:[%s5747_s8 + $0xc8] sm:$0xff] }
  0x3c   : > { %855 = vmatprep.subr.bf16.mxu0 %v5632_v1  ;;  %v514_v38 = vpack.c.bf16 %v337_v35, %v334_v34  ;;  %v376_v34 = vld [vmem:[%s5747_s8 + $0x218] sm:$0xff]  ;;  %v379_v35 = vld [vmem:[%s5747_s8 + $0x230] sm:$0xff] }
  0x3f   : > { %856 = vmatpush1.bf16.msra.mxu0 %v5522_v37  ;;  %v510_v37 = vpack.c.bf16 %v330_v32, %v327_v31  ;;  %v532_v31 = vpack.c.bf16 %v373_v29, %v370_v28  ;;  %v369_v32 = vld [vmem:[%s5747_s8 + $0x1e0] sm:$0xff]  ;;  %v411_v28 = vld [vmem:[%s5747_s8 + $0x330] sm:$0xff]  ;;  %v414_v29 = vld [vmem:[%s5747_s8 + $0x348] sm:$0xff] }
  0x40   : > { %857 = vmatprep.subr.bf16.mxu0 %v5632_v1 }
  0x41   : > { %4860 = vmatmul.mubr.msk.bf16.gmra.mrb[16].mxu1 %vm734_vm1, %v530_v51  ;;  %v437_v51 = vld [vmem:[%s5747_s8 + $0x400] sm:$0xff] }
  0x42   : > { %4863 = vmatprep.mubr.msk.bf16.mxu1 %vm734_vm1, %v533_v52  ;;  %v440_v52 = vld [vmem:[%s5747_s8 + $0x418] sm:$0xff] }
  0x43   : > { %858 = vmatpush1.bf16.msra.mxu0 %v5523_v42  ;;  %v336_v42 = vld [vmem:[%s5747_s8 + $0xd8] sm:$0xff]  ;;  %v566_v55 = vpack.c.bf16 %v440_v52, %v437_v51 }
  0x44   : > { %859 = vmatprep.subr.bf16.mxu0 %v5632_v1  ;;  %v513_v46 = vpack.c.bf16 %v336_v42, %v333_v41  ;;  %v473_v41 = vld [vmem:[%s5747_s8 + $0x520] sm:$0xff]  ;;  %v476_v42 = vld [vmem:[%s5747_s8 + $0x538] sm:$0xff] }
  0x45   : > { %v384_v51 = vld [vmem:[%s5747_s8 + $0x258] sm:$0xff] }
  0x46   : > { %v388_v52 = vld [vmem:[%s5747_s8 + $0x278] sm:$0xff] }
  0x47   : > { %860 = vmatpush1.bf16.msra.mxu0 %v5524_v45  ;;  %v343_v45 = vld [vmem:[%s5747_s8 + $0x110] sm:$0xff] }
  0x48   : > { %861 = vmatprep.subr.bf16.mxu0 %v5632_v1  ;;  %v517_v47 = vpack.c.bf16 %v343_v45, %v340_v44  ;;  %v375_v44 = vld [vmem:[%s5747_s8 + $0x210] sm:$0xff]  ;;  %v378_v45 = vld [vmem:[%s5747_s8 + $0x228] sm:$0xff] }
  0x49   : > { %4864 = vmatmul.mubr.msk.bf16.gmra.mrb[20].mxu1 %vm734_vm1, %v536_v61  ;;  %v348_v61 = vld [vmem:[%s5747_s8 + $0x138] sm:$0xff] }
  0x4a   : > { %4867 = vmatprep.mubr.msk.bf16.mxu1 %vm734_vm1, %v539_v0  ;;  %v519_v0 = vpack.c.bf16 %v348_v61, %v345_v60  ;;  %v587_v60 = vpack.c.bf16 %v482_v57, %v479_v56 }
  0x4b   : > { %862 = vmatpush1.bf16.msra.mxu0 %v5525_v50  ;;  %v563_v50 = vpack.c.bf16 %v434_v49, %v431_v48  ;;  %v534_v48 = vpack.c.bf16 %v378_v45, %v375_v44 }
  0x4c   : > { %863 = vmatprep.subr.bf16.mxu0 %v5632_v1 }
  0x4f   : > { %864 = vmatpush1.bf16.msra.mxu0 %v5526_v53  ;;  %v339_v53 = vld [vmem:[%s5747_s8 + $0xf0] sm:$0xff] }
  0x50   : > { %865 = vmatprep.subr.bf16.mxu0 %v5632_v1  ;;  %v398_v1 = vld [vmem:[%s5747_s8 + $0x2c8] sm:$0xff] }
  0x51   : > { %v545_v12 = vpack.c.bf16 %v398_v1, %v395_v6  ;;  %4868 = vmatmul.mubr.msk.bf16.gmra.mrb[24].mxu1 %vm734_vm1, %v542_v9  ;;  %v449_v6 = vld [vmem:[%s5747_s8 + $0x460] sm:$0xff]  ;;  %v452_v1 = vld [vmem:[%s5747_s8 + $0x478] sm:$0xff]  ;;  %v354_v9 = vld [vmem:[%s5747_s8 + $0x168] sm:$0xff] }
  0x52   : > { %v572_v7 = vpack.c.bf16 %v452_v1, %v449_v6  ;;  %v396_v6 = vld [vmem:[%s5747_s8 + $0x2b8] sm:$0xff] }
  0x53   : > { %866 = vmatpush1.bf16.msra.mxu0 %v5527_v58  ;;  %4871 = vmatprep.mubr.msk.bf16.mxu1 %vm734_vm1, %v545_v12  ;;  %v516_v58 = vpack.c.bf16 %v342_v54, %v339_v53  ;;  %v522_v12 = vpack.c.bf16 %v354_v9, %v351_v8  ;;  %v391_v53 = vld [vmem:[%s5747_s8 + $0x290] sm:$0xff]  ;;  %v400_v1 = vld [vmem:[%s5747_s8 + $0x2d8] sm:$0xff] }
  0x56   : > { %868 = vmatmul.mubr.bf16.vlgmr.msra.gmra.mrb[0].mxu0 %v501_v2  ;;  %v523_v2 = vpack.c.bf16 %v355_v63, %v352_v62  ;;  %v387_v62 = vld [vmem:[%s5747_s8 + $0x270] sm:$0xff]  ;;  %v390_v63 = vld [vmem:[%s5747_s8 + $0x288] sm:$0xff] }
  0x57   : > { %875 = vmatprep.mubr.bf16.mxu0 %v505_v3  ;;  %v443_v3 = vld [vmem:[%s5747_s8 + $0x430] sm:$0xff] }
  0x58   : > { %v569_v5 = vpack.c.bf16 %v446_v4, %v443_v3  ;;  %v540_v3 = vpack.c.bf16 %v390_v63, %v387_v62  ;;  %v448_v62 = vld [vmem:[%s5747_s8 + $0x458] sm:$0xff]  ;;  %v451_v63 = vld [vmem:[%s5747_s8 + $0x470] sm:$0xff] }
  0x59   : > { %4872 = vmatmul.mubr.msk.bf16.gmra.mrb[28].mxu1 %vm734_vm1, %v548_v21  ;;  %v458_v21 = vld [vmem:[%s5747_s8 + $0x4a8] sm:$0xff] }
  0x5a   : > { %4875 = vmatprep.mubr.msk.bf16.mxu1 %vm734_vm1, %v551_v24  ;;  %v575_v22 = vpack.c.bf16 %v458_v21, %v455_v20  ;;  %v464_v24 = vld [vmem:[%s5747_s8 + $0x4d8] sm:$0xff]  ;;  %v546_v20 = vpack.c.bf16 %v402_v17, %v399_v16 }
  0x5b   : > { %v456_v16 = vld [vmem:[%s5747_s8 + $0x498] sm:$0xff] }
  0x5e   : > { %876 = vmatmul.mubr.bf16.gmra.mrb[4].mxu0 %v504_v13  ;;  %v526_v13 = vpack.c.bf16 %v361_v11, %v358_v10  ;;  %v491_v10 = vld [vmem:[%s5747_s8 + $0x5b0] sm:$0xff]  ;;  %v494_v11 = vld [vmem:[%s5747_s8 + $0x5c8] sm:$0xff] }
  0x5f   : > { %883 = vmatprep.mubr.bf16.mxu0 %v508_v14  ;;  %v357_v14 = vld [vmem:[%s5747_s8 + $0x180] sm:$0xff] }
  0x60   : > { %v525_v18 = vpack.c.bf16 %v360_v15, %v357_v14  ;;  %v593_v14 = vpack.c.bf16 %v494_v11, %v491_v10 }
  0x61   : > { %4876 = vmatmul.mubr.msk.bf16.gmra.mrb[32].mxu1 %vm734_vm1, %v554_v33  ;;  %v372_v33 = vld [vmem:[%s5747_s8 + $0x1f8] sm:$0xff] }
  0x62   : > { %4879 = vmatprep.mubr.msk.bf16.mxu1 %vm734_vm1, %v557_v36  ;;  %v531_v36 = vpack.c.bf16 %v372_v33, %v369_v32  ;;  %v552_v32 = vpack.c.bf16 %v414_v29, %v411_v28  ;;  %v466_v28 = vld [vmem:[%s5747_s8 + $0x4e8] sm:$0xff]  ;;  %v469_v29 = vld [vmem:[%s5747_s8 + $0x500] sm:$0xff] }
  0x66   : > { %884 = vmatmul.mubr.bf16.gmra.mrb[8].mxu0 %v507_v25  ;;  %v578_v25 = vpack.c.bf16 %v464_v24, %v461_v23  ;;  %v408_v23 = vld [vmem:[%s5747_s8 + $0x318] sm:$0xff] }
  0x67   : > { %891 = vmatprep.mubr.bf16.mxu0 %v511_v26  ;;  %v363_v26 = vld [vmem:[%s5747_s8 + $0x1b0] sm:$0xff]  ;;  %v412_v24 = vld [vmem:[%s5747_s8 + $0x338] sm:$0xff] }
  0x68   : > { %v528_v30 = vpack.c.bf16 %v366_v27, %v363_v26 }
  0x69   : > { %4880 = vmatmul.mubr.msk.bf16.gmra.mrb[36].mxu1 %vm734_vm1, %v560_v43  ;;  %v584_v43 = vpack.c.bf16 %v476_v42, %v473_v41  ;;  %v426_v41 = vld [vmem:[%s5747_s8 + $0x3a8] sm:$0xff] }
  0x6a   : > { %4883 = vmatprep.mubr.msk.bf16.mxu1 %vm734_vm1, %v563_v50  ;;  %v381_v50 = vld [vmem:[%s5747_s8 + $0x240] sm:$0xff]  ;;  %v430_v42 = vld [vmem:[%s5747_s8 + $0x3c8] sm:$0xff] }
  0x6b   : > { %v537_v54 = vpack.c.bf16 %v384_v51, %v381_v50 }
  0x6e   : > { %892 = vmatmul.mubr.bf16.gmra.mrb[12].mxu0 %v510_v37  ;;  %v535_v37 = vpack.c.bf16 %v379_v35, %v376_v34  ;;  %v417_v34 = vld [vmem:[%s5747_s8 + $0x360] sm:$0xff]  ;;  %v420_v35 = vld [vmem:[%s5747_s8 + $0x378] sm:$0xff] }
  0x6f   : > { %899 = vmatprep.mubr.bf16.mxu0 %v514_v38  ;;  %v467_v38 = vld [vmem:[%s5747_s8 + $0x4f0] sm:$0xff] }
  0x70   : > { %v581_v40 = vpack.c.bf16 %v470_v39, %v467_v38  ;;  %v555_v38 = vpack.c.bf16 %v420_v35, %v417_v34  ;;  %v465_v35 = vld [vmem:[%s5747_s8 + $0x4e0] sm:$0xff] }
  0x71   : > { %4884 = vmatmul.mubr.msk.bf16.gmra.mrb[40].mxu1 %vm734_vm1, %v566_v55  ;;  %v541_v55 = vpack.c.bf16 %v391_v53, %v388_v52  ;;  %v435_v52 = vld [vmem:[%s5747_s8 + $0x3f0] sm:$0xff]  ;;  %v438_v53 = vld [vmem:[%s5747_s8 + $0x408] sm:$0xff] }
  0x72   : > { %4887 = vmatprep.mubr.msk.bf16.mxu1 %vm734_vm1, %v569_v5  ;;  %v393_v5 = vld [vmem:[%s5747_s8 + $0x2a0] sm:$0xff]  ;;  %v564_v56 = vpack.c.bf16 %v438_v53, %v435_v52 }
  0x73   : > { %v543_v8 = vpack.c.bf16 %v396_v6, %v393_v5  ;;  %v447_v6 = vld [vmem:[%s5747_s8 + $0x450] sm:$0xff]  ;;  %v481_v52 = vld [vmem:[%s5747_s8 + $0x560] sm:$0xff] }
  0x76   : > { %900 = vmatmul.mubr.bf16.gmra.mrb[16].mxu0 %v513_v46  ;;  %v382_v46 = vld [vmem:[%s5747_s8 + $0x248] sm:$0xff] }
  0x77   : > { %907 = vmatprep.mubr.bf16.mxu0 %v517_v47  ;;  %v385_v47 = vld [vmem:[%s5747_s8 + $0x260] sm:$0xff] }
  0x78   : > { %v538_v49 = vpack.c.bf16 %v385_v47, %v382_v46  ;;  %v429_v46 = vld [vmem:[%s5747_s8 + $0x3c0] sm:$0xff]  ;;  %v432_v47 = vld [vmem:[%s5747_s8 + $0x3d8] sm:$0xff] }
  0x79   : > { %4888 = vmatmul.mubr.msk.bf16.gmra.mrb[44].mxu1 %vm734_vm1, %v572_v7  ;;  %v403_v7 = vld [vmem:[%s5747_s8 + $0x2f0] sm:$0xff]  ;;  %v561_v50 = vpack.c.bf16 %v432_v47, %v429_v46 }
  0x7a   : > { %4891 = vmatprep.mubr.msk.bf16.mxu1 %vm734_vm1, %v575_v22  ;;  %v547_v9 = vpack.c.bf16 %v403_v7, %v400_v1  ;;  %v405_v22 = vld [vmem:[%s5747_s8 + $0x300] sm:$0xff]  ;;  %v450_v1 = vld [vmem:[%s5747_s8 + $0x468] sm:$0xff]  ;;  %v471_v47 = vld [vmem:[%s5747_s8 + $0x510] sm:$0xff] }
  0x7b   : > { %v549_v26 = vpack.c.bf16 %v408_v23, %v405_v22 }
  0x7e   : > { %908 = vmatmul.mubr.bf16.gmra.mrb[20].mxu0 %v516_v58  ;;  %v485_v58 = vld [vmem:[%s5747_s8 + $0x580] sm:$0xff] }
  0x7f   : > { %915 = vmatprep.mubr.bf16.mxu0 %v520_v59  ;;  %v488_v59 = vld [vmem:[%s5747_s8 + $0x598] sm:$0xff] }
  0x80   : > { %v590_v61 = vpack.c.bf16 %v488_v59, %v485_v58  ;;  %v441_v59 = vld [vmem:[%s5747_s8 + $0x420] sm:$0xff] }
  0x81   : > { %4892 = vmatmul.mubr.msk.bf16.gmra.mrb[48].mxu1 %vm734_vm1, %v578_v25  ;;  %v415_v25 = vld [vmem:[%s5747_s8 + $0x350] sm:$0xff] }
  0x82   : > { %4895 = vmatprep.mubr.msk.bf16.mxu1 %vm734_vm1, %v581_v40  ;;  %v553_v27 = vpack.c.bf16 %v415_v25, %v412_v24  ;;  %v423_v40 = vld [vmem:[%s5747_s8 + $0x390] sm:$0xff] }
  0x83   : > { %v558_v44 = vpack.c.bf16 %v426_v41, %v423_v40  ;;  %v459_v25 = vld [vmem:[%s5747_s8 + $0x4b0] sm:$0xff] }
  0x86   : > { %916 = vmatmul.mubr.bf16.gmra.mrb[24].mxu0 %v519_v0  ;;  %v394_v0 = vld [vmem:[%s5747_s8 + $0x2a8] sm:$0xff] }
  0x87   : > { %923 = vmatprep.mubr.bf16.mxu0 %v523_v2  ;;  %v397_v2 = vld [vmem:[%s5747_s8 + $0x2c0] sm:$0xff] }
  0x88   : > { %v544_v4 = vpack.c.bf16 %v397_v2, %v394_v0 }
  0x89   : > { %4896 = vmatmul.mubr.msk.bf16.gmra.mrb[52].mxu1 %vm734_vm1, %v584_v43  ;;  %v433_v43 = vld [vmem:[%s5747_s8 + $0x3e0] sm:$0xff] }
  0x8a   : > { %4899 = vmatprep.mubr.msk.bf16.mxu1 %vm734_vm1, %v587_v60  ;;  %v562_v45 = vpack.c.bf16 %v433_v43, %v430_v42  ;;  %v444_v60 = vld [vmem:[%s5747_s8 + $0x438] sm:$0xff] }
  0x8e   : > { %924 = vmatmul.mubr.bf16.gmra.mrb[28].mxu0 %v522_v12  ;;  %v497_v12 = vld [vmem:[%s5747_s8 + $0x5e0] sm:$0xff] }
  0x8f   : > { %931 = vmatprep.mubr.bf16.mxu0 %v526_v13  ;;  %v500_v13 = vld [vmem:[%s5747_s8 + $0x5f8] sm:$0xff] }
  0x90   : > { %v596_v15 = vpack.c.bf16 %v500_v13, %v497_v12  ;;  %v570_v12 = vpack.c.bf16 %v450_v1, %v447_v6 }
  0x91   : > { %4900 = vmatmul.mubr.msk.bf16.gmra.mrb[56].mxu1 %vm734_vm1, %v590_v61 }
  0x92   : > { %4903 = vmatprep.mubr.msk.bf16.mxu1 %vm734_vm1, %v593_v14 }
  0x96   : > { %932 = vmatmul.mubr.bf16.gmra.mrb[32].mxu0 %v525_v18  ;;  %v406_v18 = vld [vmem:[%s5747_s8 + $0x308] sm:$0xff] }
  0x97   : > { %939 = vmatprep.mubr.bf16.mxu0 %v529_v19  ;;  %v409_v19 = vld [vmem:[%s5747_s8 + $0x320] sm:$0xff] }
  0x98   : > { %v550_v21 = vpack.c.bf16 %v409_v19, %v406_v18  ;;  %v460_v18 = vld [vmem:[%s5747_s8 + $0x4b8] sm:$0xff]  ;;  %v463_v19 = vld [vmem:[%s5747_s8 + $0x4d0] sm:$0xff] }
  0x99   : > { %4904 = vmatmul.mubr.msk.bf16.gmra.mrb[60].mxu1 %vm734_vm1, %v596_v15  ;;  %v453_v15 = vld [vmem:[%s5747_s8 + $0x480] sm:$0xff]  ;;  %v577_v23 = vpack.c.bf16 %v463_v19, %v460_v18  ;;  %v484_v18 = vld [vmem:[%s5747_s8 + $0x578] sm:$0xff] }
  0x9a   : > { %v573_v22 = vpack.c.bf16 %v456_v16, %v453_v15  ;;  %v5532_v15 = vld [vmem:[%s8173_s2 + $0x18] sm:$0xff]  }
  0x9e   : > { %940 = vmatmul.mubr.bf16.gmra.mrb[36].mxu0 %v528_v30  ;;  %v418_v30 = vld [vmem:[%s5747_s8 + $0x368] sm:$0xff] }
  0x9f   : > { %947 = vmatprep.mubr.bf16.mxu0 %v532_v31  ;;  %v421_v31 = vld [vmem:[%s5747_s8 + $0x380] sm:$0xff] }
  0xa0   : > { %v556_v33 = vpack.c.bf16 %v421_v31, %v418_v30 }
  0xa6   : > { %948 = vmatmul.mubr.bf16.gmra.mrb[40].mxu0 %v531_v36  ;;  %v424_v36 = vld [vmem:[%s5747_s8 + $0x398] sm:$0xff] }
  0xa7   : > { %955 = vmatprep.mubr.bf16.mxu0 %v535_v37  ;;  %v427_v37 = vld [vmem:[%s5747_s8 + $0x3b0] sm:$0xff] }
  0xa8   : > { %v559_v39 = vpack.c.bf16 %v427_v37, %v424_v36  ;;  %v468_v36 = vld [vmem:[%s5747_s8 + $0x4f8] sm:$0xff] }
  0xa9   : > { %v579_v42 = vpack.c.bf16 %v468_v36, %v465_v35 }
  0xae   : > { %956 = vmatmul.mubr.bf16.gmra.mrb[44].mxu0 %v534_v48  ;;  %v436_v48 = vld [vmem:[%s5747_s8 + $0x3f8] sm:$0xff] }
  0xaf   : > { %963 = vmatprep.mubr.bf16.mxu0 %v538_v49  ;;  %v439_v49 = vld [vmem:[%s5747_s8 + $0x410] sm:$0xff] }
  0xb0   : > { %v565_v51 = vpack.c.bf16 %v439_v49, %v436_v48  ;;  %v474_v48 = vld [vmem:[%s5747_s8 + $0x528] sm:$0xff] }
  0xb6   : > { %964 = vmatmul.mubr.bf16.gmra.mrb[48].mxu0 %v537_v54  ;;  %v442_v54 = vld [vmem:[%s5747_s8 + $0x428] sm:$0xff] }
  0xb7   : > { %971 = vmatprep.mubr.bf16.mxu0 %v541_v55  ;;  %v445_v55 = vld [vmem:[%s5747_s8 + $0x440] sm:$0xff] }
  0xb8   : > { %v568_v57 = vpack.c.bf16 %v445_v55, %v442_v54 }
  0xbe   : > { %972 = vmatmul.mubr.bf16.gmra.mrb[52].mxu0 %v540_v3  ;;  %v567_v3 = vpack.c.bf16 %v444_v60, %v441_v59  ;;  %v582_v59 = vpack.c.bf16 %v474_v48, %v471_v47 }
  0xbf   : > { %979 = vmatprep.mubr.bf16.mxu0 %v544_v4  ;;  %v571_v4 = vpack.c.bf16 %v451_v63, %v448_v62  ;;  %v5531_v63 = vld [vmem:[%s8173_s2 + $0x10] sm:$0xff]  }
  0xc6   : > { %980 = vmatmul.mubr.bf16.gmra.mrb[56].mxu0 %v543_v8  ;;  %v454_v8 = vld [vmem:[%s5747_s8 + $0x488] sm:$0xff] }
  0xc7   : > { %987 = vmatprep.mubr.bf16.mxu0 %v547_v9  ;;  %v457_v9 = vld [vmem:[%s5747_s8 + $0x4a0] sm:$0xff] }
  0xc8   : > { %v574_v13 = vpack.c.bf16 %v457_v9, %v454_v8  ;;  %v477_v9 = vld [vmem:[%s5747_s8 + $0x540] sm:$0xff] }
  0xce   : > { %988 = vmatmul.mubr.bf16.gmra.mrb[60].mxu0 %v546_v20 }
  0xcf   : > { %995 = vmatprep.mubr.bf16.mxu0 %v550_v21 }
  0xd6   : > { %996 = vmatmul.mubr.bf16.gmra.mrb[64].mxu0 %v549_v26  ;;  %v462_v26 = vld [vmem:[%s5747_s8 + $0x4c8] sm:$0xff] }
  0xd7   : > { %1003 = vmatprep.mubr.bf16.mxu0 %v553_v27 }
  0xde   : > { %1004 = vmatmul.mubr.bf16.gmra.mrb[68].mxu0 %v552_v32  ;;  %v576_v32 = vpack.c.bf16 %v462_v26, %v459_v25 }
  0xdf   : > { %1011 = vmatprep.mubr.bf16.mxu0 %v556_v33  ;;  %v580_v33 = vpack.c.bf16 %v469_v29, %v466_v28 }
  0xe6   : > { %1012 = vmatmul.mubr.bf16.gmra.mrb[72].mxu0 %v555_v38  ;;  %v472_v38 = vld [vmem:[%s5747_s8 + $0x518] sm:$0xff] }
  0xe7   : > { %1019 = vmatprep.mubr.bf16.mxu0 %v559_v39  ;;  %v475_v39 = vld [vmem:[%s5747_s8 + $0x530] sm:$0xff] }
  0xe8   : > { %v583_v43 = vpack.c.bf16 %v475_v39, %v472_v38 }
  0xee   : > { %1020 = vmatmul.mubr.bf16.gmra.mrb[76].mxu0 %v558_v44  ;;  %v5529_v44 = vld [vmem:[%s8173_s2] sm:$0xff]  }
  0xef   : > { %1027 = vmatprep.mubr.bf16.mxu0 %v562_v45  ;;  %4907 = vmatprep.subr.bf16.mxu1 %v5529_v44  ;;  %v6052_v45 = vld [vmem:[%s8177_s6] ss:$0 sm:$0xff] }
  0xf0   : > { %4908 = vmatpush3.bf16.msra.mxu1 %v5529_v44  ;;  %v486_v44 = vld [vmem:[%s5747_s8 + $0x588] sm:$0xff] }
  0xf4   : > { %v5986_v58 = vpop.f32.mrb[0].mxu1 }
  0xf5   : > { %v5990_v61 = vpop.f32.mrb[1].mxu1 }
  0xf6   : > { %1028 = vmatmul.mubr.bf16.gmra.mrb[80].mxu0 %v561_v50  ;;  %v5994_v0 = vpop.f32.mrb[2].mxu1  ;;  %v5530_v50 = vld [vmem:[%s8173_s2 + $0x8] sm:$0xff]  }
  0xf7   : > { %1035 = vmatprep.mubr.bf16.mxu0 %v565_v51  ;;  %v5996_v2 = vpop.f32.mrb[3].mxu1  ;;  %v478_v51 = vld [vmem:[%s5747_s8 + $0x548] sm:$0xff]  ;;  %4909 = vmatprep.subr.bf16.mxu1 %v5530_v50 }
  0xf8   : > { %4910 = vmatpush3.bf16.msra.mxu1 %v5530_v50  ;;  %v586_v62 = vpack.c.bf16 %v481_v52, %v478_v51  ;;  %v490_v50 = vld [vmem:[%s5747_s8 + $0x5a8] sm:$0xff]  ;;  %v493_v51 = vld [vmem:[%s5747_s8 + $0x5c0] sm:$0xff] }
  0xf9   : > { %4911 = vmatprep.subr.bf16.mxu1 %v5531_v63 }
  0xfc   : > { %v5998_v5 = vpop.f32.mrb[4].mxu1  ;;  %4912 = vmatpush3.bf16.msra.mxu1 %v5531_v63  ;;  %v592_v63 = vpack.c.bf16 %v493_v51, %v490_v50 }
  0xfd   : > { %v6002_v7 = vpop.f32.mrb[5].mxu1  ;;  %4913 = vmatprep.subr.bf16.mxu1 %v5532_v15 }
  0xfe   : > { %1036 = vmatmul.mubr.bf16.gmra.mrb[84].mxu0 %v564_v56  ;;  %v6006_v10 = vpop.f32.mrb[6].mxu1 }
  0xff   : > { %1043 = vmatprep.mubr.bf16.mxu0 %v568_v57  ;;  %v6008_v11 = vpop.f32.mrb[7].mxu1 }
 0x100   : > { %4914 = vmatpush3.bf16.msra.mxu1 %v5532_v15 }
 0x104   : > { %v6010_v14 = vpop.f32.mrb[8].mxu1 }
 0x105   : > { %v6014_v17 = vpop.f32.mrb[9].mxu1 }
 0x106   : > { %1044 = vmatmul.mubr.bf16.gmra.mrb[88].mxu0 %v567_v3  ;;  %v6018_v20 = vpop.f32.mrb[10].mxu1 }
 0x107   : > { %1051 = vmatprep.mubr.bf16.mxu0 %v571_v4  ;;  %v6020_v21 = vpop.f32.mrb[11].mxu1 }
 0x10c   : > { %v6022_v24 = vpop.f32.mrb[12].mxu1 }
 0x10d   : > { %v6026_v27 = vpop.f32.mrb[13].mxu1 }
 0x10e   : > { %1052 = vmatmul.mubr.bf16.gmra.mrb[92].mxu0 %v570_v12  ;;  %v6030_v30 = vpop.f32.mrb[14].mxu1  ;;  %v480_v12 = vld [vmem:[%s5747_s8 + $0x558] sm:$0xff] }
 0x10f   : > { %1059 = vmatprep.mubr.bf16.mxu0 %v574_v13  ;;  %v6032_v31 = vpop.f32.mrb[15].mxu1  ;;  %v585_v29 = vpack.c.bf16 %v480_v12, %v477_v9 }
 0x114   : > { %v6034_v34 = vpop.f32.mrb[16].mxu1 }
 0x115   : > { %v6038_v37 = vpop.f32.mrb[17].mxu1 }
 0x116   : > { %1060 = vmatmul.mubr.bf16.gmra.mrb[96].mxu0 %v573_v22  ;;  %v6042_v40 = vpop.f32.mrb[18].mxu1 }
 0x117   : > { %1067 = vmatprep.mubr.bf16.mxu0 %v577_v23  ;;  %v6044_v41 = vpop.f32.mrb[19].mxu1 }
 0x11c   : > { %v6054_v46 = vpop.f32.mrb[20].mxu1 }
 0x11d   : > { %v6058_v49 = vpop.f32.mrb[21].mxu1 }
 0x11e   : > { %1068 = vmatmul.mubr.bf16.gmra.mrb[100].mxu0 %v576_v32  ;;  %v6065_v53 = vpop.f32.mrb[22].mxu1 }
 0x11f   : > { %1075 = vmatprep.mubr.bf16.mxu0 %v580_v33  ;;  %v6067_v55 = vpop.f32.mrb[23].mxu1 }
 0x124   : > { %v6080_v8 = vpop.f32.mrb[24].mxu1 }
 0x125   : > { %v6084_v13 = vpop.f32.mrb[25].mxu1 }
 0x126   : > { %1076 = vmatmul.mubr.bf16.gmra.mrb[104].mxu0 %v579_v42  ;;  %v6093_v19 = vpop.f32.mrb[26].mxu1 }
 0x127   : > { %1083 = vmatprep.mubr.bf16.mxu0 %v583_v43  ;;  %v6095_v23 = vpop.f32.mrb[27].mxu1  ;;  %v483_v43 = vld [vmem:[%s5747_s8 + $0x570] sm:$0xff] }
 0x129   : > { %v869_v54 = vpop.f32.mrb[0].mxu0 }
 0x12a   : > { %v870_v56 = vadd.f32 %v6052_v45, %v869_v54  ;;  %v871_v57 = vpop.f32.mrb[1].mxu0 }
 0x12b   : > { %v872_v60 = vpop.f32.mrb[2].mxu0 }
 0x12c   : > { %v873_v3 = vadd.f32 %v6052_v45, %v872_v60  ;;  %v6075_v4 = vadd.f32 %v5990_v61, %v870_v56  ;;  %v874_v6 = vpop.f32.mrb[3].mxu0  ;;  %v6110_v42 = vpop.f32.mrb[28].mxu1  ;;  %v588_v60 = vpack.c.bf16 %v486_v44, %v483_v43 }
 0x12d   : > { %v6114_v47 = vpop.f32.mrb[29].mxu1 }
 0x12e   : > { %v6078_v1 = vadd.f32 %v5996_v2, %v873_v3  ;;  %1084 = vmatmul.mubr.bf16.gmra.mrb[108].mxu0 %v582_v59  ;;  %v8193_v61 = vmax.f32 %v6075_v4, 0.0  ;;  %v487_v2 = vld [vmem:[%s5747_s8 + $0x590] sm:$0xff]  ;;  %v6120_v52 = vpop.f32.mrb[30].mxu1 }
 0x12f   : > { %1091 = vmatprep.mubr.bf16.mxu0 %v586_v62  ;;  %v589_v33 = vpack.c.bf16 %v487_v2, %v484_v18  ;;  %v489_v18 = vld [vmem:[%s5747_s8 + $0x5a0] sm:$0xff]  ;;  %v492_v2 = vld [vmem:[%s5747_s8 + $0x5b8] sm:$0xff] }
 0x130   : > { %v8194_v16 = vmax.f32 %v6078_v1, 0.0  ;;  %v591_v43 = vpack.c.bf16 %v492_v2, %v489_v18 }
 0x131   : > { %v877_v22 = vpop.f32.mrb[4].mxu0 }
 0x132   : > { %v878_v25 = vadd.f32 %v6052_v45, %v877_v22  ;;  %v879_v26 = vpop.f32.mrb[5].mxu0  ;;  %v5191_v28 = vpack.i.bf16 %v8194_v16, %v8193_v61 }
 0x133   : > { %v880_v32 = vpop.f32.mrb[6].mxu0 }
 0x134   : > { %v6103_v35 = vadd.f32 %v5986_v58, %v878_v25  ;;  %v881_v36 = vadd.f32 %v6052_v45, %v880_v32  ;;  %v882_v38 = vpop.f32.mrb[7].mxu0  ;;  %5192 = vrot.lane.b32.xlu0 %v5191_v28, %s5633_s22  ;;  %v499_v28 = vld [vmem:[%s5747_s8 + $0x5f0] sm:$0xff] }
 0x136   : > { %v6108_v39 = vadd.f32 %v5994_v0, %v881_v36  ;;  %1092 = vmatmul.mubr.bf16.gmra.mrb[112].mxu0 %v585_v29  ;;  %v8187_v58 = vmax.f32 %v6103_v35, 0.0  ;;  %v6122_v0 = vpop.f32.mrb[31].mxu1 }
 0x137   : > { %1099 = vmatprep.mubr.bf16.mxu0 %v589_v33  ;;  %v6137_v15 = vpop.f32.mrb[32].mxu1 }
 0x138   : > { %v8188_v48 = vmax.f32 %v6108_v39, 0.0  ;;  %v6141_v22 = vpop.f32.mrb[33].mxu1 }
 0x139   : > { %v885_v54 = vpop.f32.mrb[8].mxu0  ;;  %v6147_v29 = vpop.f32.mrb[34].mxu1 }
 0x13a   : > { %v886_v56 = vadd.f32 %v6052_v45, %v885_v54  ;;  %v887_v57 = vpop.f32.mrb[9].mxu0  ;;  %v5196_v59 = vpack.i.bf16 %v8188_v48, %v8187_v58 }
 0x13b   : > { %v888_v62 = vpop.f32.mrb[10].mxu0 }
 0x13c   : > { %v889_v3 = vadd.f32 %v6052_v45, %v888_v62  ;;  %v6131_v6 = vadd.f32 %v6002_v7, %v886_v56  ;;  %v890_v9 = vpop.f32.mrb[11].mxu0  ;;  %5197 = vrot.lane.b32.xlu0 %v5196_v59, %s5633_s22  ;;  %v496_v7 = vld [vmem:[%s5747_s8 + $0x5d8] sm:$0xff]  ;;  %v498_v62 = vld [vmem:[%s5747_s8 + $0x5e8] sm:$0xff] }
 0x13d   : > { %v595_v50 = vpack.c.bf16 %v499_v28, %v496_v7 }
 0x13e   : > { %v6135_v12 = vadd.f32 %v6008_v11, %v889_v3  ;;  %1100 = vmatmul.mubr.bf16.gmra.mrb[116].mxu0 %v588_v60  ;;  %v8185_v25 = vmax.f32 %v6131_v6, 0.0  ;;  %v6149_v11 = vpop.f32.mrb[35].mxu1  ;;  %v495_v60 = vld [vmem:[%s5747_s8 + $0x5d0] sm:$0xff] }
 0x13f   : > { %1107 = vmatprep.mubr.bf16.mxu0 %v592_v63  ;;  %v6164_v59 = vpop.f32.mrb[36].mxu1 }
 0x140   : > { %v8186_v26 = vmax.f32 %v6135_v12, 0.0  ;;  %v6168_v63 = vpop.f32.mrb[37].mxu1 }
 0x141   : > { %v893_v32 = vpop.f32.mrb[12].mxu0  ;;  %v6172_v9 = vpop.f32.mrb[38].mxu1 }
 0x142   : > { %v894_v33 = vadd.f32 %v6052_v45, %v893_v32  ;;  %v895_v36 = vpop.f32.mrb[13].mxu0  ;;  %v5201_v38 = vpack.i.bf16 %v8186_v26, %v8185_v25  ;;  %v6174_v2 = vpop.f32.mrb[39].mxu1  ;;  %v594_v32 = vpack.c.bf16 %v498_v62, %v495_v60 }
 0x143   : > { %v896_v44 = vpop.f32.mrb[14].mxu0 }
 0x144   : > { %v6157_v51 = vadd.f32 %v5998_v5, %v894_v33  ;;  %v897_v54 = vadd.f32 %v6052_v45, %v896_v44  ;;  %v898_v56 = vpop.f32.mrb[15].mxu0  ;;  %5202 = vrot.lane.b32.xlu1 %v5201_v38, %s5633_s22 }
 0x146   : > { %v6162_v57 = vadd.f32 %v6006_v10, %v897_v54  ;;  %1108 = vmatmul.mubr.bf16.gmra.mrb[120].mxu0 %v591_v43  ;;  %v8179_v3 = vmax.f32 %v6157_v51, 0.0 }
 0x147   : > { %1115 = vmatprep.mubr.bf16.mxu0 %v595_v50  ;;  %v6189_v50 = vpop.f32.mrb[40].mxu1 }
 0x148   : > { %v8180_v5 = vmax.f32 %v6162_v57, 0.0  ;;  %v6191_v54 = vpop.f32.mrb[41].mxu1 }
 0x149   : > { %v901_v18 = vpop.f32.mrb[16].mxu0  ;;  %v6195_v62 = vpop.f32.mrb[42].mxu1 }
 0x14a   : > { %v902_v10 = vadd.f32 %v6052_v45, %v901_v18  ;;  %v903_v7 = vpop.f32.mrb[17].mxu0  ;;  %v5206_v28 = vpack.i.bf16 %v8180_v5, %v8179_v3 }
 0x14b   : > { %v904_v33 = vpop.f32.mrb[18].mxu0 }
 0x14c   : > { %v905_v36 = vadd.f32 %v6052_v45, %v904_v33  ;;  %v6183_v38 = vadd.f32 %v6014_v17, %v902_v10  ;;  %v906_v43 = vpop.f32.mrb[19].mxu0  ;;  %5207 = vrot.lane.b32.xlu1 %v5206_v28, %s5633_s22  ;;  %v6197_v17 = vpop.f32.mrb[43].mxu1 }
 0x14e   : > { %v6187_v44 = vadd.f32 %v6020_v21, %v905_v36  ;;  %1116 = vmatmul.mubr.bf16.gmra.mrb[124].mxu0 %v594_v32  ;;  %v8181_v56 = vmax.f32 %v6183_v38, 0.0 }
 0x150   : > { %v8182_v60 = vmax.f32 %v6187_v44, 0.0 }
 0x151   : > { %v909_v18 = vpop.f32.mrb[20].mxu0 }
 0x152   : > { %v5211_v21 = vpack.i.bf16 %v8182_v60, %v8181_v56  ;;  %v910_v10 = vadd.f32 %v6052_v45, %v909_v18  ;;  %v911_v7 = vpop.f32.mrb[21].mxu0 }
 0x153   : > { %v912_v28 = vpop.f32.mrb[22].mxu0 }
 0x154   : > { %v6205_v32 = vadd.f32 %v6010_v14, %v910_v10  ;;  %v913_v33 = vadd.f32 %v6052_v45, %v912_v28  ;;  %v914_v36 = vpop.f32.mrb[23].mxu0  ;;  %5212 = vrot.lane.b32.xlu0 %v5211_v21, %s5633_s22  ;;  %v6219_v10 = vpop.f32.mrb[44].mxu1 }
 0x155   : > { %v6221_v21 = vpop.f32.mrb[45].mxu1 }
 0x156   : > { %v6210_v43 = vadd.f32 %v6018_v20, %v913_v33  ;;  %v8183_v3 = vmax.f32 %v6205_v32, 0.0 }
 0x158   : > { %v8184_v5 = vmax.f32 %v6210_v43, 0.0 }
 0x159   : > { %v917_v56 = vpop.f32.mrb[24].mxu0 }
 0x15a   : > { %v918_v18 = vadd.f32 %v6052_v45, %v917_v56  ;;  %v919_v7 = vpop.f32.mrb[25].mxu0  ;;  %v5216_v14 = vpack.i.bf16 %v8184_v5, %v8183_v3  ;;  %v6228_v56 = vpop.f32.mrb[46].mxu1 }
 0x15b   : > { %v920_v28 = vpop.f32.mrb[26].mxu0  ;;  %v6230_v7 = vpop.f32.mrb[47].mxu1 }
 0x15c   : > { %v921_v20 = vadd.f32 %v6052_v45, %v920_v28  ;;  %v6225_v33 = vadd.f32 %v6026_v27, %v918_v18  ;;  %v922_v36 = vpop.f32.mrb[27].mxu0  ;;  %5217 = vrot.lane.b32.xlu1 %v5216_v14, %s5633_s22 }
 0x15e   : > { %v6233_v60 = vadd.f32 %v6032_v31, %v921_v20  ;;  %v8189_v3 = vmax.f32 %v6225_v33, 0.0 }
 0x160   : > { %v8190_v5 = vmax.f32 %v6233_v60, 0.0 }
 0x161   : > { %v925_v25 = vpop.f32.mrb[28].mxu0 }
 0x162   : > { %v5221_v27 = vpack.i.bf16 %v8190_v5, %v8189_v3  ;;  %v926_v18 = vadd.f32 %v6052_v45, %v925_v25  ;;  %v927_v14 = vpop.f32.mrb[29].mxu0 }
 0x163   : > { %v928_v28 = vpop.f32.mrb[30].mxu0 }
 0x164   : > { %v6243_v36 = vadd.f32 %v6022_v24, %v926_v18  ;;  %v929_v31 = vadd.f32 %v6052_v45, %v928_v28  ;;  %v930_v20 = vpop.f32.mrb[31].mxu0  ;;  %5222 = vrot.lane.b32.xlu0 %v5221_v27, %s5633_s22  ;;  %v6257_v18 = vpop.f32.mrb[48].mxu1 }
 0x165   : > { %8256 = vst [vmem:[#allocation5_spill] sm:$0xff] %v6257_v18  ;;  %v6259_v27 = vpop.f32.mrb[49].mxu1 }
 0x166   : > { %v6248_v26 = vadd.f32 %v6030_v30, %v929_v31  ;;  %v8191_v58 = vmax.f32 %v6243_v36, 0.0 }
 0x168   : > { %v8192_v48 = vmax.f32 %v6248_v26, 0.0 }
 0x169   : > { %v933_v3 = vpop.f32.mrb[32].mxu0 }
 0x16a   : > { %v934_v25 = vadd.f32 %v6052_v45, %v933_v3  ;;  %v935_v14 = vpop.f32.mrb[33].mxu0  ;;  %v5226_v24 = vpack.i.bf16 %v8192_v48, %v8191_v58  ;;  %v6266_v3 = vpop.f32.mrb[50].mxu1 }
 0x16b   : > { %v936_v28 = vpop.f32.mrb[34].mxu0  ;;  %8257 = vst [vmem:[#allocation6_spill] sm:$0xff] %v6266_v3  ;;  %v6268_v14 = vpop.f32.mrb[51].mxu1 }
 0x16c   : > { %v937_v30 = vadd.f32 %v6052_v45, %v936_v28  ;;  %v6263_v31 = vadd.f32 %v6038_v37, %v934_v25  ;;  %v938_v20 = vpop.f32.mrb[35].mxu0  ;;  %5227 = vrot.lane.b32.xlu1 %v5226_v24, %s5633_s22 }
 0x16e   : > { %v6271_v5 = vadd.f32 %v6044_v41, %v937_v30  ;;  %v8195_v58 = vmax.f32 %v6263_v31, 0.0 }
 0x170   : > { %v8196_v48 = vmax.f32 %v6271_v5, 0.0 }
 0x171   : > { %v941_v61 = vpop.f32.mrb[36].mxu0 }
 0x172   : > { %v5231_v37 = vpack.i.bf16 %v8196_v48, %v8195_v58  ;;  %v942_v25 = vadd.f32 %v6052_v45, %v941_v61  ;;  %v943_v24 = vpop.f32.mrb[37].mxu0 }
 0x173   : > { %v944_v28 = vpop.f32.mrb[38].mxu0 }
 0x174   : > { %v6281_v20 = vadd.f32 %v6034_v34, %v942_v25  ;;  %v945_v41 = vadd.f32 %v6052_v45, %v944_v28  ;;  %v946_v30 = vpop.f32.mrb[39].mxu0  ;;  %5232 = vrot.lane.b32.xlu0 %v5231_v37, %s5633_s22  ;;  %v6295_v25 = vpop.f32.mrb[52].mxu1 }
 0x175   : > { %8258 = vst [vmem:[#allocation7_spill] sm:$0xff] %v6295_v25  ;;  %v6297_v37 = vpop.f32.mrb[53].mxu1 }
 0x176   : > { %v6286_v16 = vadd.f32 %v6042_v40, %v945_v41  ;;  %v8197_v3 = vmax.f32 %v6281_v20, 0.0  ;;  %8259 = vst [vmem:[#allocation8_spill] sm:$0xff] %v6297_v37 }
 0x178   : > { %v8198_v18 = vmax.f32 %v6286_v16, 0.0 }
 0x179   : > { %v949_v58 = vpop.f32.mrb[40].mxu0 }
 0x17a   : > { %v950_v61 = vadd.f32 %v6052_v45, %v949_v58  ;;  %v951_v24 = vpop.f32.mrb[41].mxu0  ;;  %v5236_v34 = vpack.i.bf16 %v8198_v18, %v8197_v3  ;;  %v6304_v58 = vpop.f32.mrb[54].mxu1 }
 0x17b   : > { %v952_v28 = vpop.f32.mrb[42].mxu0  ;;  %8260 = vst [vmem:[#allocation9_spill] sm:$0xff] %v6304_v58  ;;  %v6306_v24 = vpop.f32.mrb[55].mxu1 }
 0x17c   : > { %v953_v40 = vadd.f32 %v6052_v45, %v952_v28  ;;  %v6301_v41 = vadd.f32 %v6058_v49, %v950_v61  ;;  %v954_v30 = vpop.f32.mrb[43].mxu0  ;;  %5237 = vrot.lane.b32.xlu1 %v5236_v34, %s5633_s22  ;;  %8261 = vst [vmem:[#allocation10_spill] sm:$0xff] %v6306_v24 }
 0x17e   : > { %v6309_v48 = vadd.f32 %v6067_v55, %v953_v40  ;;  %v8199_v3 = vmax.f32 %v6301_v41, 0.0 }
 0x180   : > { %v8200_v18 = vmax.f32 %v6309_v48, 0.0 }
 0x181   : > { %v957_v25 = vpop.f32.mrb[44].mxu0 }
 0x182   : > { %v5241_v49 = vpack.i.bf16 %v8200_v18, %v8199_v3  ;;  %v958_v61 = vadd.f32 %v6052_v45, %v957_v25  ;;  %v959_v34 = vpop.f32.mrb[45].mxu0 }
 0x183   : > { %v960_v28 = vpop.f32.mrb[46].mxu0 }
 0x184   : > { %v6319_v30 = vadd.f32 %v6054_v46, %v958_v61  ;;  %v961_v55 = vadd.f32 %v6052_v45, %v960_v28  ;;  %v962_v40 = vpop.f32.mrb[47].mxu0  ;;  %5242 = vrot.lane.b32.xlu0 %v5241_v49, %s5633_s22  ;;  %v6333_v28 = vpop.f32.mrb[56].mxu1 }
 0x185   : > { %8262 = vst [vmem:[#allocation11_spill] sm:$0xff] %v6333_v28  ;;  %v6340_v40 = vpop.f32.mrb[57].mxu1 }
 0x186   : > { %v6324_v58 = vadd.f32 %v6065_v53, %v961_v55  ;;  %v8201_v24 = vmax.f32 %v6319_v30, 0.0  ;;  %8263 = vst [vmem:[#allocation12_spill] sm:$0xff] %v6340_v40 }
 0x188   : > { %v8202_v37 = vmax.f32 %v6324_v58, 0.0 }
 0x189   : > { %v965_v3 = vpop.f32.mrb[48].mxu0 }
 0x18a   : > { %v966_v25 = vadd.f32 %v6052_v45, %v965_v3  ;;  %v967_v34 = vpop.f32.mrb[49].mxu0  ;;  %v5246_v46 = vpack.i.bf16 %v8202_v37, %v8201_v24  ;;  %v6342_v3 = vpop.f32.mrb[58].mxu1 }
 0x18b   : > { %v968_v61 = vpop.f32.mrb[50].mxu0  ;;  %8264 = vst [vmem:[#allocation13_spill] sm:$0xff] %v6342_v3  ;;  %v6347_v18 = vpop.f32.mrb[59].mxu1 }
 0x18c   : > { %v969_v49 = vadd.f32 %v6052_v45, %v968_v61  ;;  %v6337_v53 = vadd.f32 %v6084_v13, %v966_v25  ;;  %v970_v55 = vpop.f32.mrb[51].mxu0  ;;  %5247 = vrot.lane.b32.xlu1 %v5246_v46, %s5633_s22  ;;  %8265 = vst [vmem:[#allocation14_spill] sm:$0xff] %v6347_v18 }
 0x18e   : > { %v6345_v34 = vadd.f32 %v6095_v23, %v969_v49  ;;  %v8203_v24 = vmax.f32 %v6337_v53, 0.0 }
 0x190   : > { %v8204_v37 = vmax.f32 %v6345_v34, 0.0 }
 0x191   : > { %v973_v61 = vpop.f32.mrb[52].mxu0 }
 0x192   : > { %v5251_v13 = vpack.i.bf16 %v8204_v37, %v8203_v24  ;;  %v974_v25 = vadd.f32 %v6052_v45, %v973_v61  ;;  %v975_v46 = vpop.f32.mrb[53].mxu0 }
 0x193   : > { %v976_v55 = vpop.f32.mrb[54].mxu0 }
 0x194   : > { %v6357_v3 = vadd.f32 %v6080_v8, %v974_v25  ;;  %v977_v23 = vadd.f32 %v6052_v45, %v976_v55  ;;  %v978_v49 = vpop.f32.mrb[55].mxu0  ;;  %5252 = vrot.lane.b32.xlu0 %v5251_v13, %s5633_s22  ;;  %v6371_v55 = vpop.f32.mrb[60].mxu1 }
 0x195   : > { %8266 = vst [vmem:[#allocation15_spill] sm:$0xff] %v6371_v55  ;;  %v6378_v49 = vpop.f32.mrb[61].mxu1 }
 0x196   : > { %v6362_v28 = vadd.f32 %v6093_v19, %v977_v23  ;;  %v8205_v18 = vmax.f32 %v6357_v3, 0.0  ;;  %8268 = vst [vmem:[#allocation17_spill] sm:$0xff] %v6378_v49 }
 0x198   : > { %v8206_v40 = vmax.f32 %v6362_v28, 0.0 }
 0x199   : > { %v981_v24 = vpop.f32.mrb[56].mxu0 }
 0x19a   : > { %v982_v61 = vadd.f32 %v6052_v45, %v981_v24  ;;  %v983_v46 = vpop.f32.mrb[57].mxu0  ;;  %v5256_v8 = vpack.i.bf16 %v8206_v40, %v8205_v18  ;;  %v6380_v24 = vpop.f32.mrb[62].mxu1 }
 0x19b   : > { %v984_v25 = vpop.f32.mrb[58].mxu0  ;;  %8269 = vst [vmem:[#allocation18_spill] sm:$0xff] %v6380_v24  ;;  %v6385_v37 = vpop.f32.mrb[63].mxu1 }
 0x19c   : > { %v985_v13 = vadd.f32 %v6052_v45, %v984_v25  ;;  %v6375_v19 = vadd.f32 %v6114_v47, %v982_v61  ;;  %v986_v23 = vpop.f32.mrb[59].mxu0  ;;  %5257 = vrot.lane.b32.xlu1 %v5256_v8, %s5633_s22  ;;  %8271 = vst [vmem:[#allocation20_spill] sm:$0xff] %v6385_v37 }
 0x19e   : > { %8267 = vst [vmem:[#allocation16_spill] sm:$0xff] %v6375_v19  ;;  %v6383_v46 = vadd.f32 %v6122_v0, %v985_v13  ;;  %v8208_v18 = vmax.f32 %v6375_v19, 0.0 }
 0x1a0   : > { %8270 = vst [vmem:[#allocation19_spill] sm:$0xff] %v6383_v46  ;;  %v8209_v40 = vmax.f32 %v6383_v46, 0.0 }
 0x1a1   : > { %v989_v25 = vpop.f32.mrb[60].mxu0 }
 0x1a2   : > { %v5261_v47 = vpack.i.bf16 %v8209_v40, %v8208_v18  ;;  %v990_v61 = vadd.f32 %v6052_v45, %v989_v25  ;;  %v991_v8 = vpop.f32.mrb[61].mxu0 }
 0x1a3   : > { %v992_v23 = vpop.f32.mrb[62].mxu0  ;;  %v8272_v8 = vmax.f32 %v6078_v1, 0.0 }
 0x1a4   : > { %v6395_v24 = vadd.f32 %v6110_v42, %v990_v61  ;;  %v993_v0 = vadd.f32 %v6052_v45, %v992_v23  ;;  %v994_v13 = vpop.f32.mrb[63].mxu0  ;;  %5262 = vrot.lane.b32.xlu0 %v5261_v47, %s5633_s22  ;;  %v8273_v42 = vmax.f32 %v6075_v4, 0.0 }
 0x1a6   : > { %v6400_v55 = vadd.f32 %v6120_v52, %v993_v0  ;;  %v5193_v37 = vpop.permute.xlu0 %5192  ;;  %v1443_v18 = vmax.f32 %v6395_v24, 0.0 }
 0x1a7   : > { %v5195_v49 = vunpack.i.h.bf16 %v5193_v37  ;;  %v5194_v19 = vunpack.i.l.bf16 %v5193_v37 }
 0x1a8   : > { %v1444_v25 = vmax.f32 %v6400_v55, 0.0 }
 0x1a9   : > { %v1734_v40 = vmax.f32 %v8272_v8, %v5195_v49  ;;  %v1733_v61 = vmax.f32 %v8273_v42, %v5194_v19  ;;  %v997_v23 = vpop.f32.mrb[64].mxu0 }
 0x1aa   : > { %v998_v13 = vadd.f32 %v6052_v45, %v997_v23  ;;  %v999_v47 = vpop.f32.mrb[65].mxu0  ;;  %v5266_v52 = vpack.i.bf16 %v1444_v25, %v1443_v18 }
 0x1ab   : > { %v1797_v37 = vpack.c.bf16 %v1734_v40, %v1733_v61  ;;  %v1000_v0 = vpop.f32.mrb[66].mxu0  ;;  %v8274_v61 = vmax.f32 %v6108_v39, 0.0 }
 0x1ac   : > { %v1001_v46 = vadd.f32 %v6052_v45, %v1000_v0  ;;  %v6415_v1 = vadd.f32 %v6141_v22, %v998_v13  ;;  %v1002_v49 = vpop.f32.mrb[67].mxu0  ;;  %5267 = vrot.lane.b32.xlu1 %v5266_v52, %s5633_s22  ;;  %v8275_v22 = vmax.f32 %v6103_v35, 0.0 }
 0x1ad   : > { %4915 = vmatprep.mubr.msk.bf16.mxu1 %vm1866_vm2, %v1797_v37 }
 0x1ae   : > { %v6420_v4 = vadd.f32 %v6149_v11, %v1001_v46  ;;  %v5198_v19 = vpop.permute.xlu0 %5197  ;;  %v8211_v23 = vmax.f32 %v6415_v1, 0.0 }
 0x1af   : > { %v5200_v8 = vunpack.i.h.bf16 %v5198_v19  ;;  %v5199_v42 = vunpack.i.l.bf16 %v5198_v19 }
 0x1b0   : > { %v1446_v40 = vmax.f32 %v6420_v4, 0.0 }
 0x1b1   : > { %v1736_v47 = vmax.f32 %v8274_v61, %v5200_v8  ;;  %v1735_v13 = vmax.f32 %v8275_v22, %v5199_v42  ;;  %v1005_v0 = vpop.f32.mrb[68].mxu0 }
 0x1b2   : > { %v5271_v11 = vpack.i.bf16 %v1446_v40, %v8211_v23  ;;  %v1006_v46 = vadd.f32 %v6052_v45, %v1005_v0  ;;  %v1007_v52 = vpop.f32.mrb[69].mxu0 }
 0x1b3   : > { %v1798_v37 = vpack.c.bf16 %v1736_v47, %v1735_v13  ;;  %v1008_v49 = vpop.f32.mrb[70].mxu0 }
 0x1b4   : > { %v6434_v19 = vadd.f32 %v6137_v15, %v1006_v46  ;;  %v1009_v39 = vadd.f32 %v6052_v45, %v1008_v49  ;;  %v1010_v8 = vpop.f32.mrb[71].mxu0  ;;  %5272 = vrot.lane.b32.xlu0 %v5271_v11, %s5633_s22  ;;  %v8276_v15 = vmax.f32 %v6135_v12, 0.0  ;;  %v8277_v46 = vmax.f32 %v6131_v6, 0.0 }
 0x1b5   : > { %4916 = vmatmul.mubr.msk.bf16.vlgmr.msra.gmra.mrb[64].mxu1 %vm1866_vm2, %v1798_v37 }
 0x1b6   : > { %v6440_v35 = vadd.f32 %v6147_v29, %v1009_v39  ;;  %v5203_v42 = vpop.permute.xlu1 %5202  ;;  %v1447_v0 = vmax.f32 %v6434_v19, 0.0 }
 0x1b7   : > { %v5205_v61 = vunpack.i.h.bf16 %v5203_v42  ;;  %v5204_v22 = vunpack.i.l.bf16 %v5203_v42 }
 0x1b8   : > { %v1448_v47 = vmax.f32 %v6440_v35, 0.0 }
 0x1b9   : > { %v1738_v13 = vmax.f32 %v8276_v15, %v5205_v61  ;;  %v1737_v52 = vmax.f32 %v8277_v46, %v5204_v22  ;;  %v1013_v49 = vpop.f32.mrb[72].mxu0 }
 0x1ba   : > { %v1014_v11 = vadd.f32 %v6052_v45, %v1013_v49  ;;  %v1015_v37 = vpop.f32.mrb[73].mxu0  ;;  %v5276_v29 = vpack.i.bf16 %v1448_v47, %v1447_v0 }
 0x1bb   : > { %v1799_v39 = vpack.c.bf16 %v1738_v13, %v1737_v52  ;;  %v1016_v8 = vpop.f32.mrb[74].mxu0  ;;  %v8278_v52 = vmax.f32 %v6162_v57, 0.0 }
 0x1bc   : > { %v1017_v42 = vadd.f32 %v6052_v45, %v1016_v8  ;;  %v6455_v23 = vadd.f32 %v6168_v63, %v1014_v11  ;;  %v1018_v12 = vpop.f32.mrb[75].mxu0  ;;  %5277 = vrot.lane.b32.xlu1 %v5276_v29, %s5633_s22  ;;  %v8279_v63 = vmax.f32 %v6157_v51, 0.0 }
 0x1bd   : > { %4919 = vmatprep.mubr.msk.bf16.mxu1 %vm1866_vm2, %v1799_v39 }
 0x1be   : > { %v6460_v6 = vadd.f32 %v6174_v2, %v1017_v42  ;;  %v5208_v61 = vpop.permute.xlu1 %5207  ;;  %v1449_v46 = vmax.f32 %v6455_v23, 0.0 }
 0x1bf   : > { %v5210_v22 = vunpack.i.h.bf16 %v5208_v61  ;;  %v5209_v15 = vunpack.i.l.bf16 %v5208_v61 }
 0x1c0   : > { %v1450_v13 = vmax.f32 %v6460_v6, 0.0 }
 0x1c1   : > { %v1740_v49 = vmax.f32 %v8278_v52, %v5210_v22  ;;  %v1739_v11 = vmax.f32 %v8279_v63, %v5209_v15  ;;  %v1021_v37 = vpop.f32.mrb[76].mxu0 }
 0x1c2   : > { %v5281_v2 = vpack.i.bf16 %v1450_v13, %v1449_v46  ;;  %v1022_v29 = vadd.f32 %v6052_v45, %v1021_v37  ;;  %v1023_v39 = vpop.f32.mrb[77].mxu0  ;;  %v8281_v37 = vmax.f32 %v6183_v38, 0.0 }
 0x1c3   : > { %v1800_v8 = vpack.c.bf16 %v1740_v49, %v1739_v11  ;;  %v1024_v42 = vpop.f32.mrb[78].mxu0 }
 0x1c4   : > { %v6474_v12 = vadd.f32 %v6164_v59, %v1022_v29  ;;  %v1025_v57 = vadd.f32 %v6052_v45, %v1024_v42  ;;  %v1026_v61 = vpop.f32.mrb[79].mxu0  ;;  %5282 = vrot.lane.b32.xlu0 %v5281_v2, %s5633_s22  ;;  %v8280_v59 = vmax.f32 %v6187_v44, 0.0 }
 0x1c5   : > { %4920 = vmatmul.mubr.msk.bf16.gmra.mrb[68].mxu1 %vm1866_vm2, %v1800_v8 }
 0x1c6   : > { %v6480_v51 = vadd.f32 %v6172_v9, %v1025_v57  ;;  %v5213_v22 = vpop.permute.xlu0 %5212  ;;  %v1451_v63 = vmax.f32 %v6474_v12, 0.0 }
 0x1c7   : > { %v5215_v15 = vunpack.i.h.bf16 %v5213_v22  ;;  %v5214_v52 = vunpack.i.l.bf16 %v5213_v22 }
 0x1c8   : > { %v1452_v49 = vmax.f32 %v6480_v51, 0.0 }
 0x1c9   : > { %v1742_v11 = vmax.f32 %v8280_v59, %v5215_v15  ;;  %v1741_v29 = vmax.f32 %v8281_v37, %v5214_v52  ;;  %v1029_v39 = vpop.f32.mrb[80].mxu0 }
 0x1ca   : > { %v1030_v2 = vadd.f32 %v6052_v45, %v1029_v39  ;;  %v1031_v8 = vpop.f32.mrb[81].mxu0  ;;  %v5286_v9 = vpack.i.bf16 %v1452_v49, %v1451_v63 }
 0x1cb   : > { %v1801_v42 = vpack.c.bf16 %v1742_v11, %v1741_v29  ;;  %v1032_v57 = vpop.f32.mrb[82].mxu0  ;;  %v8282_v29 = vmax.f32 %v6210_v43, 0.0 }
 0x1cc   : > { %v1033_v61 = vadd.f32 %v6052_v45, %v1032_v57  ;;  %v6495_v22 = vadd.f32 %v6191_v54, %v1030_v2  ;;  %v1034_v44 = vpop.f32.mrb[83].mxu0  ;;  %5287 = vrot.lane.b32.xlu1 %v5286_v9, %s5633_s22  ;;  %v8283_v54 = vmax.f32 %v6205_v32, 0.0 }
 0x1cd   : > { %4923 = vmatprep.mubr.msk.bf16.mxu1 %vm1866_vm2, %v1801_v42 }
 0x1ce   : > { %v6500_v38 = vadd.f32 %v6197_v17, %v1033_v61  ;;  %v5218_v15 = vpop.permute.xlu1 %5217  ;;  %v1453_v37 = vmax.f32 %v6495_v22, 0.0 }
 0x1cf   : > { %v5220_v52 = vunpack.i.h.bf16 %v5218_v15  ;;  %v5219_v59 = vunpack.i.l.bf16 %v5218_v15 }
 0x1d0   : > { %v1454_v11 = vmax.f32 %v6500_v38, 0.0 }
 0x1d1   : > { %v1744_v39 = vmax.f32 %v8282_v29, %v5220_v52  ;;  %v1743_v2 = vmax.f32 %v8283_v54, %v5219_v59  ;;  %v1037_v8 = vpop.f32.mrb[84].mxu0 }
 0x1d2   : > { %v5291_v17 = vpack.i.bf16 %v1454_v11, %v1453_v37  ;;  %v1038_v9 = vadd.f32 %v6052_v45, %v1037_v8  ;;  %v1039_v42 = vpop.f32.mrb[85].mxu0  ;;  %v8285_v8 = vmax.f32 %v6225_v33, 0.0 }
 0x1d3   : > { %v1802_v57 = vpack.c.bf16 %v1744_v39, %v1743_v2  ;;  %v1040_v61 = vpop.f32.mrb[86].mxu0 }
 0x1d4   : > { %v6514_v44 = vadd.f32 %v6189_v50, %v1038_v9  ;;  %v1041_v43 = vadd.f32 %v6052_v45, %v1040_v61  ;;  %v1042_v15 = vpop.f32.mrb[87].mxu0  ;;  %5292 = vrot.lane.b32.xlu0 %v5291_v17, %s5633_s22  ;;  %v8284_v50 = vmax.f32 %v6233_v60, 0.0 }
 0x1d5   : > { %4924 = vmatmul.mubr.msk.bf16.gmra.mrb[72].mxu1 %vm1866_vm2, %v1802_v57 }
 0x1d6   : > { %v6520_v32 = vadd.f32 %v6195_v62, %v1041_v43  ;;  %v5223_v52 = vpop.permute.xlu0 %5222  ;;  %v1455_v54 = vmax.f32 %v6514_v44, 0.0 }
 0x1d7   : > { %v5225_v59 = vunpack.i.h.bf16 %v5223_v52  ;;  %v5224_v29 = vunpack.i.l.bf16 %v5223_v52 }
 0x1d8   : > { %v1456_v39 = vmax.f32 %v6520_v32, 0.0 }
 0x1d9   : > { %v1746_v2 = vmax.f32 %v8284_v50, %v5225_v59  ;;  %v1745_v9 = vmax.f32 %v8285_v8, %v5224_v29  ;;  %v1045_v42 = vpop.f32.mrb[88].mxu0 }
 0x1da   : > { %v1046_v17 = vadd.f32 %v6052_v45, %v1045_v42  ;;  %v1047_v57 = vpop.f32.mrb[89].mxu0  ;;  %v5296_v62 = vpack.i.bf16 %v1456_v39, %v1455_v54 }
 0x1db   : > { %v1803_v61 = vpack.c.bf16 %v1746_v2, %v1745_v9  ;;  %v1048_v43 = vpop.f32.mrb[90].mxu0  ;;  %v8286_v9 = vmax.f32 %v6248_v26, 0.0 }
 0x1dc   : > { %v1049_v15 = vadd.f32 %v6052_v45, %v1048_v43  ;;  %v6535_v52 = vadd.f32 %v6221_v21, %v1046_v17  ;;  %v1050_v60 = vpop.f32.mrb[91].mxu0  ;;  %5297 = vrot.lane.b32.xlu1 %v5296_v62, %s5633_s22  ;;  %v8287_v21 = vmax.f32 %v6243_v36, 0.0 }
 0x1dd   : > { %4927 = vmatprep.mubr.msk.bf16.mxu1 %vm1866_vm2, %v1803_v61 }
 0x1de   : > { %v6540_v33 = vadd.f32 %v6230_v7, %v1049_v15  ;;  %v5228_v59 = vpop.permute.xlu1 %5227  ;;  %v8224_v8 = vmax.f32 %v6535_v52, 0.0 }
 0x1df   : > { %v5230_v29 = vunpack.i.h.bf16 %v5228_v59  ;;  %v5229_v50 = vunpack.i.l.bf16 %v5228_v59 }
 0x1e0   : > { %v1458_v2 = vmax.f32 %v6540_v33, 0.0 }
 0x1e1   : > { %v1748_v42 = vmax.f32 %v8286_v9, %v5230_v29  ;;  %v1747_v17 = vmax.f32 %v8287_v21, %v5229_v50  ;;  %v1053_v57 = vpop.f32.mrb[92].mxu0 }
 0x1e2   : > { %v5301_v7 = vpack.i.bf16 %v1458_v2, %v8224_v8  ;;  %v1054_v62 = vadd.f32 %v6052_v45, %v1053_v57  ;;  %v1055_v61 = vpop.f32.mrb[93].mxu0  ;;  %v8289_v57 = vmax.f32 %v6263_v31, 0.0 }
 0x1e3   : > { %v1804_v43 = vpack.c.bf16 %v1748_v42, %v1747_v17  ;;  %v1056_v15 = vpop.f32.mrb[94].mxu0 }
 0x1e4   : > { %v6554_v60 = vadd.f32 %v6219_v10, %v1054_v62  ;;  %v1057_v26 = vadd.f32 %v6052_v45, %v1056_v15  ;;  %v1058_v59 = vpop.f32.mrb[95].mxu0  ;;  %5302 = vrot.lane.b32.xlu0 %v5301_v7, %s5633_s22  ;;  %v8288_v10 = vmax.f32 %v6271_v5, 0.0 }
 0x1e5   : > { %4928 = vmatmul.mubr.msk.bf16.gmra.mrb[76].mxu1 %vm1866_vm2, %v1804_v43 }
 0x1e6   : > { %v6560_v36 = vadd.f32 %v6228_v56, %v1057_v26  ;;  %v5233_v29 = vpop.permute.xlu0 %5232  ;;  %v8214_v21 = vmax.f32 %v6554_v60, 0.0 }
 0x1e7   : > { %v5235_v50 = vunpack.i.h.bf16 %v5233_v29  ;;  %v5234_v9 = vunpack.i.l.bf16 %v5233_v29 }
 0x1e8   : > { %v8223_v42 = vmax.f32 %v6560_v36, 0.0  ;;  %v8320_v44 = vmax.f32 %v6560_v36, 0.0 }
 0x1e9   : > { %v1750_v17 = vmax.f32 %v8288_v10, %v5235_v50  ;;  %v1749_v62 = vmax.f32 %v8289_v57, %v5234_v9  ;;  %v1061_v61 = vpop.f32.mrb[96].mxu0 }
 0x1ea   : > { %v1062_v7 = vadd.f32 %v6052_v45, %v1061_v61  ;;  %v1063_v43 = vpop.f32.mrb[97].mxu0  ;;  %v5306_v56 = vpack.i.bf16 %v8223_v42, %v8214_v21  ;;  %v8314_v42 = vld [vmem:[#allocation17_spill] sm:$0xff] }
 0x1eb   : > { %v1805_v15 = vpack.c.bf16 %v1750_v17, %v1749_v62  ;;  %v1064_v26 = vpop.f32.mrb[98].mxu0  ;;  %v8290_v62 = vmax.f32 %v6286_v16, 0.0 }
 0x1ec   : > { %v1065_v59 = vadd.f32 %v6052_v45, %v1064_v26  ;;  %v6575_v29 = vadd.f32 %v6259_v27, %v1062_v7  ;;  %v1066_v5 = vpop.f32.mrb[99].mxu0  ;;  %5307 = vrot.lane.b32.xlu1 %v5306_v56, %s5633_s22  ;;  %v8291_v27 = vmax.f32 %v6281_v20, 0.0  ;;  %v8293_v20 = vld [vmem:[#allocation6_spill] sm:$0xff] }
 0x1ed   : > { %4931 = vmatprep.mubr.msk.bf16.mxu1 %vm1866_vm2, %v1805_v15  ;;  %v8292_v5 = vld [vmem:[#allocation5_spill] sm:$0xff] }
 0x1ee   : > { %v6580_v31 = vadd.f32 %v6268_v14, %v1065_v59  ;;  %v5238_v50 = vpop.permute.xlu1 %5237  ;;  %v8212_v57 = vmax.f32 %v6575_v29, 0.0 }
 0x1ef   : > { %v5240_v9 = vunpack.i.h.bf16 %v5238_v50  ;;  %v5239_v10 = vunpack.i.l.bf16 %v5238_v50 }
 0x1f0   : > { %v8213_v17 = vmax.f32 %v6580_v31, 0.0 }
 0x1f1   : > { %v1752_v61 = vmax.f32 %v8290_v62, %v5240_v9  ;;  %v1751_v7 = vmax.f32 %v8291_v27, %v5239_v10  ;;  %v1069_v43 = vpop.f32.mrb[100].mxu0 }
 0x1f2   : > { %v5311_v14 = vpack.i.bf16 %v8213_v17, %v8212_v57  ;;  %v1070_v56 = vadd.f32 %v6052_v45, %v1069_v43  ;;  %v1071_v15 = vpop.f32.mrb[101].mxu0  ;;  %v8296_v17 = vld [vmem:[#allocation8_spill] sm:$0xff] }
 0x1f3   : > { %v1806_v26 = vpack.c.bf16 %v1752_v61, %v1751_v7  ;;  %v1072_v59 = vpop.f32.mrb[102].mxu0  ;;  %v8294_v7 = vmax.f32 %v6309_v48, 0.0  ;;  %v8295_v15 = vmax.f32 %v6301_v41, 0.0  ;;  %v8297_v41 = vld [vmem:[#allocation10_spill] sm:$0xff] }
 0x1f4   : > { %v6594_v50 = vadd.f32 %v8292_v5, %v1070_v56  ;;  %v1073_v16 = vadd.f32 %v6052_v45, %v1072_v59  ;;  %v1074_v9 = vpop.f32.mrb[103].mxu0  ;;  %5312 = vrot.lane.b32.xlu0 %v5311_v14, %s5633_s22 }
 0x1f5   : > { %4932 = vmatmul.mubr.msk.bf16.gmra.mrb[80].mxu1 %vm1866_vm2, %v1806_v26 }
 0x1f6   : > { %v6600_v10 = vadd.f32 %v8293_v20, %v1073_v16  ;;  %v5243_v62 = vpop.permute.xlu0 %5242  ;;  %v8215_v43 = vmax.f32 %v6594_v50, 0.0 }
 0x1f7   : > { %v5245_v27 = vunpack.i.h.bf16 %v5243_v62  ;;  %v5244_v57 = vunpack.i.l.bf16 %v5243_v62 }
 0x1f8   : > { %v8222_v61 = vmax.f32 %v6600_v10, 0.0 }
 0x1f9   : > { %v1754_v56 = vmax.f32 %v8294_v7, %v5245_v27  ;;  %v1753_v59 = vmax.f32 %v8295_v15, %v5244_v57  ;;  %v1077_v5 = vpop.f32.mrb[104].mxu0 }
 0x1fa   : > { %v1078_v14 = vadd.f32 %v6052_v45, %v1077_v5  ;;  %v1079_v26 = vpop.f32.mrb[105].mxu0  ;;  %v5316_v16 = vpack.i.bf16 %v8222_v61, %v8215_v43 }
 0x1fb   : > { %v1807_v9 = vpack.c.bf16 %v1754_v56, %v1753_v59  ;;  %v1080_v20 = vpop.f32.mrb[106].mxu0  ;;  %v8298_v59 = vmax.f32 %v6324_v58, 0.0 }
 0x1fc   : > { %v1081_v62 = vadd.f32 %v6052_v45, %v1080_v20  ;;  %v6615_v21 = vadd.f32 %v8296_v17, %v1078_v14  ;;  %5317 = vrot.lane.b32.xlu1 %v5316_v16, %s5633_s22  ;;  %v1082_v48 = vpop.f32.mrb[107].mxu0  ;;  %v8299_v17 = vmax.f32 %v6319_v30, 0.0 }
 0x1fd   : > { %4935 = vmatprep.mubr.msk.bf16.mxu1 %vm1866_vm2, %v1807_v9 }
 0x1fe   : > { %v6620_v57 = vadd.f32 %v8297_v41, %v1081_v62  ;;  %v5248_v27 = vpop.permute.xlu1 %5247  ;;  %v8216_v5 = vmax.f32 %v6615_v21, 0.0 }
 0x1ff   : > { %v5250_v7 = vunpack.i.h.bf16 %v5248_v27  ;;  %v5249_v15 = vunpack.i.l.bf16 %v5248_v27  ;;  %v8300_v27 = vld [vmem:[#allocation7_spill] sm:$0xff] }
 0x200   : > { %v8219_v56 = vmax.f32 %v6620_v57, 0.0 }
 0x201   : > { %v1756_v26 = vmax.f32 %v8298_v59, %v5250_v7  ;;  %v1755_v14 = vmax.f32 %v8299_v17, %v5249_v15  ;;  %v1085_v16 = vpop.f32.mrb[108].mxu0  ;;  %v8301_v7 = vld [vmem:[#allocation9_spill] sm:$0xff] }
 0x202   : > { %v5321_v9 = vpack.i.bf16 %v8219_v56, %v8216_v5  ;;  %v1086_v20 = vadd.f32 %v6052_v45, %v1085_v16  ;;  %v1087_v62 = vpop.f32.mrb[109].mxu0 }
 0x203   : > { %v1808_v48 = vpack.c.bf16 %v1756_v26, %v1755_v14  ;;  %v1088_v41 = vpop.f32.mrb[110].mxu0  ;;  %v8302_v14 = vmax.f32 %v6345_v34, 0.0 }
 0x204   : > { %v6634_v43 = vadd.f32 %v8300_v27, %v1086_v20  ;;  %v1089_v58 = vadd.f32 %v6052_v45, %v1088_v41  ;;  %5322 = vrot.lane.b32.xlu0 %v5321_v9, %s5633_s22  ;;  %v1090_v30 = vpop.f32.mrb[111].mxu0  ;;  %v8303_v45 = vmax.f32 %v6337_v53, 0.0  ;;  %v8304_v53 = vld [vmem:[#allocation12_spill] sm:$0xff] }
 0x205   : > { %4936 = vmatmul.mubr.msk.bf16.gmra.mrb[84].mxu1 %vm1866_vm2, %v1808_v48  ;;  %v6651_v48 = vld [vmem:[%s8177_s6] ss:$0 sm:$0xff] }
 0x206   : > { %v6640_v15 = vadd.f32 %v8301_v7, %v1089_v58  ;;  %v5253_v59 = vpop.permute.xlu0 %5252  ;;  %v8217_v16 = vmax.f32 %v6634_v43, 0.0 }
 0x207   : > { %v5255_v17 = vunpack.i.h.bf16 %v5253_v59  ;;  %v5254_v5 = vunpack.i.l.bf16 %v5253_v59 }
 0x208   : > { %v8218_v26 = vmax.f32 %v6640_v15, 0.0 }
 0x209   : > { %v1758_v20 = vmax.f32 %v8302_v14, %v5255_v17  ;;  %v1757_v62 = vmax.f32 %v8303_v45, %v5254_v5  ;;  %v1093_v9 = vpop.f32.mrb[112].mxu0  ;;  %v8305_v17 = vld [vmem:[#allocation14_spill] sm:$0xff] }
 0x20a   : > { %v1094_v41 = vadd.f32 %v6651_v48, %v1093_v9  ;;  %v1095_v27 = vpop.f32.mrb[113].mxu0  ;;  %v5326_v58 = vpack.i.bf16 %v8218_v26, %v8217_v16  ;;  %v8308_v26 = vld [vmem:[#allocation11_spill] sm:$0xff] }
 0x20b   : > { %v1809_v30 = vpack.c.bf16 %v1758_v20, %v1757_v62  ;;  %v1096_v34 = vpop.f32.mrb[114].mxu0  ;;  %v8306_v62 = vmax.f32 %v6362_v28, 0.0 }
 0x20c   : > { %v1097_v7 = vadd.f32 %v6651_v48, %v1096_v34  ;;  %v6660_v5 = vadd.f32 %v8304_v53, %v1094_v41  ;;  %5327 = vrot.lane.b32.xlu1 %v5326_v58, %s5633_s22  ;;  %v1098_v59 = vpop.f32.mrb[115].mxu0  ;;  %v8307_v41 = vmax.f32 %v6357_v3, 0.0 }
 0x20d   : > { %4939 = vmatprep.mubr.msk.bf16.mxu1 %vm1866_vm2, %v1809_v30 }
 0x20e   : > { %v6665_v14 = vadd.f32 %v8305_v17, %v1097_v7  ;;  %v5258_v45 = vpop.permute.xlu1 %5257  ;;  %v8220_v16 = vmax.f32 %v6660_v5, 0.0 }
 0x20f   : > { %v5260_v9 = vunpack.i.h.bf16 %v5258_v45  ;;  %v5259_v27 = vunpack.i.l.bf16 %v5258_v45 }
 0x210   : > { %v8221_v20 = vmax.f32 %v6665_v14, 0.0 }
 0x211   : > { %v1760_v34 = vmax.f32 %v8306_v62, %v5260_v9  ;;  %v1759_v53 = vmax.f32 %v8307_v41, %v5259_v27  ;;  %v1101_v58 = vpop.f32.mrb[116].mxu0  ;;  %v8309_v9 = vld [vmem:[#allocation13_spill] sm:$0xff] }
 0x212   : > { %v5331_v30 = vpack.i.bf16 %v8221_v20, %v8220_v16  ;;  %v1102_v7 = vadd.f32 %v6651_v48, %v1101_v58  ;;  %v1103_v59 = vpop.f32.mrb[117].mxu0 }
 0x213   : > { %v1810_v17 = vpack.c.bf16 %v1760_v34, %v1759_v53  ;;  %v1104_v45 = vpop.f32.mrb[118].mxu0  ;;  %v8310_v53 = vld [vmem:[#allocation19_spill] sm:$0xff]  ;;  %v8312_v59 = vld [vmem:[#allocation16_spill] sm:$0xff] }
 0x214   : > { %v6679_v56 = vadd.f32 %v8308_v26, %v1102_v7  ;;  %v1105_v28 = vadd.f32 %v6651_v48, %v1104_v45  ;;  %5332 = vrot.lane.b32.xlu0 %v5331_v30, %s5633_s22  ;;  %v1106_v3 = vpop.f32.mrb[119].mxu0  ;;  %v8311_v26 = vmax.f32 %v8310_v53, 0.0  ;;  %v8313_v45 = vmax.f32 %v8312_v59, 0.0 }
 0x215   : > { %4940 = vmatmul.mubr.msk.bf16.gmra.mrb[88].mxu1 %vm1866_vm2, %v1810_v17 }
 0x216   : > { %v6685_v27 = vadd.f32 %v8309_v9, %v1105_v28  ;;  %v5263_v62 = vpop.permute.xlu0 %5262  ;;  %v1471_v58 = vmax.f32 %v6679_v56, 0.0 }
 0x217   : > { %v5265_v41 = vunpack.i.h.bf16 %v5263_v62  ;;  %v5264_v16 = vunpack.i.l.bf16 %v5263_v62 }
 0x218   : > { %v1472_v34 = vmax.f32 %v6685_v27, 0.0 }
 0x219   : > { %v1762_v7 = vmax.f32 %v8311_v26, %v5265_v41  ;;  %v1761_v20 = vmax.f32 %v8313_v45, %v5264_v16  ;;  %v1109_v30 = vpop.f32.mrb[120].mxu0  ;;  %v8315_v16 = vld [vmem:[#allocation20_spill] sm:$0xff] }
 0x21a   : > { %v1110_v3 = vadd.f32 %v6651_v48, %v1109_v30  ;;  %v1111_v17 = vpop.f32.mrb[121].mxu0  ;;  %v5336_v28 = vpack.i.bf16 %v1472_v34, %v1471_v58 }
 0x21b   : > { %v1811_v9 = vpack.c.bf16 %v1762_v7, %v1761_v20  ;;  %v1112_v62 = vpop.f32.mrb[122].mxu0 }
 0x21c   : > { %v1113_v61 = vadd.f32 %v6651_v48, %v1112_v62  ;;  %v6700_v8 = vadd.f32 %v8314_v42, %v1110_v3  ;;  %5337 = vrot.lane.b32.xlu1 %v5336_v28, %s5633_s22  ;;  %v1114_v41 = vpop.f32.mrb[123].mxu0 }
 0x21d   : > { %4943 = vmatprep.mubr.msk.bf16.mxu1 %vm1866_vm2, %v1811_v9  ;;  %v8316_v41 = vld [vmem:[#allocation15_spill] sm:$0xff] }
 0x21e   : > { %v6705_v53 = vadd.f32 %v8315_v16, %v1113_v61  ;;  %v5268_v26 = vpop.permute.xlu1 %5267  ;;  %v1473_v30 = vmax.f32 %v6700_v8, 0.0 }
 0x21f   : > { %v5270_v59 = vunpack.i.h.bf16 %v5268_v26  ;;  %v5269_v45 = vunpack.i.l.bf16 %v5268_v26 }
 0x220   : > { %v1474_v20 = vmax.f32 %v6705_v53, 0.0 }
 0x221   : > { %v1764_v7 = vmax.f32 %v1444_v25, %v5270_v59  ;;  %v1763_v42 = vmax.f32 %v1443_v18, %v5269_v45  ;;  %v1117_v3 = vpop.f32.mrb[124].mxu0  ;;  %v8317_v18 = vld [vmem:[#allocation18_spill] sm:$0xff] }
 0x222   : > { %v5341_v61 = vpack.i.bf16 %v1474_v20, %v1473_v30  ;;  %v1118_v17 = vadd.f32 %v6651_v48, %v1117_v3  ;;  %v1119_v28 = vpop.f32.mrb[125].mxu0 }
 0x223   : > { %v1812_v9 = vpack.c.bf16 %v1764_v7, %v1763_v42  ;;  %v1120_v62 = vpop.f32.mrb[126].mxu0 }
 0x224   : > { %v6719_v16 = vadd.f32 %v8316_v41, %v1118_v17  ;;  %v1121_v55 = vadd.f32 %v6651_v48, %v1120_v62  ;;  %5342 = vrot.lane.b32.xlu0 %v5341_v61, %s5633_s22  ;;  %v1122_v24 = vpop.f32.mrb[127].mxu0  ;;  %v8318_v48 = vmax.f32 %v6415_v1, 0.0 }
 0x225   : > { %4944 = vmatmul.mubr.msk.bf16.gmra.mrb[92].mxu1 %vm1866_vm2, %v1812_v9 }
 0x226   : > { %v6725_v25 = vadd.f32 %v8317_v18, %v1121_v55  ;;  %v5273_v26 = vpop.permute.xlu0 %5272  ;;  %v1475_v3 = vmax.f32 %v6719_v16, 0.0 }
 0x227   : > { %v5275_v59 = vunpack.i.h.bf16 %v5273_v26  ;;  %v5274_v45 = vunpack.i.l.bf16 %v5273_v26 }
 0x228   : > { %v1476_v7 = vmax.f32 %v6725_v25, 0.0 }
 0x229   : > { %v1766_v42 = vmax.f32 %v1446_v40, %v5275_v59  ;;  %v1765_v17 = vmax.f32 %v8318_v48, %v5274_v45 }
 0x22a   : > { %v5346_v61 = vpack.i.bf16 %v1476_v7, %v1475_v3 }
 0x22b   : > { %v1813_v28 = vpack.c.bf16 %v1766_v42, %v1765_v17 }
 0x22c   : > { %5347 = vrot.lane.b32.xlu1 %v5346_v61, %s5633_s22  ;;  %s287_s22 = sand.u32 1, %s5622_s25  }
 0x22d   : > { %4947 = vmatprep.mubr.msk.bf16.mxu1 %vm1866_vm2, %v1813_v28  ;;  %s4481_s8 = sshll.u32 %s287_s22, 5 }
 0x22e   : > { %v5278_v9 = vpop.permute.xlu1 %5277  ;;  %s8070_s23 = scalar_lea.vmem [#allocation2], %s4481_s8 }
 0x22f   : > { %v5280_v62 = vunpack.i.h.bf16 %v5278_v9  ;;  %v5279_v41 = vunpack.i.l.bf16 %v5278_v9  ;;  %s4418_s9 = sshll.u32 %s8070_s23, 4  ;;  %s8126_s9 = int_to_ptr.vmem [resolvable:$true] %s4418_s9 }
 0x230   : > { %s5568_s16 = scalar_lea.vmem %s8126_s9, 512  ;;  %p5575_p0 = scmp.lt.s32.totalorder %s8126_s9, %s5573_s18 }
 0x231   : > { %v1768_v4 = vmax.f32 %v1448_v47, %v5280_v62  ;;  %v1767_v1 = vmax.f32 %v1447_v0, %v5279_v41  ;;  %p5569_p11 = scmp.ne.s32.totalorder %s8126_s9, %s5568_s16  ;;  %p5576_p1 = scmp.lt.s32.totalorder %s5574_s19, %s5568_s16 }
 0x233   : > { %v1814_v40 = vpack.c.bf16 %v1768_v4, %v1767_v1  ;;  %p5570_p12 = pnand %p5569_p11, %p5717_p5  ;;  %p5577_p2 = por %p5576_p1, %p5575_p0 }
 0x235   : > { %4948 = vmatmul.mubr.msk.bf16.gmra.mrb[96].mxu1 %vm1866_vm2, %v1814_v40  ;;  %v8321_v40 = vmax.f32 %v6554_v60, 0.0  ;;  %v8324_v60 = vmax.f32 %v6600_v10, 0.0  ;;  %p5571_p13 = pneg %p5570_p12 }
 0x236   : > { %v5283_v55 = vpop.permute.xlu0 %5282 }
 0x237   : > { %v5285_v24 = vunpack.i.h.bf16 %v5283_v55  ;;  %v5284_v18 = vunpack.i.l.bf16 %v5283_v55  ;;  %p5578_p3 = pnand %p5577_p2, %p5571_p13 }
 0x239   : > { %v1770_v26 = vmax.f32 %v1450_v13, %v5285_v24  ;;  %v1769_v59 = vmax.f32 %v1449_v46, %v5284_v18 }
 0x23b   : > { %v1815_v45 = vpack.c.bf16 %v1770_v26, %v1769_v59  ;;  %v8323_v59 = vmax.f32 %v6575_v29, 0.0 }
 0x23d   : > { %4951 = vmatprep.mubr.msk.bf16.mxu1 %vm1866_vm2, %v1815_v45 }
 0x23e   : > { %v5288_v35 = vpop.permute.xlu1 %5287 }
 0x23f   : > { %v5290_v47 = vunpack.i.h.bf16 %v5288_v35  ;;  %v5289_v42 = vunpack.i.l.bf16 %v5288_v35 }
 0x241   : > { %v1772_v19 = vmax.f32 %v1452_v49, %v5290_v47  ;;  %v1771_v0 = vmax.f32 %v1451_v63, %v5289_v42 }
 0x243   : > { %v1816_v48 = vpack.c.bf16 %v1772_v19, %v1771_v0  ;;  %v8325_v0 = vmax.f32 %v6594_v50, 0.0  ;;  %v8326_v50 = vmax.f32 %v6620_v57, 0.0 }
 0x245   : > { %4952 = vmatmul.mubr.msk.bf16.gmra.mrb[100].mxu1 %vm1866_vm2, %v1816_v48 }
 0x246   : > { %v5293_v6 = vpop.permute.xlu0 %5292 }
 0x247   : > { %v5295_v13 = vunpack.i.h.bf16 %v5293_v6  ;;  %v5294_v17 = vunpack.i.l.bf16 %v5293_v6 }
 0x249   : > { %v1774_v23 = vmax.f32 %v1454_v11, %v5295_v13  ;;  %v1773_v46 = vmax.f32 %v1453_v37, %v5294_v17  ;;  %v8319_v37 = vmax.f32 %v6535_v52, 0.0  ;;  %v8322_v52 = vmax.f32 %v6580_v31, 0.0  ;;  %v5533_v31 = vld [vmem:[%s8174_s3] sm:$0xff]   ;;  %v5534_v13 = vld [vmem:[%s8174_s3 + $0x8] sm:$0xff]  }
 0x24a   : > { %4979 = vmatprep.subr.bf16.mxu1 %v5533_v31 }
 0x24b   : > { %v1817_v61 = vpack.c.bf16 %v1774_v23, %v1773_v46  ;;  %4980 = vmatpush3.bf16.msra.mxu1 %v5533_v31  ;;  %v8327_v46 = vmax.f32 %v6615_v21, 0.0  ;;  %v8328_v21 = vmax.f32 %v6640_v15, 0.0 }
 0x24c   : > { %4981 = vmatprep.subr.bf16.mxu1 %v5534_v13 }
 0x24d   : > { %4955 = vmatprep.mubr.msk.bf16.mxu1 %vm1866_vm2, %v1817_v61 }
 0x24e   : > { %v5298_v51 = vpop.permute.xlu1 %5297 }
 0x24f   : > { %v5300_v49 = vunpack.i.h.bf16 %v5298_v51  ;;  %v5299_v28 = vunpack.i.l.bf16 %v5298_v51  ;;  %4982 = vmatpush3.bf16.msra.mxu1 %v5534_v13  ;;  %v5535_v51 = vld [vmem:[%s8174_s3 + $0x10] sm:$0xff]  }
 0x250   : > { %4983 = vmatprep.subr.bf16.mxu1 %v5535_v51 }
 0x251   : > { %v1776_v12 = vmax.f32 %v1456_v39, %v5300_v49  ;;  %v1775_v63 = vmax.f32 %v1455_v54, %v5299_v28 }
 0x253   : > { %v1818_v9 = vpack.c.bf16 %v1776_v12, %v1775_v63  ;;  %4984 = vmatpush3.bf16.msra.mxu1 %v5535_v51  ;;  %v5536_v12 = vld [vmem:[%s8174_s3 + $0x18] sm:$0xff]  }
 0x254   : > { %4985 = vmatprep.subr.bf16.mxu1 %v5536_v12 }
 0x255   : > { %4956 = vmatmul.mubr.msk.bf16.gmra.mrb[104].mxu1 %vm1866_vm2, %v1818_v9 }
 0x256   : > { %v5303_v38 = vpop.permute.xlu0 %5302 }
 0x257   : > { %v5305_v11 = vunpack.i.h.bf16 %v5303_v38  ;;  %v5304_v62 = vunpack.i.l.bf16 %v5303_v38  ;;  %v8329_v38 = vmax.f32 %v6634_v43, 0.0  ;;  %4986 = vmatpush3.bf16.msra.mxu1 %v5536_v12  ;;  %v5538_v43 = vld [vmem:[%s8174_s3 + $0x28] sm:$0xff]  }
 0x259   : > { %v1778_v22 = vmax.f32 %v1458_v2, %v5305_v11  ;;  %v1777_v41 = vmax.f32 %v8319_v37, %v5304_v62  ;;  %v5537_v62 = vld [vmem:[%s8174_s3 + $0x20] sm:$0xff]  }
 0x25a   : > { %4987 = vmatprep.subr.bf16.mxu1 %v5537_v62 }
 0x25b   : > { %v1819_v4 = vpack.c.bf16 %v1778_v22, %v1777_v41  ;;  %v6812_v41 = vld [vmem:[%s8177_s6 + $0x1] ss:$0 sm:$0xff]  ;;  %4988 = vmatpush3.bf16.msra.mxu1 %v5537_v62 }
 0x25c   : > { %4989 = vmatprep.subr.bf16.mxu1 %v5538_v43 }
 0x25d   : > { %4959 = vmatprep.mubr.msk.bf16.mxu1 %vm1866_vm2, %v1819_v4 }
 0x25e   : > { %v5308_v32 = vpop.permute.xlu1 %5307 }
 0x25f   : > { %v5310_v39 = vunpack.i.h.bf16 %v5308_v32  ;;  %v5309_v1 = vunpack.i.l.bf16 %v5308_v32  ;;  %4990 = vmatpush3.bf16.msra.mxu1 %v5538_v43 }
 0x261   : > { %v1780_v54 = vmax.f32 %v8320_v44, %v5310_v39  ;;  %v1779_v55 = vmax.f32 %v8321_v40, %v5309_v1  ;;  %v8330_v39 = vmax.f32 %v6665_v14, 0.0  ;;  %v8331_v44 = vmax.f32 %v6660_v5, 0.0 }
 0x263   : > { %v1820_v24 = vpack.c.bf16 %v1780_v54, %v1779_v55 }
 0x265   : > { %4960 = vmatmul.mubr.msk.bf16.gmra.mrb[108].mxu1 %vm1866_vm2, %v1820_v24 }
 0x266   : > { %v5313_v33 = vpop.permute.xlu0 %5312 }
 0x267   : > { %v5315_v2 = vunpack.i.h.bf16 %v5313_v33  ;;  %v5314_v18 = vunpack.i.l.bf16 %v5313_v33 }
 0x269   : > { %v1782_v26 = vmax.f32 %v8322_v52, %v5315_v2  ;;  %v1781_v45 = vmax.f32 %v8323_v59, %v5314_v18 }
 0x26b   : > { %v1821_v35 = vpack.c.bf16 %v1782_v26, %v1781_v45 }
 0x26d   : > { %4963 = vmatprep.mubr.msk.bf16.mxu1 %vm1866_vm2, %v1821_v35 }
 0x26e   : > { %v5318_v36 = vpop.permute.xlu1 %5317 }
 0x26f   : > { %v5320_v47 = vunpack.i.h.bf16 %v5318_v36  ;;  %v5319_v42 = vunpack.i.l.bf16 %v5318_v36 }
 0x271   : > { %v1784_v19 = vmax.f32 %v8324_v60, %v5320_v47  ;;  %v1783_v48 = vmax.f32 %v8325_v0, %v5319_v42 }
 0x273   : > { %v1822_v6 = vpack.c.bf16 %v1784_v19, %v1783_v48 }
 0x275   : > { %4964 = vmatmul.mubr.msk.bf16.gmra.mrb[112].mxu1 %vm1866_vm2, %v1822_v6 }
 0x276   : > { %v5323_v29 = vpop.permute.xlu0 %5322 }
 0x277   : > { %v5325_v17 = vunpack.i.h.bf16 %v5323_v29  ;;  %v5324_v10 = vunpack.i.l.bf16 %v5323_v29 }
 0x279   : > { %v1786_v23 = vmax.f32 %v8326_v50, %v5325_v17  ;;  %v1785_v61 = vmax.f32 %v8327_v46, %v5324_v10 }
 0x27b   : > { %v1823_v49 = vpack.c.bf16 %v1786_v23, %v1785_v61 }
 0x27d   : > { %4967 = vmatprep.mubr.msk.bf16.mxu1 %vm1866_vm2, %v1823_v49 }
 0x27e   : > { %v5328_v28 = vpop.permute.xlu1 %5327 }
 0x27f   : > { %v5330_v57 = vunpack.i.h.bf16 %v5328_v28  ;;  %v5329_v63 = vunpack.i.l.bf16 %v5328_v28 }
 0x281   : > { %v1788_v9 = vmax.f32 %v8328_v21, %v5330_v57  ;;  %v1787_v11 = vmax.f32 %v8329_v38, %v5329_v63 }
 0x283   : > { %v1824_v22 = vpack.c.bf16 %v1788_v9, %v1787_v11 }
 0x285   : > { %4968 = vmatmul.mubr.msk.bf16.gmra.mrb[116].mxu1 %vm1866_vm2, %v1824_v22 }
 0x286   : > { %v5333_v37 = vpop.permute.xlu0 %5332 }
 0x287   : > { %v5335_v15 = vunpack.i.h.bf16 %v5333_v37  ;;  %v5334_v4 = vunpack.i.l.bf16 %v5333_v37 }
 0x288   : > { %v4917_v32 = vpop.f32.mrb[64].mxu1 }
 0x289   : > { %v1790_v1 = vmax.f32 %v8330_v39, %v5335_v15  ;;  %v1789_v54 = vmax.f32 %v8331_v44, %v5334_v4  ;;  %v6822_v40 = vadd.f32 %v4917_v32, %v6812_v41  ;;  %v1997_v55 = vpop.f32.mrb[65].mxu1 }
 0x28a   : > { %v6825_v24 = vadd.f32 %v6812_v41, %v1997_v55  ;;  %v4918_v33 = vpop.f32.mrb[66].mxu1 }
 0x28b   : > { %v1825_v2 = vpack.c.bf16 %v1790_v1, %v1789_v54  ;;  %v6828_v18 = vadd.f32 %v4918_v33, %v6812_v41  ;;  %v2000_v52 = vpop.f32.mrb[67].mxu1  ;;  %v2254_v5 = vmax.f32 %v6822_v40, 0.0 }
 0x28c   : > { %v6831_v14 = vadd.f32 %v6812_v41, %v2000_v52  ;;  %v2252_v59 = vmax.f32 %v6825_v24, 0.0 }
 0x28d   : > { %v2255_v26 = vmax.f32 %v6828_v18, 0.0  ;;  %4971 = vmatprep.mubr.msk.bf16.mxu1 %vm1866_vm2, %v1825_v2 }
 0x28e   : > { %v2253_v45 = vmax.f32 %v6831_v14, 0.0  ;;  %v5338_v35 = vpop.permute.xlu1 %5337 }
 0x28f   : > { %v5356_v36 = vpack.i.bf16 %v2255_v26, %v2254_v5  ;;  %v5340_v47 = vunpack.i.h.bf16 %v5338_v35  ;;  %v5339_v42 = vunpack.i.l.bf16 %v5338_v35 }
 0x290   : > { %v5351_v60 = vpack.i.bf16 %v2253_v45, %v2252_v59 }
 0x291   : > { %v1792_v19 = vmax.f32 %v1472_v34, %v5340_v47  ;;  %v1791_v0 = vmax.f32 %v1471_v58, %v5339_v42  ;;  %5357 = vrot.lane.b32.xlu1 %v5356_v36, %s5634_s29 }
 0x292   : > { %5352 = vrot.lane.b32.xlu0 %v5351_v60, %s5634_s29 }
 0x293   : > { %v1826_v48 = vpack.c.bf16 %v1792_v19, %v1791_v0 }
 0x295   : > { %4972 = vmatmul.mubr.msk.bf16.gmra.mrb[120].mxu1 %vm1866_vm2, %v1826_v48 }
 0x296   : > { %v5343_v31 = vpop.permute.xlu0 %5342 }
 0x297   : > { %v5345_v6 = vunpack.i.h.bf16 %v5343_v31  ;;  %v5344_v29 = vunpack.i.l.bf16 %v5343_v31 }
 0x298   : > { %v4921_v13 = vpop.f32.mrb[68].mxu1 }
 0x299   : > { %v1794_v17 = vmax.f32 %v1474_v20, %v5345_v6  ;;  %v1793_v27 = vmax.f32 %v1473_v30, %v5344_v29  ;;  %v6858_v56 = vadd.f32 %v4921_v13, %v6812_v41  ;;  %v2013_v58 = vpop.f32.mrb[69].mxu1 }
 0x29a   : > { %v6861_v34 = vadd.f32 %v6812_v41, %v2013_v58  ;;  %v4922_v10 = vpop.f32.mrb[70].mxu1 }
 0x29b   : > { %v1827_v50 = vpack.c.bf16 %v1794_v17, %v1793_v27  ;;  %v6864_v23 = vadd.f32 %v4922_v10, %v6812_v41  ;;  %v2016_v46 = vpop.f32.mrb[71].mxu1  ;;  %v2258_v53 = vmax.f32 %v6858_v56, 0.0 }
 0x29c   : > { %v6867_v61 = vadd.f32 %v6812_v41, %v2016_v46  ;;  %v2256_v30 = vmax.f32 %v6861_v34, 0.0 }
 0x29d   : > { %v2259_v8 = vmax.f32 %v6864_v23, 0.0  ;;  %4975 = vmatprep.mubr.msk.bf16.mxu1 %vm1866_vm2, %v1827_v50 }
 0x29e   : > { %v2257_v20 = vmax.f32 %v6867_v61, 0.0  ;;  %v5348_v51 = vpop.permute.xlu1 %5347 }
 0x29f   : > { %v5366_v49 = vpack.i.bf16 %v2259_v8, %v2258_v53  ;;  %v5350_v28 = vunpack.i.h.bf16 %v5348_v51  ;;  %v5349_v12 = vunpack.i.l.bf16 %v5348_v51 }
 0x2a0   : > { %v5361_v57 = vpack.i.bf16 %v2257_v20, %v2256_v30 }
 0x2a1   : > { %v1796_v63 = vmax.f32 %v1476_v7, %v5350_v28  ;;  %v1795_v21 = vmax.f32 %v1475_v3, %v5349_v12  ;;  %5367 = vrot.lane.b32.xlu1 %v5366_v49, %s5634_s29 }
 0x2a2   : > { %5362 = vrot.lane.b32.xlu0 %v5361_v57, %s5634_s29 }
 0x2a3   : > { %v1828_v9 = vpack.c.bf16 %v1796_v63, %v1795_v21 }
 0x2a5   : > { %4976 = vmatmul.mubr.msk.bf16.gmra.mrb[124].mxu1 %vm1866_vm2, %v1828_v9 }
 0x2a8   : > { %v4925_v38 = vpop.f32.mrb[72].mxu1 }
 0x2a9   : > { %v6890_v11 = vadd.f32 %v4925_v38, %v6812_v41  ;;  %v2029_v62 = vpop.f32.mrb[73].mxu1 }
 0x2aa   : > { %v6893_v22 = vadd.f32 %v6812_v41, %v2029_v62  ;;  %v4926_v25 = vpop.f32.mrb[74].mxu1 }
 0x2ab   : > { %v6896_v7 = vadd.f32 %v4926_v25, %v6812_v41  ;;  %v2032_v16 = vpop.f32.mrb[75].mxu1  ;;  %v2262_v37 = vmax.f32 %v6890_v11, 0.0 }
 0x2ac   : > { %v6899_v3 = vadd.f32 %v6812_v41, %v2032_v16  ;;  %v2260_v15 = vmax.f32 %v6893_v22, 0.0 }
 0x2ad   : > { %v2263_v43 = vmax.f32 %v6896_v7, 0.0 }
 0x2ae   : > { %v2261_v4 = vmax.f32 %v6899_v3, 0.0 }
 0x2af   : > { %v5376_v32 = vpack.i.bf16 %v2263_v43, %v2262_v37 }
 0x2b0   : > { %v5371_v39 = vpack.i.bf16 %v2261_v4, %v2260_v15 }
 0x2b1   : > { %5377 = vrot.lane.b32.xlu1 %v5376_v32, %s5634_s29 }
 0x2b2   : > { %5372 = vrot.lane.b32.xlu0 %v5371_v39, %s5634_s29 }
 0x2b8   : > { %v4929_v1 = vpop.f32.mrb[76].mxu1 }
 0x2b9   : > { %v6916_v44 = vadd.f32 %v4929_v1, %v6812_v41  ;;  %v2045_v54 = vpop.f32.mrb[77].mxu1 }
 0x2ba   : > { %v6919_v55 = vadd.f32 %v6812_v41, %v2045_v54  ;;  %v4930_v33 = vpop.f32.mrb[78].mxu1 }
 0x2bb   : > { %v6922_v2 = vadd.f32 %v4930_v33, %v6812_v41  ;;  %v2048_v52 = vpop.f32.mrb[79].mxu1  ;;  %v2266_v36 = vmax.f32 %v6916_v44, 0.0 }
 0x2bc   : > { %v6925_v35 = vadd.f32 %v6812_v41, %v2048_v52  ;;  %v2264_v42 = vmax.f32 %v6919_v55, 0.0 }
 0x2bd   : > { %v2267_v47 = vmax.f32 %v6922_v2, 0.0 }
 0x2be   : > { %v2265_v60 = vmax.f32 %v6925_v35, 0.0 }
 0x2bf   : > { %v5386_v19 = vpack.i.bf16 %v2267_v47, %v2266_v36 }
 0x2c0   : > { %v5381_v0 = vpack.i.bf16 %v2265_v60, %v2264_v42 }
 0x2c1   : > { %5387 = vrot.lane.b32.xlu1 %v5386_v19, %s5634_s29 }
 0x2c2   : > { %5382 = vrot.lane.b32.xlu0 %v5381_v0, %s5634_s29 }
 0x2c8   : > { %v4933_v48 = vpop.f32.mrb[80].mxu1 }
 0x2c9   : > { %v6942_v31 = vadd.f32 %v4933_v48, %v6812_v41  ;;  %v2061_v6 = vpop.f32.mrb[81].mxu1 }
 0x2ca   : > { %v6945_v29 = vadd.f32 %v6812_v41, %v2061_v6  ;;  %v4934_v13 = vpop.f32.mrb[82].mxu1 }
 0x2cb   : > { %v6948_v17 = vadd.f32 %v4934_v13, %v6812_v41  ;;  %v2064_v27 = vpop.f32.mrb[83].mxu1  ;;  %v2270_v10 = vmax.f32 %v6942_v31, 0.0 }
 0x2cc   : > { %v6951_v58 = vadd.f32 %v6812_v41, %v2064_v27  ;;  %v8233_v46 = vmax.f32 %v6945_v29, 0.0 }
 0x2cd   : > { %v2271_v50 = vmax.f32 %v6948_v17, 0.0 }
 0x2ce   : > { %v8234_v51 = vmax.f32 %v6951_v58, 0.0 }
 0x2cf   : > { %v5396_v49 = vpack.i.bf16 %v2271_v50, %v2270_v10 }
 0x2d0   : > { %v5391_v28 = vpack.i.bf16 %v8234_v51, %v8233_v46 }
 0x2d1   : > { %5397 = vrot.lane.b32.xlu1 %v5396_v49, %s5634_s29 }
 0x2d2   : > { %5392 = vrot.lane.b32.xlu0 %v5391_v28, %s5634_s29 }
 0x2d8   : > { %v4937_v12 = vpop.f32.mrb[84].mxu1 }
 0x2d9   : > { %v6968_v57 = vadd.f32 %v4937_v12, %v6812_v41  ;;  %v2077_v63 = vpop.f32.mrb[85].mxu1 }
 0x2da   : > { %v6971_v21 = vadd.f32 %v6812_v41, %v2077_v63  ;;  %v4938_v9 = vpop.f32.mrb[86].mxu1 }
 0x2db   : > { %v6974_v38 = vadd.f32 %v4938_v9, %v6812_v41  ;;  %v2080_v62 = vpop.f32.mrb[87].mxu1  ;;  %v8231_v16 = vmax.f32 %v6968_v57, 0.0 }
 0x2dc   : > { %v6977_v25 = vadd.f32 %v6812_v41, %v2080_v62  ;;  %v8227_v39 = vmax.f32 %v6971_v21, 0.0 }
 0x2dd   : > { %v8232_v32 = vmax.f32 %v6974_v38, 0.0 }
 0x2de   : > { %v8230_v1 = vmax.f32 %v6977_v25, 0.0 }
 0x2df   : > { %v5406_v54 = vpack.i.bf16 %v8232_v32, %v8231_v16 }
 0x2e0   : > { %v5401_v33 = vpack.i.bf16 %v8230_v1, %v8227_v39 }
 0x2e1   : > { %5407 = vrot.lane.b32.xlu1 %v5406_v54, %s5634_s29 }
 0x2e2   : > { %5402 = vrot.lane.b32.xlu0 %v5401_v33, %s5634_s29 }
 0x2e8   : > { %v4941_v52 = vpop.f32.mrb[88].mxu1 }
 0x2e9   : > { %v6994_v19 = vadd.f32 %v4941_v52, %v6812_v41  ;;  %v2093_v0 = vpop.f32.mrb[89].mxu1 }
 0x2ea   : > { %v6997_v48 = vadd.f32 %v6812_v41, %v2093_v0  ;;  %v4942_v6 = vpop.f32.mrb[90].mxu1 }
 0x2eb   : > { %v7000_v13 = vadd.f32 %v4942_v6, %v6812_v41  ;;  %v2096_v27 = vpop.f32.mrb[91].mxu1  ;;  %v8225_v28 = vmax.f32 %v6994_v19, 0.0 }
 0x2ec   : > { %v7003_v49 = vadd.f32 %v6812_v41, %v2096_v27  ;;  %v8228_v63 = vmax.f32 %v6997_v48, 0.0 }
 0x2ed   : > { %v8226_v12 = vmax.f32 %v7000_v13, 0.0 }
 0x2ee   : > { %v8229_v9 = vmax.f32 %v7003_v49, 0.0 }
 0x2ef   : > { %v5416_v62 = vpack.i.bf16 %v8226_v12, %v8225_v28 }
 0x2f0   : > { %v5411_v54 = vpack.i.bf16 %v8229_v9, %v8228_v63 }
 0x2f1   : > { %5417 = vrot.lane.b32.xlu1 %v5416_v62, %s5634_s29 }
 0x2f2   : > { %5412 = vrot.lane.b32.xlu0 %v5411_v54, %s5634_s29 }
 0x2f8   : > { %v4945_v33 = vpop.f32.mrb[92].mxu1 }
 0x2f9   : > { %v7020_v52 = vadd.f32 %v4945_v33, %v6812_v41  ;;  %v2109_v0 = vpop.f32.mrb[93].mxu1 }
 0x2fa   : > { %v7023_v6 = vadd.f32 %v6812_v41, %v2109_v0  ;;  %v4946_v27 = vpop.f32.mrb[94].mxu1 }
 0x2fb   : > { %v7026_v28 = vadd.f32 %v4946_v27, %v6812_v41  ;;  %v2112_v12 = vpop.f32.mrb[95].mxu1  ;;  %v8235_v62 = vmax.f32 %v7020_v52, 0.0 }
 0x2fc   : > { %v7029_v39 = vadd.f32 %v6812_v41, %v2112_v12  ;;  %v8237_v63 = vmax.f32 %v7023_v6, 0.0 }
 0x2fd   : > { %v8236_v54 = vmax.f32 %v7026_v28, 0.0 }
 0x2fe   : > { %v8238_v33 = vmax.f32 %v7029_v39, 0.0 }
 0x2ff   : > { %v5426_v0 = vpack.i.bf16 %v8236_v54, %v8235_v62 }
 0x300   : > { %v5421_v27 = vpack.i.bf16 %v8238_v33, %v8237_v63 }
 0x301   : > { %5427 = vrot.lane.b32.xlu1 %v5426_v0, %s5634_s29 }
 0x302   : > { %5422 = vrot.lane.b32.xlu0 %v5421_v27, %s5634_s29 }
 0x303   : > { %v5358_v12 = vpop.permute.xlu1 %5357 }
 0x304   : > { %v5360_v9 = vunpack.i.h.bf16 %v5358_v12  ;;  %v5359_v1 = vunpack.i.l.bf16 %v5358_v12  ;;  %v5353_v16 = vpop.permute.xlu0 %5352 }
 0x305   : > { %v5355_v32 = vunpack.i.h.bf16 %v5353_v16  ;;  %v5354_v46 = vunpack.i.l.bf16 %v5353_v16 }
 0x306   : > { %v2575_v51 = vmax.f32 %v2255_v26, %v5360_v9  ;;  %v2574_v62 = vmax.f32 %v2254_v5, %v5359_v1  ;;  %v5539_v5 = vld [vmem:[%s8175_s4] sm:$0xff]  }
 0x307   : > { %v2573_v54 = vmax.f32 %v2253_v45, %v5355_v32  ;;  %v2572_v0 = vmax.f32 %v2252_v59, %v5354_v46  ;;  %5055 = vmatprep.subr.bf16.mxu0 %v5539_v5 }
 0x308   : > { %v4949_v63 = vpop.f32.mrb[96].mxu1  ;;  %v2637_v16 = vpack.c.bf16 %v2575_v51, %v2574_v62  ;;  %5056 = vmatpush3.bf16.msra.mxu0 %v5539_v5 }
 0x309   : > { %v2636_v27 = vpack.c.bf16 %v2573_v54, %v2572_v0  ;;  %v7054_v12 = vadd.f32 %v4949_v63, %v6812_v41  ;;  %v2125_v33 = vpop.f32.mrb[97].mxu1 }
 0x30a   : > { %v7057_v18 = vadd.f32 %v6812_v41, %v2125_v33  ;;  %v4950_v26 = vpop.f32.mrb[98].mxu1 }
 0x30b   : > { %v7060_v40 = vadd.f32 %v4950_v26, %v6812_v41  ;;  %v2128_v14 = vpop.f32.mrb[99].mxu1  ;;  %4991 = vmatprep.mubr.msk.bf16.mxu1 %vm2721_vm3, %v2636_v27  ;;  %v2286_v59 = vmax.f32 %v7054_v12, 0.0 }
 0x30c   : > { %v7064_v24 = vadd.f32 %v6812_v41, %v2128_v14  ;;  %4992 = vmatmul.mubr.msk.bf16.vlgmr.msra.gmra.mrb[128].mxu1 %vm2721_vm3, %v2637_v16  ;;  %v8239_v46 = vmax.f32 %v7057_v18, 0.0 }
 0x30d   : > { %v2287_v45 = vmax.f32 %v7060_v40, 0.0 }
 0x30e   : > { %v2285_v51 = vmax.f32 %v7064_v24, 0.0 }
 0x30f   : > { %v5436_v32 = vpack.i.bf16 %v2287_v45, %v2286_v59 }
 0x310   : > { %v5431_v1 = vpack.i.bf16 %v2285_v51, %v8239_v46 }
 0x311   : > { %5437 = vrot.lane.b32.xlu1 %v5436_v32, %s5634_s29 }
 0x312   : > { %5432 = vrot.lane.b32.xlu0 %v5431_v1, %s5634_s29 }
 0x313   : > { %v5368_v63 = vpop.permute.xlu1 %5367 }
 0x314   : > { %v5370_v9 = vunpack.i.h.bf16 %v5368_v63  ;;  %v5369_v62 = vunpack.i.l.bf16 %v5368_v63  ;;  %v5363_v54 = vpop.permute.xlu0 %5362 }
 0x315   : > { %v5365_v33 = vunpack.i.h.bf16 %v5363_v54  ;;  %v5364_v0 = vunpack.i.l.bf16 %v5363_v54 }
 0x316   : > { %v2579_v27 = vmax.f32 %v2259_v8, %v5370_v9  ;;  %v2578_v16 = vmax.f32 %v2258_v53, %v5369_v62 }
 0x317   : > { %v2577_v26 = vmax.f32 %v2257_v20, %v5365_v33  ;;  %v2576_v14 = vmax.f32 %v2256_v30, %v5364_v0 }
 0x318   : > { %v4953_v5 = vpop.f32.mrb[100].mxu1  ;;  %v2639_v46 = vpack.c.bf16 %v2579_v27, %v2578_v16 }
 0x319   : > { %v2638_v32 = vpack.c.bf16 %v2577_v26, %v2576_v14  ;;  %v7093_v1 = vadd.f32 %v4953_v5, %v6812_v41  ;;  %v2141_v63 = vpop.f32.mrb[101].mxu1 }
 0x31a   : > { %v7096_v54 = vadd.f32 %v6812_v41, %v2141_v63  ;;  %v4954_v23 = vpop.f32.mrb[102].mxu1 }
 0x31b   : > { %v7099_v56 = vadd.f32 %v4954_v23, %v6812_v41  ;;  %v2144_v53 = vpop.f32.mrb[103].mxu1  ;;  %4995 = vmatprep.mubr.msk.bf16.mxu1 %vm2721_vm3, %v2638_v32  ;;  %v2290_v61 = vmax.f32 %v7093_v1, 0.0 }
 0x31c   : > { %v7103_v34 = vadd.f32 %v6812_v41, %v2144_v53  ;;  %4996 = vmatmul.mubr.msk.bf16.gmra.mrb[132].mxu1 %vm2721_vm3, %v2639_v46  ;;  %v2288_v30 = vmax.f32 %v7096_v54, 0.0 }
 0x31d   : > { %v2291_v8 = vmax.f32 %v7099_v56, 0.0 }
 0x31e   : > { %v2289_v20 = vmax.f32 %v7103_v34, 0.0 }
 0x31f   : > { %v5446_v9 = vpack.i.bf16 %v2291_v8, %v2290_v61 }
 0x320   : > { %v5441_v62 = vpack.i.bf16 %v2289_v20, %v2288_v30 }
 0x321   : > { %5447 = vrot.lane.b32.xlu1 %v5446_v9, %s5634_s29 }
 0x322   : > { %5442 = vrot.lane.b32.xlu0 %v5441_v62, %s5634_s29 }
 0x323   : > { %v5378_v46 = vpop.permute.xlu1 %5377 }
 0x324   : > { %v5380_v33 = vunpack.i.h.bf16 %v5378_v46  ;;  %v5379_v0 = vunpack.i.l.bf16 %v5378_v46  ;;  %v5373_v27 = vpop.permute.xlu0 %5372 }
 0x325   : > { %v5375_v16 = vunpack.i.h.bf16 %v5373_v27  ;;  %v5374_v26 = vunpack.i.l.bf16 %v5373_v27 }
 0x326   : > { %v2583_v14 = vmax.f32 %v2263_v43, %v5380_v33  ;;  %v2582_v5 = vmax.f32 %v2262_v37, %v5379_v0 }
 0x327   : > { %v2581_v32 = vmax.f32 %v2261_v4, %v5375_v16  ;;  %v2580_v63 = vmax.f32 %v2260_v15, %v5374_v26 }
 0x328   : > { %v4957_v23 = vpop.f32.mrb[104].mxu1  ;;  %v2641_v46 = vpack.c.bf16 %v2583_v14, %v2582_v5 }
 0x329   : > { %v2640_v53 = vpack.c.bf16 %v2581_v32, %v2580_v63  ;;  %v7129_v9 = vadd.f32 %v4957_v23, %v6812_v41  ;;  %v2157_v62 = vpop.f32.mrb[105].mxu1 }
 0x32a   : > { %v7132_v27 = vadd.f32 %v6812_v41, %v2157_v62  ;;  %v4958_v7 = vpop.f32.mrb[106].mxu1 }
 0x32b   : > { %v7135_v11 = vadd.f32 %v4958_v7, %v6812_v41  ;;  %v2160_v37 = vpop.f32.mrb[107].mxu1  ;;  %4999 = vmatprep.mubr.msk.bf16.mxu1 %vm2721_vm3, %v2640_v53  ;;  %v2294_v3 = vmax.f32 %v7129_v9, 0.0 }
 0x32c   : > { %v7139_v22 = vadd.f32 %v6812_v41, %v2160_v37  ;;  %5000 = vmatmul.mubr.msk.bf16.gmra.mrb[136].mxu1 %vm2721_vm3, %v2641_v46  ;;  %v2292_v15 = vmax.f32 %v7132_v27, 0.0 }
 0x32d   : > { %v2295_v43 = vmax.f32 %v7135_v11, 0.0 }
 0x32e   : > { %v2293_v4 = vmax.f32 %v7139_v22, 0.0 }
 0x32f   : > { %v5456_v33 = vpack.i.bf16 %v2295_v43, %v2294_v3 }
 0x330   : > { %v5451_v0 = vpack.i.bf16 %v2293_v4, %v2292_v15 }
 0x331   : > { %5457 = vrot.lane.b32.xlu1 %v5456_v33, %s5634_s29 }
 0x332   : > { %5452 = vrot.lane.b32.xlu0 %v5451_v0, %s5634_s29 }
 0x333   : > { %v5388_v16 = vpop.permute.xlu1 %5387 }
 0x334   : > { %v5390_v26 = vunpack.i.h.bf16 %v5388_v16  ;;  %v5389_v14 = vunpack.i.l.bf16 %v5388_v16  ;;  %v5383_v5 = vpop.permute.xlu0 %5382 }
 0x335   : > { %v5385_v32 = vunpack.i.h.bf16 %v5383_v5  ;;  %v5384_v63 = vunpack.i.l.bf16 %v5383_v5 }
 0x336   : > { %v2587_v23 = vmax.f32 %v2267_v47, %v5390_v26  ;;  %v2586_v53 = vmax.f32 %v2266_v36, %v5389_v14 }
 0x337   : > { %v2585_v62 = vmax.f32 %v2265_v60, %v5385_v32  ;;  %v2584_v46 = vmax.f32 %v2264_v42, %v5384_v63 }
 0x338   : > { %v4961_v7 = vpop.f32.mrb[108].mxu1  ;;  %v2643_v16 = vpack.c.bf16 %v2587_v23, %v2586_v53 }
 0x339   : > { %v2642_v37 = vpack.c.bf16 %v2585_v62, %v2584_v46  ;;  %v7165_v33 = vadd.f32 %v4961_v7, %v6812_v41  ;;  %v2173_v0 = vpop.f32.mrb[109].mxu1 }
 0x33a   : > { %v7168_v5 = vadd.f32 %v6812_v41, %v2173_v0  ;;  %v4962_v2 = vpop.f32.mrb[110].mxu1  ;;  %v8332_v0 = vmax.f32 %v6951_v58, 0.0  ;;  %v5540_v58 = vld [vmem:[%s8175_s4 + $0x8] sm:$0xff]  }
 0x33b   : > { %v7171_v44 = vadd.f32 %v4962_v2, %v6812_v41  ;;  %v2176_v36 = vpop.f32.mrb[111].mxu1  ;;  %5003 = vmatprep.mubr.msk.bf16.mxu1 %vm2721_vm3, %v2642_v37  ;;  %v2298_v35 = vmax.f32 %v7165_v33, 0.0  ;;  %v8333_v2 = vmax.f32 %v6945_v29, 0.0  ;;  %5057 = vmatprep.subr.bf16.mxu0 %v5540_v58 }
 0x33c   : > { %v7175_v55 = vadd.f32 %v6812_v41, %v2176_v36  ;;  %5004 = vmatmul.mubr.msk.bf16.gmra.mrb[140].mxu1 %vm2721_vm3, %v2643_v16  ;;  %v8240_v42 = vmax.f32 %v7168_v5, 0.0  ;;  %5058 = vmatpush3.bf16.msra.mxu0 %v5540_v58 }
 0x33d   : > { %v2299_v47 = vmax.f32 %v7171_v44, 0.0 }
 0x33e   : > { %v8241_v60 = vmax.f32 %v7175_v55, 0.0  ;;  %v8347_v27 = vmax.f32 %v7175_v55, 0.0 }
 0x33f   : > { %v5466_v26 = vpack.i.bf16 %v2299_v47, %v2298_v35 }
 0x340   : > { %v5461_v14 = vpack.i.bf16 %v8241_v60, %v8240_v42 }
 0x341   : > { %5467 = vrot.lane.b32.xlu1 %v5466_v26, %s5634_s29 }
 0x342   : > { %5462 = vrot.lane.b32.xlu0 %v5461_v14, %s5634_s29 }
 0x343   : > { %v5398_v32 = vpop.permute.xlu1 %5397 }
 0x344   : > { %v5400_v63 = vunpack.i.h.bf16 %v5398_v32  ;;  %v5399_v23 = vunpack.i.l.bf16 %v5398_v32  ;;  %v5393_v53 = vpop.permute.xlu0 %5392 }
 0x345   : > { %v5395_v62 = vunpack.i.h.bf16 %v5393_v53  ;;  %v5394_v46 = vunpack.i.l.bf16 %v5393_v53 }
 0x346   : > { %v2591_v7 = vmax.f32 %v2271_v50, %v5400_v63  ;;  %v2590_v37 = vmax.f32 %v2270_v10, %v5399_v23 }
 0x347   : > { %v2589_v16 = vmax.f32 %v8332_v0, %v5395_v62  ;;  %v2588_v36 = vmax.f32 %v8333_v2, %v5394_v46 }
 0x348   : > { %v4965_v26 = vpop.f32.mrb[112].mxu1  ;;  %v2645_v60 = vpack.c.bf16 %v2591_v7, %v2590_v37 }
 0x349   : > { %v2644_v14 = vpack.c.bf16 %v2589_v16, %v2588_v36  ;;  %v7201_v42 = vadd.f32 %v4965_v26, %v6812_v41  ;;  %v2189_v32 = vpop.f32.mrb[113].mxu1  ;;  %v8334_v26 = vmax.f32 %v6974_v38, 0.0 }
 0x34a   : > { %v7204_v53 = vadd.f32 %v6812_v41, %v2189_v32  ;;  %v4966_v17 = vpop.f32.mrb[114].mxu1  ;;  %v8335_v32 = vmax.f32 %v6968_v57, 0.0 }
 0x34b   : > { %v7207_v31 = vadd.f32 %v4966_v17, %v6812_v41  ;;  %v2192_v10 = vpop.f32.mrb[115].mxu1  ;;  %5007 = vmatprep.mubr.msk.bf16.mxu1 %vm2721_vm3, %v2644_v14  ;;  %v8244_v50 = vmax.f32 %v7201_v42, 0.0  ;;  %v8350_v55 = vmax.f32 %v7201_v42, 0.0 }
 0x34c   : > { %v7211_v29 = vadd.f32 %v6812_v41, %v2192_v10  ;;  %5008 = vmatmul.mubr.msk.bf16.gmra.mrb[144].mxu1 %vm2721_vm3, %v2645_v60  ;;  %v8242_v23 = vmax.f32 %v7204_v53, 0.0  ;;  %v8336_v10 = vmax.f32 %v6977_v25, 0.0 }
 0x34d   : > { %v8245_v63 = vmax.f32 %v7207_v31, 0.0  ;;  %v8349_v33 = vmax.f32 %v7207_v31, 0.0 }
 0x34e   : > { %v8243_v62 = vmax.f32 %v7211_v29, 0.0 }
 0x34f   : > { %v5476_v46 = vpack.i.bf16 %v8245_v63, %v8244_v50 }
 0x350   : > { %v5471_v60 = vpack.i.bf16 %v8243_v62, %v8242_v23  ;;  %v8337_v23 = vmax.f32 %v6971_v21, 0.0 }
 0x351   : > { %5477 = vrot.lane.b32.xlu1 %v5476_v46, %s5634_s29 }
 0x352   : > { %5472 = vrot.lane.b32.xlu0 %v5471_v60, %s5634_s29 }
 0x353   : > { %v5408_v7 = vpop.permute.xlu1 %5407 }
 0x354   : > { %v5410_v37 = vunpack.i.h.bf16 %v5408_v7  ;;  %v5409_v0 = vunpack.i.l.bf16 %v5408_v7  ;;  %v5403_v16 = vpop.permute.xlu0 %5402 }
 0x355   : > { %v5405_v2 = vunpack.i.h.bf16 %v5403_v16  ;;  %v5404_v36 = vunpack.i.l.bf16 %v5403_v16 }
 0x356   : > { %v2595_v14 = vmax.f32 %v8334_v26, %v5410_v37  ;;  %v2594_v17 = vmax.f32 %v8335_v32, %v5409_v0 }
 0x357   : > { %v2593_v58 = vmax.f32 %v8336_v10, %v5405_v2  ;;  %v2592_v46 = vmax.f32 %v8337_v23, %v5404_v36 }
 0x358   : > { %v4969_v62 = vpop.f32.mrb[116].mxu1  ;;  %v2647_v63 = vpack.c.bf16 %v2595_v14, %v2594_v17  ;;  %v5541_v17 = vld [vmem:[%s8175_s4 + $0x10] sm:$0xff]  }
 0x359   : > { %v2646_v60 = vpack.c.bf16 %v2593_v58, %v2592_v46  ;;  %v7240_v50 = vadd.f32 %v4969_v62, %v6812_v41  ;;  %v2205_v7 = vpop.f32.mrb[117].mxu1  ;;  %v8338_v46 = vmax.f32 %v7000_v13, 0.0  ;;  %5059 = vmatprep.subr.bf16.mxu0 %v5541_v17 }
 0x35a   : > { %v7243_v16 = vadd.f32 %v6812_v41, %v2205_v7  ;;  %v4970_v38 = vpop.f32.mrb[118].mxu1  ;;  %v8339_v7 = vmax.f32 %v6994_v19, 0.0  ;;  %5060 = vmatpush3.bf16.msra.mxu0 %v5541_v17 }
 0x35b   : > { %v7246_v57 = vadd.f32 %v4970_v38, %v6812_v41  ;;  %v2208_v37 = vpop.f32.mrb[119].mxu1  ;;  %5011 = vmatprep.mubr.msk.bf16.mxu1 %vm2721_vm3, %v2646_v60  ;;  %v8252_v25 = vmax.f32 %v7240_v50, 0.0 }
 0x35c   : > { %v7250_v21 = vadd.f32 %v6812_v41, %v2208_v37  ;;  %5012 = vmatmul.mubr.msk.bf16.gmra.mrb[148].mxu1 %vm2721_vm3, %v2647_v63  ;;  %v8246_v62 = vmax.f32 %v7243_v16, 0.0  ;;  %v8340_v37 = vmax.f32 %v7003_v49, 0.0 }
 0x35d   : > { %v8253_v23 = vmax.f32 %v7246_v57, 0.0  ;;  %v8353_v42 = vmax.f32 %v7246_v57, 0.0  ;;  %v7408_v57 = vld [vmem:[%s8177_s6 + $0x2] ss:$0 sm:$0xff] }
 0x35e   : > { %v8247_v0 = vmax.f32 %v7250_v21, 0.0 }
 0x35f   : > { %v5486_v2 = vpack.i.bf16 %v8253_v23, %v8252_v25 }
 0x360   : > { %v5481_v36 = vpack.i.bf16 %v8247_v0, %v8246_v62  ;;  %v5542_v0 = vld [vmem:[%s8175_s4 + $0x18] ss:$0 sps:$4 sm:$0x11]  }
 0x361   : > { %5487 = vrot.lane.b32.xlu1 %v5486_v2, %s5634_s29  ;;  %5128 = vmatprep.subr.msk.bf16.mxu0 %vm3471_vm4, %v5542_v0 }
 0x362   : > { %5482 = vrot.lane.b32.xlu0 %v5481_v36, %s5634_s29  ;;  %v8341_v36 = vmax.f32 %v6997_v48, 0.0  ;;  %v3473_v48 = vsel %vm3471_vm4, %v5542_v0, 0 }
 0x363   : > { %v5418_v63 = vpop.permute.xlu1 %5417  ;;  %5062 = vmatpush3.bf16.msra.mxu0 %v3473_v48  ;;  %v8343_v48 = vmax.f32 %v7020_v52, 0.0 }
 0x364   : > { %v5420_v26 = vunpack.i.h.bf16 %v5418_v63  ;;  %v5419_v14 = vunpack.i.l.bf16 %v5418_v63  ;;  %v5413_v32 = vpop.permute.xlu0 %5412 }
 0x365   : > { %v5415_v10 = vunpack.i.h.bf16 %v5413_v32  ;;  %v5414_v58 = vunpack.i.l.bf16 %v5413_v32 }
 0x366   : > { %v2599_v60 = vmax.f32 %v8338_v46, %v5420_v26  ;;  %v2598_v38 = vmax.f32 %v8339_v7, %v5419_v14 }
 0x367   : > { %v2597_v2 = vmax.f32 %v8340_v37, %v5415_v10  ;;  %v2596_v63 = vmax.f32 %v8341_v36, %v5414_v58 }
 0x368   : > { %v4973_v62 = vpop.f32.mrb[120].mxu1  ;;  %v2649_v19 = vpack.c.bf16 %v2599_v60, %v2598_v38 }
 0x369   : > { %v2648_v32 = vpack.c.bf16 %v2597_v2, %v2596_v63  ;;  %v7282_v13 = vadd.f32 %v4973_v62, %v6812_v41  ;;  %v2221_v26 = vpop.f32.mrb[121].mxu1 }
 0x36a   : > { %v7285_v14 = vadd.f32 %v6812_v41, %v2221_v26  ;;  %v4974_v49 = vpop.f32.mrb[122].mxu1 }
 0x36b   : > { %v7288_v17 = vadd.f32 %v4974_v49, %v6812_v41  ;;  %v2224_v10 = vpop.f32.mrb[123].mxu1  ;;  %5015 = vmatprep.mubr.msk.bf16.mxu1 %vm2721_vm3, %v2648_v32  ;;  %v8248_v62 = vmax.f32 %v7282_v13, 0.0 }
 0x36c   : > { %v7292_v58 = vadd.f32 %v6812_v41, %v2224_v10  ;;  %5016 = vmatmul.mubr.msk.bf16.gmra.mrb[152].mxu1 %vm2721_vm3, %v2649_v19  ;;  %v8250_v60 = vmax.f32 %v7285_v14, 0.0  ;;  %v8342_v19 = vmax.f32 %v7026_v28, 0.0 }
 0x36d   : > { %v8249_v46 = vmax.f32 %v7288_v17, 0.0 }
 0x36e   : > { %v8251_v0 = vmax.f32 %v7292_v58, 0.0 }
 0x36f   : > { %v5496_v7 = vpack.i.bf16 %v8249_v46, %v8248_v62  ;;  %v8344_v62 = vmax.f32 %v7029_v39, 0.0 }
 0x370   : > { %v5491_v38 = vpack.i.bf16 %v8251_v0, %v8250_v60  ;;  %v8345_v60 = vmax.f32 %v7023_v6, 0.0 }
 0x371   : > { %5497 = vrot.lane.b32.xlu1 %v5496_v7, %s5634_s29 }
 0x372   : > { %5492 = vrot.lane.b32.xlu0 %v5491_v38, %s5634_s29 }
 0x373   : > { %v5428_v37 = vpop.permute.xlu1 %5427 }
 0x374   : > { %v5430_v2 = vunpack.i.h.bf16 %v5428_v37  ;;  %v5429_v36 = vunpack.i.l.bf16 %v5428_v37  ;;  %v5423_v63 = vpop.permute.xlu0 %5422 }
 0x375   : > { %v5425_v32 = vunpack.i.h.bf16 %v5423_v63  ;;  %v5424_v26 = vunpack.i.l.bf16 %v5423_v63 }
 0x376   : > { %v2603_v49 = vmax.f32 %v8342_v19, %v5430_v2  ;;  %v2602_v10 = vmax.f32 %v8343_v48, %v5429_v36 }
 0x377   : > { %v2601_v46 = vmax.f32 %v8344_v62, %v5425_v32  ;;  %v2600_v7 = vmax.f32 %v8345_v60, %v5424_v26 }
 0x378   : > { %v4977_v0 = vpop.f32.mrb[124].mxu1  ;;  %v2651_v23 = vpack.c.bf16 %v2603_v49, %v2602_v10 }
 0x379   : > { %v2650_v38 = vpack.c.bf16 %v2601_v46, %v2600_v7  ;;  %v7318_v25 = vadd.f32 %v4977_v0, %v6812_v41  ;;  %v2237_v37 = vpop.f32.mrb[125].mxu1 }
 0x37a   : > { %v7321_v63 = vadd.f32 %v6812_v41, %v2237_v37  ;;  %v4978_v28 = vpop.f32.mrb[126].mxu1 }
 0x37b   : > { %v7324_v52 = vadd.f32 %v4978_v28, %v6812_v41  ;;  %v2240_v2 = vpop.f32.mrb[127].mxu1  ;;  %5019 = vmatprep.mubr.msk.bf16.mxu1 %vm2721_vm3, %v2650_v38  ;;  %v2314_v6 = vmax.f32 %v7318_v25, 0.0  ;;  %v8346_v38 = vmax.f32 %v7057_v18, 0.0 }
 0x37c   : > { %v7328_v39 = vadd.f32 %v6812_v41, %v2240_v2  ;;  %5020 = vmatmul.mubr.msk.bf16.gmra.mrb[156].mxu1 %vm2721_vm3, %v2651_v23  ;;  %v2312_v46 = vmax.f32 %v7321_v63, 0.0 }
 0x37d   : > { %v2315_v62 = vmax.f32 %v7324_v52, 0.0 }
 0x37e   : > { %v2313_v60 = vmax.f32 %v7328_v39, 0.0 }
 0x37f   : > { %v5506_v0 = vpack.i.bf16 %v2315_v62, %v2314_v6 }
 0x380   : > { %v5501_v41 = vpack.i.bf16 %v2313_v60, %v2312_v46 }
 0x381   : > { %5507 = vrot.lane.b32.xlu1 %v5506_v0, %s5634_s29 }
 0x382   : > { %5502 = vrot.lane.b32.xlu0 %v5501_v41, %s5634_s29  ;;  %s4661_s29 = sshll.u32 %s5700_s28, 9  ;;  %s4404_s28 = scalar_lea.sflag [#allocation3], %s287_s22 }
 0x383   : > { %v5438_v23 = vpop.permute.xlu1 %5437  ;;  %s8124_s15 = scalar_lea.hbm %s8178_s7, %s4661_s29 }
 0x384   : > { %v5440_v36 = vunpack.i.h.bf16 %v5438_v23  ;;  %v5439_v32 = vunpack.i.l.bf16 %v5438_v23  ;;  %v5433_v26 = vpop.permute.xlu0 %5432 }
 0x385   : > { %v5435_v19 = vunpack.i.h.bf16 %v5433_v26  ;;  %v5434_v49 = vunpack.i.l.bf16 %v5433_v26 }
 0x386   : > { %v2607_v48 = vmax.f32 %v2287_v45, %v5440_v36  ;;  %v2606_v10 = vmax.f32 %v2286_v59, %v5439_v32 }
 0x387   : > { %v2605_v7 = vmax.f32 %v2285_v51, %v5435_v19  ;;  %v2604_v37 = vmax.f32 %v8346_v38, %v5434_v49 }
 0x388   : > { %v2653_v2 = vpack.c.bf16 %v2607_v48, %v2606_v10 }
 0x389   : > { %v2652_v28 = vpack.c.bf16 %v2605_v7, %v2604_v37 }
 0x38b   : > { %5023 = vmatprep.mubr.msk.bf16.mxu1 %vm2721_vm3, %v2652_v28 }
 0x38c   : > { %5024 = vmatmul.mubr.msk.bf16.gmra.mrb[160].mxu1 %vm2721_vm3, %v2653_v2 }
 0x393   : > { %v5448_v0 = vpop.permute.xlu1 %5447 }
 0x394   : > { %v5450_v41 = vunpack.i.h.bf16 %v5448_v0  ;;  %v5449_v23 = vunpack.i.l.bf16 %v5448_v0  ;;  %v5443_v40 = vpop.permute.xlu0 %5442 }
 0x395   : > { %v5445_v45 = vunpack.i.h.bf16 %v5443_v40  ;;  %v5444_v36 = vunpack.i.l.bf16 %v5443_v40 }
 0x396   : > { %v2611_v12 = vmax.f32 %v2291_v8, %v5450_v41  ;;  %v2610_v24 = vmax.f32 %v2290_v61, %v5449_v23 }
 0x397   : > { %v2609_v18 = vmax.f32 %v2289_v20, %v5445_v45  ;;  %v2608_v59 = vmax.f32 %v2288_v30, %v5444_v36 }
 0x398   : > { %v2655_v32 = vpack.c.bf16 %v2611_v12, %v2610_v24  ;;  %v8352_v12 = vmax.f32 %v7204_v53, 0.0  ;;  %v8355_v53 = vmax.f32 %v7250_v21, 0.0 }
 0x399   : > { %v2654_v51 = vpack.c.bf16 %v2609_v18, %v2608_v59 }
 0x39b   : > { %5027 = vmatprep.mubr.msk.bf16.mxu1 %vm2721_vm3, %v2654_v51 }
 0x39c   : > { %5028 = vmatmul.mubr.msk.bf16.gmra.mrb[164].mxu1 %vm2721_vm3, %v2655_v32 }
 0x3a3   : > { %v5458_v26 = vpop.permute.xlu1 %5457 }
 0x3a4   : > { %v5460_v19 = vunpack.i.h.bf16 %v5458_v26  ;;  %v5459_v49 = vunpack.i.l.bf16 %v5458_v26  ;;  %v5453_v56 = vpop.permute.xlu0 %5452 }
 0x3a5   : > { %v5455_v8 = vunpack.i.h.bf16 %v5453_v56  ;;  %v5454_v48 = vunpack.i.l.bf16 %v5453_v56 }
 0x3a6   : > { %v2615_v1 = vmax.f32 %v2295_v43, %v5460_v19  ;;  %v2614_v34 = vmax.f32 %v2294_v3, %v5459_v49 }
 0x3a7   : > { %v2613_v54 = vmax.f32 %v2293_v4, %v5455_v8  ;;  %v2612_v61 = vmax.f32 %v2292_v15, %v5454_v48  ;;  %v8348_v15 = vmax.f32 %v7168_v5, 0.0  ;;  %v8351_v5 = vmax.f32 %v7211_v29, 0.0 }
 0x3a8   : > { %v2657_v20 = vpack.c.bf16 %v2615_v1, %v2614_v34  ;;  %v8354_v29 = vmax.f32 %v7240_v50, 0.0  ;;  %v8356_v1 = vmax.f32 %v7243_v16, 0.0  ;;  %v7414_v16 = vld [vmem:[%s8177_s6 + $0x3] ss:$0 sm:$0xff] }
 0x3a9   : > { %v2656_v30 = vpack.c.bf16 %v2613_v54, %v2612_v61 }
 0x3ab   : > { %5031 = vmatprep.mubr.msk.bf16.mxu1 %vm2721_vm3, %v2656_v30 }
 0x3ac   : > { %5032 = vmatmul.mubr.msk.bf16.gmra.mrb[168].mxu1 %vm2721_vm3, %v2657_v20 }
 0x3b3   : > { %v5468_v10 = vpop.permute.xlu1 %5467 }
 0x3b4   : > { %v5470_v7 = vunpack.i.h.bf16 %v5468_v10  ;;  %v5469_v38 = vunpack.i.l.bf16 %v5468_v10  ;;  %v5463_v11 = vpop.permute.xlu0 %5462 }
 0x3b5   : > { %v5465_v43 = vunpack.i.h.bf16 %v5463_v11  ;;  %v5464_v37 = vunpack.i.l.bf16 %v5463_v11 }
 0x3b6   : > { %v2619_v9 = vmax.f32 %v2299_v47, %v5470_v7  ;;  %v2618_v22 = vmax.f32 %v2298_v35, %v5469_v38 }
 0x3b7   : > { %v2617_v3 = vmax.f32 %v8347_v27, %v5465_v43  ;;  %v2616_v4 = vmax.f32 %v8348_v15, %v5464_v37 }
 0x3b8   : > { %v2659_v2 = vpack.c.bf16 %v2619_v9, %v2618_v22 }
 0x3b9   : > { %v2658_v28 = vpack.c.bf16 %v2617_v3, %v2616_v4 }
 0x3bb   : > { %5035 = vmatprep.mubr.msk.bf16.mxu1 %vm2721_vm3, %v2658_v28  ;;  %v7423_v28 = vld [vmem:[%s8177_s6 + $0x4] ss:$0 sm:$0xff] }
 0x3bc   : > { %5036 = vmatmul.mubr.msk.bf16.gmra.mrb[172].mxu1 %vm2721_vm3, %v2659_v2 }
 0x3c3   : > { %v5478_v0 = vpop.permute.xlu1 %5477 }
 0x3c4   : > { %v5480_v41 = vunpack.i.h.bf16 %v5478_v0  ;;  %v5479_v23 = vunpack.i.l.bf16 %v5478_v0  ;;  %v5473_v44 = vpop.permute.xlu0 %5472 }
 0x3c5   : > { %v5475_v47 = vunpack.i.h.bf16 %v5473_v44  ;;  %v5474_v40 = vunpack.i.l.bf16 %v5473_v44 }
 0x3c6   : > { %v2623_v35 = vmax.f32 %v8349_v33, %v5480_v41  ;;  %v2622_v45 = vmax.f32 %v8350_v55, %v5479_v23  ;;  %v8358_v33 = vmax.f32 %v7282_v13, 0.0 }
 0x3c7   : > { %v2621_v36 = vmax.f32 %v8351_v5, %v5475_v47  ;;  %v2620_v24 = vmax.f32 %v8352_v12, %v5474_v40  ;;  %v8357_v47 = vmax.f32 %v7288_v17, 0.0 }
 0x3c8   : > { %v2661_v59 = vpack.c.bf16 %v2623_v35, %v2622_v45  ;;  %v8359_v45 = vmax.f32 %v7292_v58, 0.0 }
 0x3c9   : > { %v2660_v18 = vpack.c.bf16 %v2621_v36, %v2620_v24  ;;  %v8360_v36 = vmax.f32 %v7285_v14, 0.0 }
 0x3cb   : > { %5039 = vmatprep.mubr.msk.bf16.mxu1 %vm2721_vm3, %v2660_v18 }
 0x3cc   : > { %5040 = vmatmul.mubr.msk.bf16.gmra.mrb[176].mxu1 %vm2721_vm3, %v2661_v59 }
 0x3d3   : > { %v5488_v51 = vpop.permute.xlu1 %5487 }
 0x3d4   : > { %v5490_v32 = vunpack.i.h.bf16 %v5488_v51  ;;  %v5489_v26 = vunpack.i.l.bf16 %v5488_v51  ;;  %v5483_v31 = vpop.permute.xlu0 %5482 }
 0x3d5   : > { %v5485_v19 = vunpack.i.h.bf16 %v5483_v31  ;;  %v5484_v49 = vunpack.i.l.bf16 %v5483_v31 }
 0x3d6   : > { %v2627_v56 = vmax.f32 %v8353_v42, %v5490_v32  ;;  %v2626_v8 = vmax.f32 %v8354_v29, %v5489_v26 }
 0x3d7   : > { %v2625_v48 = vmax.f32 %v8355_v53, %v5485_v19  ;;  %v2624_v34 = vmax.f32 %v8356_v1, %v5484_v49 }
 0x3d8   : > { %v2663_v61 = vpack.c.bf16 %v2627_v56, %v2626_v8 }
 0x3d9   : > { %v2662_v54 = vpack.c.bf16 %v2625_v48, %v2624_v34 }
 0x3db   : > { %5043 = vmatprep.mubr.msk.bf16.mxu1 %vm2721_vm3, %v2662_v54 }
 0x3dc   : > { %5044 = vmatmul.mubr.msk.bf16.gmra.mrb[180].mxu1 %vm2721_vm3, %v2663_v61 }
 0x3df   : > { %v4993_v30 = vpop.f32.mrb[128].mxu1 }
 0x3e0   : > { %v2861_v50 = vadd.f32 %v4993_v30, %v7408_v57  ;;  %v2852_v20 = vpop.f32.mrb[129].mxu1 }
 0x3e1   : > { %v2853_v21 = vadd.f32 %v7408_v57, %v2852_v20  ;;  %v4994_v10 = vpop.f32.mrb[130].mxu1 }
 0x3e2   : > { %v3109_v7 = vmax.f32 %v2861_v50, 0.0  ;;  %v2864_v38 = vadd.f32 %v4994_v10, %v7408_v57  ;;  %v2855_v11 = vpop.f32.mrb[131].mxu1 }
 0x3e3   : > { %v3107_v43 = vmax.f32 %v2853_v21, 0.0  ;;  %v2856_v37 = vadd.f32 %v7408_v57, %v2855_v11  ;;  %v5498_v9 = vpop.permute.xlu1 %5497 }
 0x3e4   : > { %v3178_v22 = vmul.f32 %v7414_v16, %v3109_v7  ;;  %v3110_v27 = vmax.f32 %v2864_v38, 0.0  ;;  %v5500_v3 = vunpack.i.h.bf16 %v5498_v9  ;;  %v5499_v15 = vunpack.i.l.bf16 %v5498_v9  ;;  %v5493_v4 = vpop.permute.xlu0 %5492 }
 0x3e5   : > { %v3176_v2 = vmul.f32 %v7414_v16, %v3107_v43  ;;  %v3108_v0 = vmax.f32 %v2856_v37, 0.0  ;;  %v5495_v41 = vunpack.i.h.bf16 %v5493_v4  ;;  %v5494_v23 = vunpack.i.l.bf16 %v5493_v4 }
 0x3e6   : > { %v3179_v44 = vmul.f32 %v7414_v16, %v3110_v27  ;;  %v2631_v40 = vmax.f32 %v8357_v47, %v5500_v3  ;;  %v2630_v35 = vmax.f32 %v8358_v33, %v5499_v15  ;;  %v3247_v24 = vadd.f32 %v7423_v28, %v3178_v22 }
 0x3e7   : > { %v3177_v55 = vmul.f32 %v7414_v16, %v3108_v0  ;;  %v2629_v5 = vmax.f32 %v8359_v45, %v5495_v41  ;;  %v2628_v12 = vmax.f32 %v8360_v36, %v5494_v23  ;;  %v3245_v59 = vadd.f32 %v7423_v28, %v3176_v2 }
 0x3e8   : > { %v3248_v18 = vadd.f32 %v7423_v28, %v3179_v44  ;;  %v2665_v13 = vpack.c.bf16 %v2631_v40, %v2630_v35 }
 0x3e9   : > { %v3246_v17 = vadd.f32 %v7423_v28, %v3177_v55  ;;  %v2664_v51 = vpack.c.bf16 %v2629_v5, %v2628_v12 }
 0x3ea   : > { %v3310_v32 = vpack.c.bf16 %v3248_v18, %v3247_v24 }
 0x3eb   : > { %v3309_v26 = vpack.c.bf16 %v3246_v17, %v3245_v59  ;;  %5047 = vmatprep.mubr.msk.bf16.mxu1 %vm2721_vm3, %v2664_v51 }
 0x3ec   : > { %5048 = vmatmul.mubr.msk.bf16.gmra.mrb[184].mxu1 %vm2721_vm3, %v2665_v13 }
 0x3ed   : > { %5063 = vmatprep.mubr.msk.bf16.mxu0 %vm3374_vm5, %v3309_v26 }
 0x3ee   : > { %5064 = vmatmul.mubr.msk.bf16.vlgmr.msra.gmra.mrb[128].mxu0 %vm3374_vm5, %v3310_v32 }
 0x3ef   : > { %v4997_v14 = vpop.f32.mrb[132].mxu1 }
 0x3f0   : > { %v2877_v58 = vadd.f32 %v4997_v14, %v7408_v57  ;;  %v2868_v31 = vpop.f32.mrb[133].mxu1 }
 0x3f1   : > { %v2869_v19 = vadd.f32 %v7408_v57, %v2868_v31  ;;  %v4998_v49 = vpop.f32.mrb[134].mxu1 }
 0x3f2   : > { %v3113_v42 = vmax.f32 %v2877_v58, 0.0  ;;  %v2880_v56 = vadd.f32 %v4998_v49, %v7408_v57  ;;  %v2871_v29 = vpop.f32.mrb[135].mxu1 }
 0x3f3   : > { %v3111_v8 = vmax.f32 %v2869_v19, 0.0  ;;  %v2872_v53 = vadd.f32 %v7408_v57, %v2871_v29  ;;  %v5508_v48 = vpop.permute.xlu1 %5507 }
 0x3f4   : > { %v3182_v1 = vmul.f32 %v7414_v16, %v3113_v42  ;;  %v3114_v34 = vmax.f32 %v2880_v56, 0.0  ;;  %v5510_v54 = vunpack.i.h.bf16 %v5508_v48  ;;  %v5509_v61 = vunpack.i.l.bf16 %v5508_v48  ;;  %v5503_v30 = vpop.permute.xlu0 %5502 }
 0x3f5   : > { %v3180_v50 = vmul.f32 %v7414_v16, %v3111_v8  ;;  %v3112_v20 = vmax.f32 %v2872_v53, 0.0  ;;  %v5505_v21 = vunpack.i.h.bf16 %v5503_v30  ;;  %v5504_v10 = vunpack.i.l.bf16 %v5503_v30 }
 0x3f6   : > { %v3183_v7 = vmul.f32 %v7414_v16, %v3114_v34  ;;  %v2635_v38 = vmax.f32 %v2315_v62, %v5510_v54  ;;  %v2634_v11 = vmax.f32 %v2314_v6, %v5509_v61  ;;  %v3251_v22 = vadd.f32 %v7423_v28, %v3182_v1 }
 0x3f7   : > { %v3181_v43 = vmul.f32 %v7414_v16, %v3112_v20  ;;  %v2633_v37 = vmax.f32 %v2313_v60, %v5505_v21  ;;  %v2632_v9 = vmax.f32 %v2312_v46, %v5504_v10  ;;  %v3249_v3 = vadd.f32 %v7423_v28, %v3180_v50 }
 0x3f8   : > { %v3252_v27 = vadd.f32 %v7423_v28, %v3183_v7  ;;  %v2667_v25 = vpack.c.bf16 %v2635_v38, %v2634_v11 }
 0x3f9   : > { %v3250_v52 = vadd.f32 %v7423_v28, %v3181_v43  ;;  %v2666_v62 = vpack.c.bf16 %v2633_v37, %v2632_v9 }
 0x3fa   : > { %v3312_v15 = vpack.c.bf16 %v3252_v27, %v3251_v22 }
 0x3fb   : > { %v3311_v6 = vpack.c.bf16 %v3250_v52, %v3249_v3  ;;  %5051 = vmatprep.mubr.msk.bf16.mxu1 %vm2721_vm3, %v2666_v62 }
 0x3fc   : > { %5052 = vmatmul.mubr.msk.bf16.gmra.mrb[188].mxu1 %vm2721_vm3, %v2667_v25 }
 0x3fd   : > { %5067 = vmatprep.mubr.msk.bf16.mxu0 %vm3374_vm5, %v3311_v6 }
 0x3fe   : > { %5068 = vmatmul.mubr.msk.bf16.gmra.mrb[132].mxu0 %vm3374_vm5, %v3312_v15 }
 0x3ff   : > { %v5001_v63 = vpop.f32.mrb[136].mxu1 }
 0x400   : > { %v2893_v39 = vadd.f32 %v5001_v63, %v7408_v57  ;;  %v2884_v46 = vpop.f32.mrb[137].mxu1 }
 0x401   : > { %v2885_v60 = vadd.f32 %v7408_v57, %v2884_v46  ;;  %v5002_v4 = vpop.f32.mrb[138].mxu1 }
 0x402   : > { %v3117_v2 = vmax.f32 %v2893_v39, 0.0  ;;  %v2896_v0 = vadd.f32 %v5002_v4, %v7408_v57  ;;  %v2887_v41 = vpop.f32.mrb[139].mxu1 }
 0x403   : > { %v3115_v23 = vmax.f32 %v2885_v60, 0.0  ;;  %v2888_v44 = vadd.f32 %v7408_v57, %v2887_v41 }
 0x404   : > { %v3186_v47 = vmul.f32 %v7414_v16, %v3117_v2  ;;  %v3118_v40 = vmax.f32 %v2896_v0, 0.0 }
 0x405   : > { %v3184_v33 = vmul.f32 %v7414_v16, %v3115_v23  ;;  %v3116_v35 = vmax.f32 %v2888_v44, 0.0 }
 0x406   : > { %v3187_v55 = vmul.f32 %v7414_v16, %v3118_v40  ;;  %v3255_v5 = vadd.f32 %v7423_v28, %v3186_v47 }
 0x407   : > { %v3185_v45 = vmul.f32 %v7414_v16, %v3116_v35  ;;  %v3253_v12 = vadd.f32 %v7423_v28, %v3184_v33 }
 0x408   : > { %v3256_v36 = vadd.f32 %v7423_v28, %v3187_v55 }
 0x409   : > { %v3254_v24 = vadd.f32 %v7423_v28, %v3185_v45 }
 0x40a   : > { %v3314_v18 = vpack.c.bf16 %v3256_v36, %v3255_v5 }
 0x40b   : > { %v3313_v59 = vpack.c.bf16 %v3254_v24, %v3253_v12 }
 0x40d   : > { %5071 = vmatprep.mubr.msk.bf16.mxu0 %vm3374_vm5, %v3313_v59 }
 0x40e   : > { %5072 = vmatmul.mubr.msk.bf16.gmra.mrb[136].mxu0 %vm3374_vm5, %v3314_v18 }
 0x40f   : > { %v5005_v17 = vpop.f32.mrb[140].mxu1 }
 0x410   : > { %v2909_v51 = vadd.f32 %v5005_v17, %v7408_v57  ;;  %v2900_v32 = vpop.f32.mrb[141].mxu1 }
 0x411   : > { %v2901_v13 = vadd.f32 %v7408_v57, %v2900_v32  ;;  %v5006_v26 = vpop.f32.mrb[142].mxu1 }
 0x412   : > { %v3121_v14 = vmax.f32 %v2909_v51, 0.0  ;;  %v2912_v58 = vadd.f32 %v5006_v26, %v7408_v57  ;;  %v2903_v31 = vpop.f32.mrb[143].mxu1 }
 0x413   : > { %v3119_v19 = vmax.f32 %v2901_v13, 0.0  ;;  %v2904_v49 = vadd.f32 %v7408_v57, %v2903_v31 }
 0x414   : > { %v3190_v42 = vmul.f32 %v7414_v16, %v3121_v14  ;;  %v3122_v56 = vmax.f32 %v2912_v58, 0.0 }
 0x415   : > { %v3188_v29 = vmul.f32 %v7414_v16, %v3119_v19  ;;  %v3120_v8 = vmax.f32 %v2904_v49, 0.0 }
 0x416   : > { %v3191_v53 = vmul.f32 %v7414_v16, %v3122_v56  ;;  %v3259_v1 = vadd.f32 %v7423_v28, %v3190_v42 }
 0x417   : > { %v3189_v48 = vmul.f32 %v7414_v16, %v3120_v8  ;;  %v3257_v54 = vadd.f32 %v7423_v28, %v3188_v29 }
 0x418   : > { %v3260_v34 = vadd.f32 %v7423_v28, %v3191_v53 }
 0x419   : > { %v3258_v61 = vadd.f32 %v7423_v28, %v3189_v48 }
 0x41a   : > { %v3316_v30 = vpack.c.bf16 %v3260_v34, %v3259_v1 }
 0x41b   : > { %v3315_v50 = vpack.c.bf16 %v3258_v61, %v3257_v54 }
 0x41d   : > { %5075 = vmatprep.mubr.msk.bf16.mxu0 %vm3374_vm5, %v3315_v50 }
 0x41e   : > { %5076 = vmatmul.mubr.msk.bf16.gmra.mrb[140].mxu0 %vm3374_vm5, %v3316_v30 }
 0x41f   : > { %v5009_v20 = vpop.f32.mrb[144].mxu1 }
 0x420   : > { %v2925_v21 = vadd.f32 %v5009_v20, %v7408_v57  ;;  %v2916_v10 = vpop.f32.mrb[145].mxu1 }
 0x421   : > { %v2917_v7 = vadd.f32 %v7408_v57, %v2916_v10  ;;  %v5010_v38 = vpop.f32.mrb[146].mxu1 }
 0x422   : > { %v3125_v11 = vmax.f32 %v2925_v21, 0.0  ;;  %v2928_v43 = vadd.f32 %v5010_v38, %v7408_v57  ;;  %v2919_v37 = vpop.f32.mrb[147].mxu1 }
 0x423   : > { %v3123_v9 = vmax.f32 %v2917_v7, 0.0  ;;  %v2920_v22 = vadd.f32 %v7408_v57, %v2919_v37 }
 0x424   : > { %v3194_v27 = vmul.f32 %v7414_v16, %v3125_v11  ;;  %v3126_v3 = vmax.f32 %v2928_v43, 0.0 }
 0x425   : > { %v3192_v52 = vmul.f32 %v7414_v16, %v3123_v9  ;;  %v3124_v62 = vmax.f32 %v2920_v22, 0.0 }
 0x426   : > { %v3195_v15 = vmul.f32 %v7414_v16, %v3126_v3  ;;  %v3263_v6 = vadd.f32 %v7423_v28, %v3194_v27 }
 0x427   : > { %v3193_v25 = vmul.f32 %v7414_v16, %v3124_v62  ;;  %v3261_v39 = vadd.f32 %v7423_v28, %v3192_v52 }
 0x428   : > { %v3264_v63 = vadd.f32 %v7423_v28, %v3195_v15 }
 0x429   : > { %v3262_v46 = vadd.f32 %v7423_v28, %v3193_v25 }
 0x42a   : > { %v3318_v60 = vpack.c.bf16 %v3264_v63, %v3263_v6 }
 0x42b   : > { %v3317_v4 = vpack.c.bf16 %v3262_v46, %v3261_v39 }
 0x42d   : > { %5079 = vmatprep.mubr.msk.bf16.mxu0 %vm3374_vm5, %v3317_v4 }
 0x42e   : > { %5080 = vmatmul.mubr.msk.bf16.gmra.mrb[144].mxu0 %vm3374_vm5, %v3318_v60 }
 0x42f   : > { %v5013_v2 = vpop.f32.mrb[148].mxu1 }
 0x430   : > { %v2941_v0 = vadd.f32 %v5013_v2, %v7408_v57  ;;  %v2932_v41 = vpop.f32.mrb[149].mxu1 }
 0x431   : > { %v2933_v23 = vadd.f32 %v7408_v57, %v2932_v41  ;;  %v5014_v44 = vpop.f32.mrb[150].mxu1 }
 0x432   : > { %v3129_v47 = vmax.f32 %v2941_v0, 0.0  ;;  %v2944_v40 = vadd.f32 %v5014_v44, %v7408_v57  ;;  %v2935_v33 = vpop.f32.mrb[151].mxu1 }
 0x433   : > { %v3127_v35 = vmax.f32 %v2933_v23, 0.0  ;;  %v2936_v55 = vadd.f32 %v7408_v57, %v2935_v33 }
 0x434   : > { %v3198_v45 = vmul.f32 %v7414_v16, %v3129_v47  ;;  %v3130_v5 = vmax.f32 %v2944_v40, 0.0 }
 0x435   : > { %v3196_v36 = vmul.f32 %v7414_v16, %v3127_v35  ;;  %v3128_v12 = vmax.f32 %v2936_v55, 0.0 }
 0x436   : > { %v3199_v24 = vmul.f32 %v7414_v16, %v3130_v5  ;;  %v3267_v59 = vadd.f32 %v7423_v28, %v3198_v45 }
 0x437   : > { %v3197_v18 = vmul.f32 %v7414_v16, %v3128_v12  ;;  %v3265_v51 = vadd.f32 %v7423_v28, %v3196_v36 }
 0x438   : > { %v3268_v17 = vadd.f32 %v7423_v28, %v3199_v24 }
 0x439   : > { %v3266_v32 = vadd.f32 %v7423_v28, %v3197_v18 }
 0x43a   : > { %v3320_v13 = vpack.c.bf16 %v3268_v17, %v3267_v59 }
 0x43b   : > { %v3319_v26 = vpack.c.bf16 %v3266_v32, %v3265_v51 }
 0x43d   : > { %5083 = vmatprep.mubr.msk.bf16.mxu0 %vm3374_vm5, %v3319_v26 }
 0x43e   : > { %5084 = vmatmul.mubr.msk.bf16.gmra.mrb[148].mxu0 %vm3374_vm5, %v3320_v13 }
 0x43f   : > { %v5017_v14 = vpop.f32.mrb[152].mxu1 }
 0x440   : > { %v2957_v58 = vadd.f32 %v5017_v14, %v7408_v57  ;;  %v2948_v31 = vpop.f32.mrb[153].mxu1 }
 0x441   : > { %v2949_v19 = vadd.f32 %v7408_v57, %v2948_v31  ;;  %v5018_v49 = vpop.f32.mrb[154].mxu1 }
 0x442   : > { %v3133_v42 = vmax.f32 %v2957_v58, 0.0  ;;  %v2960_v56 = vadd.f32 %v5018_v49, %v7408_v57  ;;  %v2951_v29 = vpop.f32.mrb[155].mxu1 }
 0x443   : > { %v3131_v8 = vmax.f32 %v2949_v19, 0.0  ;;  %v2952_v53 = vadd.f32 %v7408_v57, %v2951_v29 }
 0x444   : > { %v3202_v48 = vmul.f32 %v7414_v16, %v3133_v42  ;;  %v3134_v1 = vmax.f32 %v2960_v56, 0.0 }
 0x445   : > { %v3200_v34 = vmul.f32 %v7414_v16, %v3131_v8  ;;  %v3132_v54 = vmax.f32 %v2952_v53, 0.0 }
 0x446   : > { %v3203_v61 = vmul.f32 %v7414_v16, %v3134_v1  ;;  %v3271_v50 = vadd.f32 %v7423_v28, %v3202_v48 }
 0x447   : > { %v3201_v30 = vmul.f32 %v7414_v16, %v3132_v54  ;;  %v3269_v21 = vadd.f32 %v7423_v28, %v3200_v34 }
 0x448   : > { %v3272_v20 = vadd.f32 %v7423_v28, %v3203_v61 }
 0x449   : > { %v3270_v10 = vadd.f32 %v7423_v28, %v3201_v30 }
 0x44a   : > { %v3322_v7 = vpack.c.bf16 %v3272_v20, %v3271_v50 }
 0x44b   : > { %v3321_v38 = vpack.c.bf16 %v3270_v10, %v3269_v21 }
 0x44d   : > { %5087 = vmatprep.mubr.msk.bf16.mxu0 %vm3374_vm5, %v3321_v38 }
 0x44e   : > { %5088 = vmatmul.mubr.msk.bf16.gmra.mrb[152].mxu0 %vm3374_vm5, %v3322_v7 }
 0x44f   : > { %v5021_v11 = vpop.f32.mrb[156].mxu1 }
 0x450   : > { %v2973_v43 = vadd.f32 %v5021_v11, %v7408_v57  ;;  %v2964_v37 = vpop.f32.mrb[157].mxu1 }
 0x451   : > { %v2965_v9 = vadd.f32 %v7408_v57, %v2964_v37  ;;  %v5022_v22 = vpop.f32.mrb[158].mxu1 }
 0x452   : > { %v3137_v27 = vmax.f32 %v2973_v43, 0.0  ;;  %v2976_v3 = vadd.f32 %v5022_v22, %v7408_v57  ;;  %v2967_v52 = vpop.f32.mrb[159].mxu1 }
 0x453   : > { %v3135_v62 = vmax.f32 %v2965_v9, 0.0  ;;  %v2968_v15 = vadd.f32 %v7408_v57, %v2967_v52 }
 0x454   : > { %v3206_v25 = vmul.f32 %v7414_v16, %v3137_v27  ;;  %v3138_v6 = vmax.f32 %v2976_v3, 0.0 }
 0x455   : > { %v3204_v63 = vmul.f32 %v7414_v16, %v3135_v62  ;;  %v3136_v39 = vmax.f32 %v2968_v15, 0.0 }
 0x456   : > { %v3207_v46 = vmul.f32 %v7414_v16, %v3138_v6  ;;  %v3275_v4 = vadd.f32 %v7423_v28, %v3206_v25 }
 0x457   : > { %v3205_v60 = vmul.f32 %v7414_v16, %v3136_v39  ;;  %v3273_v0 = vadd.f32 %v7423_v28, %v3204_v63 }
 0x458   : > { %v3276_v2 = vadd.f32 %v7423_v28, %v3207_v46 }
 0x459   : > { %v3274_v41 = vadd.f32 %v7423_v28, %v3205_v60 }
 0x45a   : > { %v3324_v23 = vpack.c.bf16 %v3276_v2, %v3275_v4 }
 0x45b   : > { %v3323_v44 = vpack.c.bf16 %v3274_v41, %v3273_v0 }
 0x45d   : > { %5091 = vmatprep.mubr.msk.bf16.mxu0 %vm3374_vm5, %v3323_v44 }
 0x45e   : > { %5092 = vmatmul.mubr.msk.bf16.gmra.mrb[156].mxu0 %vm3374_vm5, %v3324_v23 }
 0x45f   : > { %v5025_v47 = vpop.f32.mrb[160].mxu1 }
 0x460   : > { %v2989_v40 = vadd.f32 %v5025_v47, %v7408_v57  ;;  %v2980_v33 = vpop.f32.mrb[161].mxu1 }
 0x461   : > { %v2981_v35 = vadd.f32 %v7408_v57, %v2980_v33  ;;  %v5026_v55 = vpop.f32.mrb[162].mxu1 }
 0x462   : > { %v3141_v45 = vmax.f32 %v2989_v40, 0.0  ;;  %v2992_v5 = vadd.f32 %v5026_v55, %v7408_v57  ;;  %v2983_v36 = vpop.f32.mrb[163].mxu1 }
 0x463   : > { %v3139_v12 = vmax.f32 %v2981_v35, 0.0  ;;  %v2984_v24 = vadd.f32 %v7408_v57, %v2983_v36 }
 0x464   : > { %v3210_v18 = vmul.f32 %v7414_v16, %v3141_v45  ;;  %v3142_v59 = vmax.f32 %v2992_v5, 0.0 }
 0x465   : > { %v3208_v17 = vmul.f32 %v7414_v16, %v3139_v12  ;;  %v3140_v51 = vmax.f32 %v2984_v24, 0.0 }
 0x466   : > { %v3211_v32 = vmul.f32 %v7414_v16, %v3142_v59  ;;  %v3279_v26 = vadd.f32 %v7423_v28, %v3210_v18 }
 0x467   : > { %v3209_v13 = vmul.f32 %v7414_v16, %v3140_v51  ;;  %v3277_v58 = vadd.f32 %v7423_v28, %v3208_v17 }
 0x468   : > { %v3280_v14 = vadd.f32 %v7423_v28, %v3211_v32 }
 0x469   : > { %v3278_v31 = vadd.f32 %v7423_v28, %v3209_v13 }
 0x46a   : > { %v3326_v19 = vpack.c.bf16 %v3280_v14, %v3279_v26 }
 0x46b   : > { %v3325_v49 = vpack.c.bf16 %v3278_v31, %v3277_v58 }
 0x46d   : > { %5095 = vmatprep.mubr.msk.bf16.mxu0 %vm3374_vm5, %v3325_v49 }
 0x46e   : > { %5096 = vmatmul.mubr.msk.bf16.gmra.mrb[160].mxu0 %vm3374_vm5, %v3326_v19 }
 0x46f   : > { %v5029_v42 = vpop.f32.mrb[164].mxu1 }
 0x470   : > { %v3005_v56 = vadd.f32 %v5029_v42, %v7408_v57  ;;  %v2996_v29 = vpop.f32.mrb[165].mxu1 }
 0x471   : > { %v2997_v8 = vadd.f32 %v7408_v57, %v2996_v29  ;;  %v5030_v53 = vpop.f32.mrb[166].mxu1 }
 0x472   : > { %v3145_v48 = vmax.f32 %v3005_v56, 0.0  ;;  %v3008_v1 = vadd.f32 %v5030_v53, %v7408_v57  ;;  %v2999_v34 = vpop.f32.mrb[167].mxu1 }
 0x473   : > { %v3143_v54 = vmax.f32 %v2997_v8, 0.0  ;;  %v3000_v61 = vadd.f32 %v7408_v57, %v2999_v34 }
 0x474   : > { %v3214_v30 = vmul.f32 %v7414_v16, %v3145_v48  ;;  %v3146_v50 = vmax.f32 %v3008_v1, 0.0 }
 0x475   : > { %v3212_v20 = vmul.f32 %v7414_v16, %v3143_v54  ;;  %v3144_v21 = vmax.f32 %v3000_v61, 0.0 }
 0x476   : > { %v3215_v10 = vmul.f32 %v7414_v16, %v3146_v50  ;;  %v3283_v38 = vadd.f32 %v7423_v28, %v3214_v30 }
 0x477   : > { %v3213_v7 = vmul.f32 %v7414_v16, %v3144_v21  ;;  %v3281_v43 = vadd.f32 %v7423_v28, %v3212_v20 }
 0x478   : > { %v3284_v11 = vadd.f32 %v7423_v28, %v3215_v10 }
 0x479   : > { %v3282_v37 = vadd.f32 %v7423_v28, %v3213_v7 }
 0x47a   : > { %v3328_v9 = vpack.c.bf16 %v3284_v11, %v3283_v38 }
 0x47b   : > { %v3327_v22 = vpack.c.bf16 %v3282_v37, %v3281_v43 }
 0x47d   : > { %5099 = vmatprep.mubr.msk.bf16.mxu0 %vm3374_vm5, %v3327_v22 }
 0x47e   : > { %5100 = vmatmul.mubr.msk.bf16.gmra.mrb[164].mxu0 %vm3374_vm5, %v3328_v9 }
 0x47f   : > { %v5033_v27 = vpop.f32.mrb[168].mxu1 }
 0x480   : > { %v3021_v3 = vadd.f32 %v5033_v27, %v7408_v57  ;;  %v3012_v52 = vpop.f32.mrb[169].mxu1 }
 0x481   : > { %v3013_v62 = vadd.f32 %v7408_v57, %v3012_v52  ;;  %v5034_v15 = vpop.f32.mrb[170].mxu1 }
 0x482   : > { %v3149_v25 = vmax.f32 %v3021_v3, 0.0  ;;  %v3024_v6 = vadd.f32 %v5034_v15, %v7408_v57  ;;  %v3015_v63 = vpop.f32.mrb[171].mxu1 }
 0x483   : > { %v3147_v39 = vmax.f32 %v3013_v62, 0.0  ;;  %v3016_v46 = vadd.f32 %v7408_v57, %v3015_v63 }
 0x484   : > { %v3218_v60 = vmul.f32 %v7414_v16, %v3149_v25  ;;  %v3150_v4 = vmax.f32 %v3024_v6, 0.0 }
 0x485   : > { %v3216_v2 = vmul.f32 %v7414_v16, %v3147_v39  ;;  %v3148_v0 = vmax.f32 %v3016_v46, 0.0 }
 0x486   : > { %v3219_v41 = vmul.f32 %v7414_v16, %v3150_v4  ;;  %v3287_v44 = vadd.f32 %v7423_v28, %v3218_v60 }
 0x487   : > { %v3217_v23 = vmul.f32 %v7414_v16, %v3148_v0  ;;  %v3285_v40 = vadd.f32 %v7423_v28, %v3216_v2 }
 0x488   : > { %v3288_v47 = vadd.f32 %v7423_v28, %v3219_v41 }
 0x489   : > { %v3286_v33 = vadd.f32 %v7423_v28, %v3217_v23 }
 0x48a   : > { %v3330_v35 = vpack.c.bf16 %v3288_v47, %v3287_v44 }
 0x48b   : > { %v3329_v55 = vpack.c.bf16 %v3286_v33, %v3285_v40 }
 0x48d   : > { %5103 = vmatprep.mubr.msk.bf16.mxu0 %vm3374_vm5, %v3329_v55 }
 0x48e   : > { %5104 = vmatmul.mubr.msk.bf16.gmra.mrb[168].mxu0 %vm3374_vm5, %v3330_v35 }
 0x48f   : > { %v5037_v45 = vpop.f32.mrb[172].mxu1 }
 0x490   : > { %v3037_v5 = vadd.f32 %v5037_v45, %v7408_v57  ;;  %v3028_v36 = vpop.f32.mrb[173].mxu1 }
 0x491   : > { %v3029_v12 = vadd.f32 %v7408_v57, %v3028_v36  ;;  %v5038_v24 = vpop.f32.mrb[174].mxu1 }
 0x492   : > { %v3153_v18 = vmax.f32 %v3037_v5, 0.0  ;;  %v3040_v59 = vadd.f32 %v5038_v24, %v7408_v57  ;;  %v3031_v17 = vpop.f32.mrb[175].mxu1 }
 0x493   : > { %v3151_v51 = vmax.f32 %v3029_v12, 0.0  ;;  %v3032_v32 = vadd.f32 %v7408_v57, %v3031_v17 }
 0x494   : > { %v3222_v13 = vmul.f32 %v7414_v16, %v3153_v18  ;;  %v3154_v26 = vmax.f32 %v3040_v59, 0.0  ;;  %v7639_v59 = vld [vmem:[%s8177_s6 + $0x5] ss:$0 sm:$0xff] }
 0x495   : > { %v3220_v14 = vmul.f32 %v7414_v16, %v3151_v51  ;;  %v3152_v58 = vmax.f32 %v3032_v32, 0.0 }
 0x496   : > { %v3223_v31 = vmul.f32 %v7414_v16, %v3154_v26  ;;  %v3291_v49 = vadd.f32 %v7423_v28, %v3222_v13 }
 0x497   : > { %v3221_v19 = vmul.f32 %v7414_v16, %v3152_v58  ;;  %v3289_v56 = vadd.f32 %v7423_v28, %v3220_v14 }
 0x498   : > { %v3292_v42 = vadd.f32 %v7423_v28, %v3223_v31 }
 0x499   : > { %v3290_v29 = vadd.f32 %v7423_v28, %v3221_v19 }
 0x49a   : > { %v3332_v8 = vpack.c.bf16 %v3292_v42, %v3291_v49 }
 0x49b   : > { %v3331_v53 = vpack.c.bf16 %v3290_v29, %v3289_v56  ;;  %v7648_v56 = vld [vmem:[%s8177_s6 + $0x6] ss:$0 sm:$0xff] }
 0x49d   : > { %5107 = vmatprep.mubr.msk.bf16.mxu0 %vm3374_vm5, %v3331_v53 }
 0x49e   : > { %5108 = vmatmul.mubr.msk.bf16.gmra.mrb[172].mxu0 %vm3374_vm5, %v3332_v8 }
 0x49f   : > { %v5041_v48 = vpop.f32.mrb[176].mxu1 }
 0x4a0   : > { %v3053_v1 = vadd.f32 %v5041_v48, %v7408_v57  ;;  %v3044_v34 = vpop.f32.mrb[177].mxu1 }
 0x4a1   : > { %v3045_v54 = vadd.f32 %v7408_v57, %v3044_v34  ;;  %v5042_v61 = vpop.f32.mrb[178].mxu1 }
 0x4a2   : > { %v3157_v30 = vmax.f32 %v3053_v1, 0.0  ;;  %v3056_v50 = vadd.f32 %v5042_v61, %v7408_v57  ;;  %v3047_v20 = vpop.f32.mrb[179].mxu1 }
 0x4a3   : > { %v3155_v21 = vmax.f32 %v3045_v54, 0.0  ;;  %v3048_v10 = vadd.f32 %v7408_v57, %v3047_v20 }
 0x4a4   : > { %v3226_v7 = vmul.f32 %v7414_v16, %v3157_v30  ;;  %v3158_v38 = vmax.f32 %v3056_v50, 0.0 }
 0x4a5   : > { %v3224_v11 = vmul.f32 %v7414_v16, %v3155_v21  ;;  %v3156_v43 = vmax.f32 %v3048_v10, 0.0 }
 0x4a6   : > { %v3227_v37 = vmul.f32 %v7414_v16, %v3158_v38  ;;  %v3295_v22 = vadd.f32 %v7423_v28, %v3226_v7 }
 0x4a7   : > { %v3225_v9 = vmul.f32 %v7414_v16, %v3156_v43  ;;  %v3293_v3 = vadd.f32 %v7423_v28, %v3224_v11  ;;  %v7661_v11 = vld [vmem:[%s8177_s6 + $0x7] ss:$0 sm:$0xff] }
 0x4a8   : > { %v3296_v27 = vadd.f32 %v7423_v28, %v3227_v37 }
 0x4a9   : > { %v3294_v52 = vadd.f32 %v7423_v28, %v3225_v9 }
 0x4aa   : > { %v3334_v62 = vpack.c.bf16 %v3296_v27, %v3295_v22 }
 0x4ab   : > { %v3333_v15 = vpack.c.bf16 %v3294_v52, %v3293_v3 }
 0x4ad   : > { %5111 = vmatprep.mubr.msk.bf16.mxu0 %vm3374_vm5, %v3333_v15 }
 0x4ae   : > { %5112 = vmatmul.mubr.msk.bf16.gmra.mrb[176].mxu0 %vm3374_vm5, %v3334_v62 }
 0x4af   : > { %v5045_v25 = vpop.f32.mrb[180].mxu1 }
 0x4b0   : > { %v3069_v6 = vadd.f32 %v5045_v25, %v7408_v57  ;;  %v3060_v63 = vpop.f32.mrb[181].mxu1 }
 0x4b1   : > { %v3061_v39 = vadd.f32 %v7408_v57, %v3060_v63  ;;  %v5046_v46 = vpop.f32.mrb[182].mxu1 }
 0x4b2   : > { %v3161_v60 = vmax.f32 %v3069_v6, 0.0  ;;  %v3072_v4 = vadd.f32 %v5046_v46, %v7408_v57  ;;  %v3063_v2 = vpop.f32.mrb[183].mxu1 }
 0x4b3   : > { %v3159_v0 = vmax.f32 %v3061_v39, 0.0  ;;  %v3064_v41 = vadd.f32 %v7408_v57, %v3063_v2 }
 0x4b4   : > { %v3230_v23 = vmul.f32 %v7414_v16, %v3161_v60  ;;  %v3162_v44 = vmax.f32 %v3072_v4, 0.0 }
 0x4b5   : > { %v3228_v47 = vmul.f32 %v7414_v16, %v3159_v0  ;;  %v3160_v40 = vmax.f32 %v3064_v41, 0.0 }
 0x4b6   : > { %v3231_v33 = vmul.f32 %v7414_v16, %v3162_v44  ;;  %v3299_v55 = vadd.f32 %v7423_v28, %v3230_v23 }
 0x4b7   : > { %v3229_v35 = vmul.f32 %v7414_v16, %v3160_v40  ;;  %v3297_v5 = vadd.f32 %v7423_v28, %v3228_v47 }
 0x4b8   : > { %v3300_v45 = vadd.f32 %v7423_v28, %v3231_v33 }
 0x4b9   : > { %v3298_v36 = vadd.f32 %v7423_v28, %v3229_v35 }
 0x4ba   : > { %v3336_v12 = vpack.c.bf16 %v3300_v45, %v3299_v55 }
 0x4bb   : > { %v3335_v24 = vpack.c.bf16 %v3298_v36, %v3297_v5 }
 0x4bd   : > { %5115 = vmatprep.mubr.msk.bf16.mxu0 %vm3374_vm5, %v3335_v24 }
 0x4be   : > { %5116 = vmatmul.mubr.msk.bf16.gmra.mrb[180].mxu0 %vm3374_vm5, %v3336_v12 }
 0x4bf   : > { %v5049_v18 = vpop.f32.mrb[184].mxu1 }
 0x4c0   : > { %v3085_v17 = vadd.f32 %v5049_v18, %v7408_v57  ;;  %v3076_v51 = vpop.f32.mrb[185].mxu1 }
 0x4c1   : > { %v3077_v32 = vadd.f32 %v7408_v57, %v3076_v51  ;;  %v5050_v13 = vpop.f32.mrb[186].mxu1  ;;  %v5065_v26 = vpop.f32.mrb[128].mxu0 }
 0x4c2   : > { %v3165_v14 = vmax.f32 %v3085_v17, 0.0  ;;  %v3088_v58 = vadd.f32 %v5050_v13, %v7408_v57  ;;  %v3518_v31 = vadd.f32 %v5065_v26, %v7639_v59  ;;  %v3079_v19 = vpop.f32.mrb[187].mxu1  ;;  %v3509_v49 = vpop.f32.mrb[129].mxu0 }
 0x4c3   : > { %v3163_v42 = vmax.f32 %v3077_v32, 0.0  ;;  %v3080_v29 = vadd.f32 %v7408_v57, %v3079_v19  ;;  %v3510_v8 = vadd.f32 %v7639_v59, %v3509_v49  ;;  %v5066_v53 = vpop.f32.mrb[130].mxu0 }
 0x4c4   : > { %v3234_v48 = vmul.f32 %v7414_v16, %v3165_v14  ;;  %v3166_v1 = vmax.f32 %v3088_v58, 0.0  ;;  %v3766_v34 = vmax.f32 %v3518_v31, 0.0  ;;  %v3521_v54 = vadd.f32 %v5066_v53, %v7639_v59  ;;  %v3512_v61 = vpop.f32.mrb[131].mxu0 }
 0x4c5   : > { %v3232_v30 = vmul.f32 %v7414_v16, %v3163_v42  ;;  %v3164_v50 = vmax.f32 %v3080_v29, 0.0  ;;  %v3764_v20 = vmax.f32 %v3510_v8, 0.0  ;;  %v3513_v21 = vadd.f32 %v7639_v59, %v3512_v61 }
 0x4c6   : > { %v3235_v10 = vmul.f32 %v7414_v16, %v3166_v1  ;;  %v3835_v7 = vmul.f32 %v7648_v56, %v3766_v34  ;;  %v3767_v38 = vmax.f32 %v3521_v54, 0.0  ;;  %v3303_v22 = vadd.f32 %v7423_v28, %v3234_v48 }
 0x4c7   : > { %v3233_v43 = vmul.f32 %v7414_v16, %v3164_v50  ;;  %v3833_v37 = vmul.f32 %v7648_v56, %v3764_v20  ;;  %v3765_v9 = vmax.f32 %v3513_v21, 0.0  ;;  %v3301_v52 = vadd.f32 %v7423_v28, %v3232_v30 }
 0x4c8   : > { %v3304_v27 = vadd.f32 %v7423_v28, %v3235_v10  ;;  %v3836_v3 = vmul.f32 %v7648_v56, %v3767_v38  ;;  %v7672_v6 = vadd.f32 %v7661_v11, %v3835_v7 }
 0x4c9   : > { %v3302_v62 = vadd.f32 %v7423_v28, %v3233_v43  ;;  %v3834_v15 = vmul.f32 %v7648_v56, %v3765_v9  ;;  %v7678_v46 = vadd.f32 %v7661_v11, %v3833_v37 }
 0x4ca   : > { %v3338_v25 = vpack.c.bf16 %v3304_v27, %v3303_v22  ;;  %v7675_v63 = vadd.f32 %v7661_v11, %v3836_v3 }
 0x4cb   : > { %v3337_v39 = vpack.c.bf16 %v3302_v62, %v3301_v52  ;;  %v7681_v60 = vadd.f32 %v7661_v11, %v3834_v15 }
 0x4cc   : > { %v3967_v4 = vpack.c.bf16 %v7675_v63, %v7672_v6 }
 0x4cd   : > { %5119 = vmatprep.mubr.msk.bf16.mxu0 %vm3374_vm5, %v3337_v39  ;;  %v3966_v2 = vpack.c.bf16 %v7681_v60, %v7678_v46 }
 0x4ce   : > { %5120 = vmatmul.mubr.msk.bf16.gmra.mrb[184].mxu0 %vm3374_vm5, %v3338_v25 }
 0x4cf   : > { %v5053_v0 = vpop.f32.mrb[188].mxu1 }
 0x4d0   : > { %v3101_v41 = vadd.f32 %v5053_v0, %v7408_v57  ;;  %v3092_v23 = vpop.f32.mrb[189].mxu1 }
 0x4d1   : > { %v3093_v44 = vadd.f32 %v7408_v57, %v3092_v23  ;;  %v5054_v47 = vpop.f32.mrb[190].mxu1  ;;  %v5069_v40 = vpop.f32.mrb[132].mxu0 }
 0x4d2   : > { %v3169_v33 = vmax.f32 %v3101_v41, 0.0  ;;  %v3104_v35 = vadd.f32 %v5054_v47, %v7408_v57  ;;  %v3534_v55 = vadd.f32 %v5069_v40, %v7639_v59  ;;  %v3095_v45 = vpop.f32.mrb[191].mxu1  ;;  %v3525_v5 = vpop.f32.mrb[133].mxu0 }
 0x4d3   : > { %v3167_v36 = vmax.f32 %v3093_v44, 0.0  ;;  %v3096_v12 = vadd.f32 %v7408_v57, %v3095_v45  ;;  %v3526_v24 = vadd.f32 %v7639_v59, %v3525_v5  ;;  %v5070_v18 = vpop.f32.mrb[134].mxu0 }
 0x4d4   : > { %v3238_v17 = vmul.f32 %v7414_v16, %v3169_v33  ;;  %v3170_v51 = vmax.f32 %v3104_v35, 0.0  ;;  %v3770_v32 = vmax.f32 %v3534_v55, 0.0  ;;  %v3537_v13 = vadd.f32 %v5070_v18, %v7639_v59  ;;  %v3528_v26 = vpop.f32.mrb[135].mxu0 }
 0x4d5   : > { %v3236_v14 = vmul.f32 %v7414_v16, %v3167_v36  ;;  %v3168_v58 = vmax.f32 %v3096_v12, 0.0  ;;  %v3768_v31 = vmax.f32 %v3526_v24, 0.0  ;;  %v3529_v19 = vadd.f32 %v7639_v59, %v3528_v26 }
 0x4d6   : > { %v3239_v49 = vmul.f32 %v7414_v16, %v3170_v51  ;;  %v3839_v57 = vmul.f32 %v7648_v56, %v3770_v32  ;;  %v3771_v42 = vmax.f32 %v3537_v13, 0.0  ;;  %v3307_v48 = vadd.f32 %v7423_v28, %v3238_v17 }
 0x4d7   : > { %v3237_v29 = vmul.f32 %v7414_v16, %v3168_v58  ;;  %v3837_v8 = vmul.f32 %v7648_v56, %v3768_v31  ;;  %v3769_v53 = vmax.f32 %v3529_v19, 0.0  ;;  %v3305_v54 = vadd.f32 %v7423_v28, %v3236_v14 }
 0x4d8   : > { %v3308_v1 = vadd.f32 %v7423_v28, %v3239_v49  ;;  %v3840_v34 = vmul.f32 %v7648_v56, %v3771_v42  ;;  %v7710_v20 = vadd.f32 %v7661_v11, %v3839_v57 }
 0x4d9   : > { %v3306_v61 = vadd.f32 %v7423_v28, %v3237_v29  ;;  %v3838_v30 = vmul.f32 %v7648_v56, %v3769_v53  ;;  %v7716_v10 = vadd.f32 %v7661_v11, %v3837_v8 }
 0x4da   : > { %v3340_v50 = vpack.c.bf16 %v3308_v1, %v3307_v48  ;;  %v7713_v16 = vadd.f32 %v7661_v11, %v3840_v34 }
 0x4db   : > { %v3339_v21 = vpack.c.bf16 %v3306_v61, %v3305_v54  ;;  %v7719_v7 = vadd.f32 %v7661_v11, %v3838_v30 }
 0x4dc   : > { %v3969_v38 = vpack.c.bf16 %v7713_v16, %v7710_v20 }
 0x4dd   : > { %5123 = vmatprep.mubr.msk.bf16.mxu0 %vm3374_vm5, %v3339_v21  ;;  %v3968_v28 = vpack.c.bf16 %v7719_v7, %v7716_v10 }
 0x4de   : > { %5124 = vmatmul.mubr.msk.bf16.gmra.mrb[188].mxu0 %vm3374_vm5, %v3340_v50 }
 0x4df   : > { %v4016_v6 = vsel %vm4005_vm6, %v3968_v28, 0 }
 0x4e1   : > { %v5073_v43 = vpop.f32.mrb[136].mxu0 }
 0x4e2   : > { %v3550_v37 = vadd.f32 %v5073_v43, %v7639_v59  ;;  %v3541_v9 = vpop.f32.mrb[137].mxu0 }
 0x4e3   : > { %v3542_v22 = vadd.f32 %v7639_v59, %v3541_v9  ;;  %v5074_v27 = vpop.f32.mrb[138].mxu0 }
 0x4e4   : > { %v3774_v3 = vmax.f32 %v3550_v37, 0.0  ;;  %v3553_v52 = vadd.f32 %v5074_v27, %v7639_v59  ;;  %v3544_v62 = vpop.f32.mrb[139].mxu0 }
 0x4e5   : > { %v3772_v15 = vmax.f32 %v3542_v22, 0.0  ;;  %v3545_v25 = vadd.f32 %v7639_v59, %v3544_v62 }
 0x4e6   : > { %v3843_v39 = vmul.f32 %v7648_v56, %v3774_v3  ;;  %v3775_v0 = vmax.f32 %v3553_v52, 0.0 }
 0x4e7   : > { %v3841_v41 = vmul.f32 %v7648_v56, %v3772_v15  ;;  %v3773_v23 = vmax.f32 %v3545_v25, 0.0 }
 0x4e8   : > { %v3844_v44 = vmul.f32 %v7648_v56, %v3775_v0  ;;  %v7736_v40 = vadd.f32 %v7661_v11, %v3843_v39 }
 0x4e9   : > { %v3842_v47 = vmul.f32 %v7648_v56, %v3773_v23  ;;  %v7742_v35 = vadd.f32 %v7661_v11, %v3841_v41 }
 0x4ea   : > { %v7739_v33 = vadd.f32 %v7661_v11, %v3844_v44 }
 0x4eb   : > { %v7745_v55 = vadd.f32 %v7661_v11, %v3842_v47 }
 0x4ec   : > { %v3971_v45 = vpack.c.bf16 %v7739_v33, %v7736_v40 }
 0x4ed   : > { %v3970_v5 = vpack.c.bf16 %v7745_v55, %v7742_v35  ;;  %v7844_v35 = vld [vmem:[%s8176_s5] sm:$0x1] }
 0x4ee   : > { %4821 = vmatprep.mubr.msk.bf16.mxu1 %vm4005_vm6, %v7844_v35  ;;  %4839 = vmatprep.mubr.msk.bf16.mxu0 %vm4005_vm6, %v7844_v35 }
 0x4ef   : > { %v4022_v20 = vsel %vm4005_vm6, %v3970_v5, 0 }
 0x4f1   : > { %v5077_v36 = vpop.f32.mrb[140].mxu0 }
 0x4f2   : > { %v3566_v12 = vadd.f32 %v5077_v36, %v7639_v59  ;;  %v3557_v24 = vpop.f32.mrb[141].mxu0 }
 0x4f3   : > { %v3558_v18 = vadd.f32 %v7639_v59, %v3557_v24  ;;  %v5078_v17 = vpop.f32.mrb[142].mxu0 }
 0x4f4   : > { %v3778_v51 = vmax.f32 %v3566_v12, 0.0  ;;  %v3569_v32 = vadd.f32 %v5078_v17, %v7639_v59  ;;  %v3560_v13 = vpop.f32.mrb[143].mxu0  ;;  %v4010_v12 = vsel %vm4005_vm6, %v3966_v2, 0 }
 0x4f5   : > { %v3776_v26 = vmax.f32 %v3558_v18, 0.0  ;;  %v3561_v14 = vadd.f32 %v7639_v59, %v3560_v13 }
 0x4f6   : > { %v3847_v58 = vmul.f32 %v7648_v56, %v3778_v51  ;;  %v3779_v31 = vmax.f32 %v3569_v32, 0.0 }
 0x4f7   : > { %v3845_v19 = vmul.f32 %v7648_v56, %v3776_v26  ;;  %v3777_v49 = vmax.f32 %v3561_v14, 0.0 }
 0x4f8   : > { %v3848_v57 = vmul.f32 %v7648_v56, %v3779_v31  ;;  %v7760_v29 = vadd.f32 %v7661_v11, %v3847_v58 }
 0x4f9   : > { %v3846_v42 = vmul.f32 %v7648_v56, %v3777_v49  ;;  %v7766_v53 = vadd.f32 %v7661_v11, %v3845_v19  ;;  %v4013_v49 = vsel %vm4005_vm6, %v3967_v4, 0 }
 0x4fa   : > { %v7763_v8 = vadd.f32 %v7661_v11, %v3848_v57 }
 0x4fb   : > { %v7769_v48 = vadd.f32 %v7661_v11, %v3846_v42 }
 0x4fc   : > { %v3973_v1 = vpack.c.bf16 %v7763_v8, %v7760_v29 }
 0x4fd   : > { %v3972_v34 = vpack.c.bf16 %v7769_v48, %v7766_v53 }
 0x4ff   : > { %v4028_v40 = vsel %vm4005_vm6, %v3972_v34, 0 }
 0x501   : > { %v5081_v54 = vpop.f32.mrb[144].mxu0 }
 0x502   : > { %v3582_v61 = vadd.f32 %v5081_v54, %v7639_v59  ;;  %v3573_v30 = vpop.f32.mrb[145].mxu0 }
 0x503   : > { %v3574_v50 = vadd.f32 %v7639_v59, %v3573_v30  ;;  %v5082_v21 = vpop.f32.mrb[146].mxu0 }
 0x504   : > { %v3782_v43 = vmax.f32 %v3582_v61, 0.0  ;;  %v3585_v37 = vadd.f32 %v5082_v21, %v7639_v59  ;;  %v3576_v9 = vpop.f32.mrb[147].mxu0 }
 0x505   : > { %v3780_v22 = vmax.f32 %v3574_v50, 0.0  ;;  %v3577_v27 = vadd.f32 %v7639_v59, %v3576_v9 }
 0x506   : > { %v3851_v3 = vmul.f32 %v7648_v56, %v3782_v43  ;;  %v3783_v52 = vmax.f32 %v3585_v37, 0.0 }
 0x507   : > { %v3849_v62 = vmul.f32 %v7648_v56, %v3780_v22  ;;  %v3781_v15 = vmax.f32 %v3577_v27, 0.0 }
 0x508   : > { %v3852_v25 = vmul.f32 %v7648_v56, %v3783_v52  ;;  %v3920_v0 = vadd.f32 %v7661_v11, %v3851_v3 }
 0x509   : > { %v3850_v39 = vmul.f32 %v7648_v56, %v3781_v15  ;;  %v3918_v23 = vadd.f32 %v7661_v11, %v3849_v62 }
 0x50a   : > { %v3921_v41 = vadd.f32 %v7661_v11, %v3852_v25 }
 0x50b   : > { %v3919_v44 = vadd.f32 %v7661_v11, %v3850_v39  ;;  %v4019_v39 = vsel %vm4005_vm6, %v3969_v38, 0 }
 0x50c   : > { %v3975_v47 = vpack.c.bf16 %v3921_v41, %v3920_v0 }
 0x50d   : > { %v3974_v36 = vpack.c.bf16 %v3919_v44, %v3918_v23 }
 0x50f   : > { %5129 = vmatprep.subr.msk.bf16.mxu1 %vm4005_vm6, %v3974_v36 }
 0x510   : > { %4806 = vmatpush3.bf16.xpose.msra.mxu1 %v4010_v12 }
 0x511   : > { %v5085_v24 = vpop.f32.mrb[148].mxu0  ;;  %5130 = vmatprep.subr.msk.bf16.mxu1 %vm4005_vm6, %v3975_v47 }
 0x512   : > { %v3598_v18 = vadd.f32 %v5085_v24, %v7639_v59  ;;  %v3589_v17 = vpop.f32.mrb[149].mxu0 }
 0x513   : > { %v3590_v51 = vadd.f32 %v7639_v59, %v3589_v17  ;;  %v5086_v32 = vpop.f32.mrb[150].mxu0 }
 0x514   : > { %v3786_v13 = vmax.f32 %v3598_v18, 0.0  ;;  %v3601_v26 = vadd.f32 %v5086_v32, %v7639_v59  ;;  %v3592_v14 = vpop.f32.mrb[151].mxu0 }
 0x515   : > { %v3784_v58 = vmax.f32 %v3590_v51, 0.0  ;;  %v3593_v31 = vadd.f32 %v7639_v59, %v3592_v14 }
 0x516   : > { %v3855_v46 = vmul.f32 %v7648_v56, %v3786_v13  ;;  %v3787_v60 = vmax.f32 %v3601_v26, 0.0 }
 0x517   : > { %v3853_v2 = vmul.f32 %v7648_v56, %v3784_v58  ;;  %v3785_v19 = vmax.f32 %v3593_v31, 0.0 }
 0x518   : > { %v3856_v57 = vmul.f32 %v7648_v56, %v3787_v60  ;;  %4808 = vmatpush3.bf16.xpose.msra.mxu1 %v4013_v49  ;;  %v3924_v54 = vadd.f32 %v7661_v11, %v3855_v46  ;;  %v4025_v60 = vsel %vm4005_vm6, %v3971_v45, 0 }
 0x519   : > { %v3854_v42 = vmul.f32 %v7648_v56, %v3785_v19  ;;  %v3922_v30 = vadd.f32 %v7661_v11, %v3853_v2 }
 0x51a   : > { %v3925_v61 = vadd.f32 %v7661_v11, %v3856_v57 }
 0x51b   : > { %v3923_v50 = vadd.f32 %v7661_v11, %v3854_v42 }
 0x51c   : > { %v3977_v21 = vpack.c.bf16 %v3925_v61, %v3924_v54 }
 0x51d   : > { %v3976_v43 = vpack.c.bf16 %v3923_v50, %v3922_v30 }
 0x51f   : > { %5131 = vmatprep.subr.msk.bf16.mxu1 %vm4005_vm6, %v3976_v43 }
 0x520   : > { %4810 = vmatpush3.bf16.xpose.msra.mxu1 %v4016_v6 }
 0x521   : > { %v5089_v63 = vpop.f32.mrb[152].mxu0  ;;  %5132 = vmatprep.subr.msk.bf16.mxu1 %vm4005_vm6, %v3977_v21 }
 0x522   : > { %v3614_v4 = vadd.f32 %v5089_v63, %v7639_v59  ;;  %v3605_v37 = vpop.f32.mrb[153].mxu0 }
 0x523   : > { %v3606_v9 = vadd.f32 %v7639_v59, %v3605_v37  ;;  %v5090_v22 = vpop.f32.mrb[154].mxu0 }
 0x524   : > { %v3790_v27 = vmax.f32 %v3614_v4, 0.0  ;;  %v3617_v3 = vadd.f32 %v5090_v22, %v7639_v59  ;;  %v3608_v52 = vpop.f32.mrb[155].mxu0 }
 0x525   : > { %v3788_v62 = vmax.f32 %v3606_v9, 0.0  ;;  %v3609_v15 = vadd.f32 %v7639_v59, %v3608_v52 }
 0x526   : > { %v3859_v10 = vmul.f32 %v7648_v56, %v3790_v27  ;;  %v3791_v7 = vmax.f32 %v3617_v3, 0.0  ;;  %v4031_v27 = vsel %vm4005_vm6, %v3973_v1, 0  ;;  %v3999_v1 = vld [vmem:[%s8177_s6] sm:$0x3] }
 0x527   : > { %v3857_v28 = vmul.f32 %v7648_v56, %v3788_v62  ;;  %v3789_v25 = vmax.f32 %v3609_v15, 0.0 }
 0x528   : > { %v3860_v0 = vmul.f32 %v7648_v56, %v3791_v7  ;;  %4812 = vmatpush3.bf16.xpose.msra.mxu1 %v4019_v39  ;;  %v3928_v23 = vadd.f32 %v7661_v11, %v3859_v10 }
 0x529   : > { %v3858_v41 = vmul.f32 %v7648_v56, %v3789_v25  ;;  %v3926_v47 = vadd.f32 %v7661_v11, %v3857_v28  ;;  %v5635_v28 = vmov 127  }
 0x52a   : > { %v3929_v44 = vadd.f32 %v7661_v11, %v3860_v0  ;;  %5511 = vset.pattern.permute.xlu0 %v5635_v28 }
 0x52b   : > { %v3927_v36 = vadd.f32 %v7661_v11, %v3858_v41  ;;  %4002 = vperm.xlu0 %5511, %v3999_v1  }
 0x52c   : > { %v3979_v12 = vpack.c.bf16 %v3929_v44, %v3928_v23 }
 0x52d   : > { %v3978_v24 = vpack.c.bf16 %v3927_v36, %v3926_v47 }
 0x52f   : > { %5133 = vmatprep.subr.msk.bf16.mxu1 %vm4005_vm6, %v3978_v24 }
 0x530   : > { %4814 = vmatpush3.bf16.xpose.msra.mxu1 %v4022_v20 }
 0x531   : > { %v5093_v16 = vpop.f32.mrb[156].mxu0  ;;  %5134 = vmatprep.subr.msk.bf16.mxu1 %vm4005_vm6, %v3979_v12 }
 0x532   : > { %v3630_v38 = vadd.f32 %v5093_v16, %v7639_v59  ;;  %v3621_v18 = vpop.f32.mrb[157].mxu0 }
 0x533   : > { %v3622_v17 = vadd.f32 %v7639_v59, %v3621_v18  ;;  %v5094_v51 = vpop.f32.mrb[158].mxu0 }
 0x534   : > { %v3794_v32 = vmax.f32 %v3630_v38, 0.0  ;;  %v3633_v13 = vadd.f32 %v5094_v51, %v7639_v59  ;;  %v3624_v26 = vpop.f32.mrb[159].mxu0 }
 0x535   : > { %v3792_v14 = vmax.f32 %v3622_v17, 0.0  ;;  %v3625_v58 = vadd.f32 %v7639_v59, %v3624_v26 }
 0x536   : > { %v3863_v55 = vmul.f32 %v7648_v56, %v3794_v32  ;;  %v3795_v5 = vmax.f32 %v3633_v13, 0.0 }
 0x537   : > { %v3861_v31 = vmul.f32 %v7648_v56, %v3792_v14  ;;  %v3793_v46 = vmax.f32 %v3625_v58, 0.0 }
 0x538   : > { %v3864_v2 = vmul.f32 %v7648_v56, %v3795_v5  ;;  %4816 = vmatpush3.bf16.xpose.msra.mxu1 %v4025_v60  ;;  %v3932_v49 = vadd.f32 %v7661_v11, %v3863_v55 }
 0x539   : > { %v3862_v19 = vmul.f32 %v7648_v56, %v3793_v46  ;;  %v3930_v42 = vadd.f32 %v7661_v11, %v3861_v31 }
 0x53a   : > { %v3933_v57 = vadd.f32 %v7661_v11, %v3864_v2 }
 0x53b   : > { %v3931_v54 = vadd.f32 %v7661_v11, %v3862_v19 }
 0x53c   : > { %v3981_v61 = vpack.c.bf16 %v3933_v57, %v3932_v49 }
 0x53d   : > { %v3980_v30 = vpack.c.bf16 %v3931_v54, %v3930_v42 }
 0x53f   : > { %5135 = vmatprep.subr.msk.bf16.mxu1 %vm4005_vm6, %v3980_v30 }
 0x540   : > { %4818 = vmatpush3.bf16.xpose.msra.mxu1 %v4028_v40 }
 0x541   : > { %v5097_v33 = vpop.f32.mrb[160].mxu0  ;;  %5136 = vmatprep.subr.msk.bf16.mxu1 %vm4005_vm6, %v3981_v61 }
 0x542   : > { %v3646_v45 = vadd.f32 %v5097_v33, %v7639_v59  ;;  %v3637_v50 = vpop.f32.mrb[161].mxu0 }
 0x543   : > { %v3638_v21 = vadd.f32 %v7639_v59, %v3637_v50  ;;  %v5098_v43 = vpop.f32.mrb[162].mxu0 }
 0x544   : > { %v3798_v6 = vmax.f32 %v3646_v45, 0.0  ;;  %v3649_v63 = vadd.f32 %v5098_v43, %v7639_v59  ;;  %v3640_v4 = vpop.f32.mrb[163].mxu0 }
 0x545   : > { %v3796_v37 = vmax.f32 %v3638_v21, 0.0  ;;  %v3641_v9 = vadd.f32 %v7639_v59, %v3640_v4 }
 0x546   : > { %v3867_v53 = vmul.f32 %v7648_v56, %v3798_v6  ;;  %v3799_v48 = vmax.f32 %v3649_v63, 0.0 }
 0x547   : > { %v3865_v34 = vmul.f32 %v7648_v56, %v3796_v37  ;;  %v3797_v22 = vmax.f32 %v3641_v9, 0.0 }
 0x548   : > { %v3868_v3 = vmul.f32 %v7648_v56, %v3799_v48  ;;  %4820 = vmatpush3.bf16.xpose.msra.mxu1 %v4031_v27  ;;  %v7881_v62 = vadd.f32 %v7661_v11, %v3867_v53 }
 0x549   : > { %v3866_v52 = vmul.f32 %v7648_v56, %v3797_v22  ;;  %v7887_v10 = vadd.f32 %v7661_v11, %v3865_v34 }
 0x54a   : > { %v7884_v15 = vadd.f32 %v7661_v11, %v3868_v3 }
 0x54b   : > { %v7890_v7 = vadd.f32 %v7661_v11, %v3866_v52 }
 0x54c   : > { %v3983_v29 = vpack.c.bf16 %v7884_v15, %v7881_v62 }
 0x54d   : > { %v3982_v8 = vpack.c.bf16 %v7890_v7, %v7887_v10 }
 0x54f   : > { %4822 = vmatmul.mubr.msk.bf16.vlgmr.msra.gmra.mrb[192].mxu1 %vm4005_vm6, %v7844_v35 }
 0x551   : > { %v5101_v25 = vpop.f32.mrb[164].mxu0 }
 0x552   : > { %v3662_v39 = vadd.f32 %v5101_v25, %v7639_v59  ;;  %v3653_v0 = vpop.f32.mrb[165].mxu0 }
 0x553   : > { %v3654_v41 = vadd.f32 %v7639_v59, %v3653_v0  ;;  %v5102_v23 = vpop.f32.mrb[166].mxu0 }
 0x554   : > { %v3802_v44 = vmax.f32 %v3662_v39, 0.0  ;;  %v3665_v47 = vadd.f32 %v5102_v23, %v7639_v59  ;;  %v3656_v36 = vpop.f32.mrb[167].mxu0 }
 0x555   : > { %v3800_v12 = vmax.f32 %v3654_v41, 0.0  ;;  %v3657_v24 = vadd.f32 %v7639_v59, %v3656_v36 }
 0x556   : > { %v3871_v20 = vmul.f32 %v7648_v56, %v3802_v44  ;;  %v3803_v16 = vmax.f32 %v3665_v47, 0.0 }
 0x557   : > { %v3869_v38 = vmul.f32 %v7648_v56, %v3800_v12  ;;  %v3801_v18 = vmax.f32 %v3657_v24, 0.0 }
 0x558   : > { %v3872_v17 = vmul.f32 %v7648_v56, %v3803_v16  ;;  %v7910_v32 = vadd.f32 %v7661_v11, %v3871_v20 }
 0x559   : > { %v3870_v51 = vmul.f32 %v7648_v56, %v3801_v18  ;;  %v7916_v26 = vadd.f32 %v7661_v11, %v3869_v38 }
 0x55a   : > { %v7913_v13 = vadd.f32 %v7661_v11, %v3872_v17 }
 0x55b   : > { %v7919_v14 = vadd.f32 %v7661_v11, %v3870_v51 }
 0x55c   : > { %v3985_v58 = vpack.c.bf16 %v7913_v13, %v7910_v32 }
 0x55d   : > { %v3984_v55 = vpack.c.bf16 %v7919_v14, %v7916_v26 }
 0x55f   : > { %v4064_v62 = vsel %vm4005_vm6, %v3984_v55, 0 }
 0x561   : > { %v5105_v5 = vpop.f32.mrb[168].mxu0 }
 0x562   : > { %v3678_v31 = vadd.f32 %v5105_v5, %v7639_v59  ;;  %v3669_v46 = vpop.f32.mrb[169].mxu0 }
 0x563   : > { %v3670_v60 = vadd.f32 %v7639_v59, %v3669_v46  ;;  %v5106_v2 = vpop.f32.mrb[170].mxu0 }
 0x564   : > { %v3806_v19 = vmax.f32 %v3678_v31, 0.0  ;;  %v3681_v49 = vadd.f32 %v5106_v2, %v7639_v59  ;;  %v3672_v57 = vpop.f32.mrb[171].mxu0 }
 0x565   : > { %v3804_v42 = vmax.f32 %v3670_v60, 0.0  ;;  %v3673_v54 = vadd.f32 %v7639_v59, %v3672_v57 }
 0x566   : > { %v3875_v61 = vmul.f32 %v7648_v56, %v3806_v19  ;;  %v3807_v30 = vmax.f32 %v3681_v49, 0.0 }
 0x567   : > { %v3873_v40 = vmul.f32 %v7648_v56, %v3804_v42  ;;  %v3805_v33 = vmax.f32 %v3673_v54, 0.0 }
 0x568   : > { %v3876_v45 = vmul.f32 %v7648_v56, %v3807_v30  ;;  %v7934_v21 = vadd.f32 %v7661_v11, %v3875_v61 }
 0x569   : > { %v3874_v50 = vmul.f32 %v7648_v56, %v3805_v33  ;;  %v7940_v6 = vadd.f32 %v7661_v11, %v3873_v40 }
 0x56a   : > { %v7937_v43 = vadd.f32 %v7661_v11, %v3876_v45 }
 0x56b   : > { %v7943_v63 = vadd.f32 %v7661_v11, %v3874_v50 }
 0x56c   : > { %v3987_v4 = vpack.c.bf16 %v7937_v43, %v7934_v21 }
 0x56d   : > { %v3986_v37 = vpack.c.bf16 %v7943_v63, %v7940_v6 }
 0x56f   : > { %v4070_v32 = vsel %vm4005_vm6, %v3986_v37, 0 }
 0x571   : > { %v5109_v9 = vpop.f32.mrb[172].mxu0 }
 0x572   : > { %v3694_v53 = vadd.f32 %v5109_v9, %v7639_v59  ;;  %v3685_v48 = vpop.f32.mrb[173].mxu0 }
 0x573   : > { %v3686_v34 = vadd.f32 %v7639_v59, %v3685_v48  ;;  %v5110_v22 = vpop.f32.mrb[174].mxu0  ;;  %v4058_v48 = vsel %vm4005_vm6, %v3982_v8, 0 }
 0x574   : > { %v3810_v27 = vmax.f32 %v3694_v53, 0.0  ;;  %v3697_v3 = vadd.f32 %v5110_v22, %v7639_v59  ;;  %v3688_v52 = vpop.f32.mrb[175].mxu0 }
 0x575   : > { %v3808_v1 = vmax.f32 %v3686_v34, 0.0  ;;  %v3689_v28 = vadd.f32 %v7639_v59, %v3688_v52 }
 0x576   : > { %v3879_v25 = vmul.f32 %v7648_v56, %v3810_v27  ;;  %v3811_v39 = vmax.f32 %v3697_v3, 0.0 }
 0x577   : > { %v3877_v0 = vmul.f32 %v7648_v56, %v3808_v1  ;;  %v3809_v41 = vmax.f32 %v3689_v28, 0.0 }
 0x578   : > { %v3880_v23 = vmul.f32 %v7648_v56, %v3811_v39  ;;  %v7958_v47 = vadd.f32 %v7661_v11, %v3879_v25 }
 0x579   : > { %v3878_v44 = vmul.f32 %v7648_v56, %v3809_v41  ;;  %v7964_v12 = vadd.f32 %v7661_v11, %v3877_v0 }
 0x57a   : > { %v7961_v36 = vadd.f32 %v7661_v11, %v3880_v23  ;;  %v4061_v23 = vsel %vm4005_vm6, %v3983_v29, 0 }
 0x57b   : > { %v7967_v24 = vadd.f32 %v7661_v11, %v3878_v44 }
 0x57c   : > { %v3989_v20 = vpack.c.bf16 %v7961_v36, %v7958_v47 }
 0x57d   : > { %v3988_v16 = vpack.c.bf16 %v7967_v24, %v7964_v12 }
 0x57f   : > { %v4076_v21 = vsel %vm4005_vm6, %v3988_v16, 0 }
 0x581   : > { %v5113_v38 = vpop.f32.mrb[176].mxu0 }
 0x582   : > { %v3710_v18 = vadd.f32 %v5113_v38, %v7639_v59  ;;  %v3701_v17 = vpop.f32.mrb[177].mxu0 }
 0x583   : > { %v3702_v51 = vadd.f32 %v7639_v59, %v3701_v17  ;;  %v5114_v5 = vpop.f32.mrb[178].mxu0 }
 0x584   : > { %v3814_v31 = vmax.f32 %v3710_v18, 0.0  ;;  %v3713_v46 = vadd.f32 %v5114_v5, %v7639_v59  ;;  %v3704_v60 = vpop.f32.mrb[179].mxu0 }
 0x585   : > { %v3812_v2 = vmax.f32 %v3702_v51, 0.0  ;;  %v3705_v19 = vadd.f32 %v7639_v59, %v3704_v60 }
 0x586   : > { %v3883_v49 = vmul.f32 %v7648_v56, %v3814_v31  ;;  %v3815_v57 = vmax.f32 %v3713_v46, 0.0 }
 0x587   : > { %v3881_v42 = vmul.f32 %v7648_v56, %v3812_v2  ;;  %v3813_v54 = vmax.f32 %v3705_v19, 0.0 }
 0x588   : > { %v3884_v61 = vmul.f32 %v7648_v56, %v3815_v57  ;;  %v3952_v40 = vadd.f32 %v7661_v11, %v3883_v49 }
 0x589   : > { %v3882_v30 = vmul.f32 %v7648_v56, %v3813_v54  ;;  %v3950_v45 = vadd.f32 %v7661_v11, %v3881_v42 }
 0x58a   : > { %v3953_v33 = vadd.f32 %v7661_v11, %v3884_v61 }
 0x58b   : > { %v3951_v50 = vadd.f32 %v7661_v11, %v3882_v30 }
 0x58c   : > { %v3991_v9 = vpack.c.bf16 %v3953_v33, %v3952_v40  ;;  %v4067_v40 = vsel %vm4005_vm6, %v3985_v58, 0 }
 0x58d   : > { %v3990_v53 = vpack.c.bf16 %v3951_v50, %v3950_v45 }
 0x58f   : > { %5137 = vmatprep.subr.msk.bf16.mxu0 %vm4005_vm6, %v3990_v53 }
 0x590   : > { %4824 = vmatpush3.bf16.xpose.msra.mxu0 %v4058_v48 }
 0x591   : > { %v5117_v34 = vpop.f32.mrb[180].mxu0  ;;  %5138 = vmatprep.subr.msk.bf16.mxu0 %vm4005_vm6, %v3991_v9 }
 0x592   : > { %v3726_v22 = vadd.f32 %v5117_v34, %v7639_v59  ;;  %v3717_v27 = vpop.f32.mrb[181].mxu0 }
 0x593   : > { %v3718_v3 = vadd.f32 %v7639_v59, %v3717_v27  ;;  %v5118_v52 = vpop.f32.mrb[182].mxu0 }
 0x594   : > { %v3818_v1 = vmax.f32 %v3726_v22, 0.0  ;;  %v3729_v28 = vadd.f32 %v5118_v52, %v7639_v59  ;;  %v3720_v25 = vpop.f32.mrb[183].mxu0 }
 0x595   : > { %v3816_v39 = vmax.f32 %v3718_v3, 0.0  ;;  %v3721_v0 = vadd.f32 %v7639_v59, %v3720_v25 }
 0x596   : > { %v3887_v10 = vmul.f32 %v7648_v56, %v3818_v1  ;;  %v3819_v7 = vmax.f32 %v3729_v28, 0.0 }
 0x597   : > { %v3885_v8 = vmul.f32 %v7648_v56, %v3816_v39  ;;  %v3817_v41 = vmax.f32 %v3721_v0, 0.0 }
 0x598   : > { %v3888_v44 = vmul.f32 %v7648_v56, %v3819_v7  ;;  %4826 = vmatpush3.bf16.xpose.msra.mxu0 %v4061_v23  ;;  %v3956_v18 = vadd.f32 %v7661_v11, %v3887_v10  ;;  %v4073_v7 = vsel %vm4005_vm6, %v3987_v4, 0 }
 0x599   : > { %v3886_v38 = vmul.f32 %v7648_v56, %v3817_v41  ;;  %v3954_v51 = vadd.f32 %v7661_v11, %v3885_v8 }
 0x59a   : > { %v3957_v17 = vadd.f32 %v7661_v11, %v3888_v44 }
 0x59b   : > { %v3955_v5 = vadd.f32 %v7661_v11, %v3886_v38 }
 0x59c   : > { %v3993_v31 = vpack.c.bf16 %v3957_v17, %v3956_v18 }
 0x59d   : > { %v3992_v46 = vpack.c.bf16 %v3955_v5, %v3954_v51 }
 0x59f   : > { %5139 = vmatprep.subr.msk.bf16.mxu0 %vm4005_vm6, %v3992_v46 }
 0x5a0   : > { %4828 = vmatpush3.bf16.xpose.msra.mxu0 %v4064_v62 }
 0x5a1   : > { %v5121_v15 = vpop.f32.mrb[184].mxu0  ;;  %5140 = vmatprep.subr.msk.bf16.mxu0 %vm4005_vm6, %v3993_v31 }
 0x5a2   : > { %v3742_v29 = vadd.f32 %v5121_v15, %v7639_v59  ;;  %v3733_v60 = vpop.f32.mrb[185].mxu0  ;;  %v5636_v15 = vmov 0.0  }
 0x5a3   : > { %v3734_v2 = vadd.f32 %v7639_v59, %v3733_v60  ;;  %v5122_v19 = vpop.f32.mrb[186].mxu0 }
 0x5a4   : > { %v3822_v49 = vmax.f32 %v3742_v29, 0.0  ;;  %v3745_v57 = vadd.f32 %v5122_v19, %v7639_v59  ;;  %v3736_v42 = vpop.f32.mrb[187].mxu0 }
 0x5a5   : > { %v3820_v54 = vmax.f32 %v3734_v2, 0.0  ;;  %v3737_v61 = vadd.f32 %v7639_v59, %v3736_v42 }
 0x5a6   : > { %v3891_v26 = vmul.f32 %v7648_v56, %v3822_v49  ;;  %v3823_v14 = vmax.f32 %v3745_v57, 0.0 }
 0x5a7   : > { %v3889_v55 = vmul.f32 %v7648_v56, %v3820_v54  ;;  %v3821_v30 = vmax.f32 %v3737_v61, 0.0 }
 0x5a8   : > { %v3892_v33 = vmul.f32 %v7648_v56, %v3823_v14  ;;  %4830 = vmatpush3.bf16.xpose.msra.mxu0 %v4067_v40  ;;  %v3960_v50 = vadd.f32 %v7661_v11, %v3891_v26 }
 0x5a9   : > { %v3890_v45 = vmul.f32 %v7648_v56, %v3821_v30  ;;  %v3958_v53 = vadd.f32 %v7661_v11, %v3889_v55 }
 0x5aa   : > { %v3961_v9 = vadd.f32 %v7661_v11, %v3892_v33 }
 0x5ab   : > { %v3959_v48 = vadd.f32 %v7661_v11, %v3890_v45 }
 0x5ac   : > { %v3995_v34 = vpack.c.bf16 %v3961_v9, %v3960_v50 }
 0x5ad   : > { %v3994_v22 = vpack.c.bf16 %v3959_v48, %v3958_v53 }
 0x5af   : > { %5141 = vmatprep.subr.msk.bf16.mxu0 %vm4005_vm6, %v3994_v22 }
 0x5b0   : > { %4832 = vmatpush3.bf16.xpose.msra.mxu0 %v4070_v32 }
 0x5b1   : > { %v5125_v13 = vpop.f32.mrb[188].mxu0  ;;  %5142 = vmatprep.subr.msk.bf16.mxu0 %vm4005_vm6, %v3995_v34 }
 0x5b2   : > { %v3758_v58 = vadd.f32 %v5125_v13, %v7639_v59  ;;  %v3749_v27 = vpop.f32.mrb[189].mxu0 }
 0x5b3   : > { %v3750_v3 = vadd.f32 %v7639_v59, %v3749_v27  ;;  %v5126_v52 = vpop.f32.mrb[190].mxu0 }
 0x5b4   : > { %v3826_v1 = vmax.f32 %v3758_v58, 0.0  ;;  %v3761_v28 = vadd.f32 %v5126_v52, %v7639_v59  ;;  %v3752_v25 = vpop.f32.mrb[191].mxu0 }
 0x5b5   : > { %v3824_v39 = vmax.f32 %v3750_v3, 0.0  ;;  %v3753_v0 = vadd.f32 %v7639_v59, %v3752_v25 }
 0x5b6   : > { %v3895_v6 = vmul.f32 %v7648_v56, %v3826_v1  ;;  %v3827_v63 = vmax.f32 %v3761_v28, 0.0 }
 0x5b7   : > { %v3893_v37 = vmul.f32 %v7648_v56, %v3824_v39  ;;  %v3825_v10 = vmax.f32 %v3753_v0, 0.0  ;;  %v5637_v0 = vmov 1966171168  }
 0x5b8   : > { %v3896_v8 = vmul.f32 %v7648_v56, %v3827_v63  ;;  %4834 = vmatpush3.bf16.xpose.msra.mxu0 %v4073_v7  ;;  %v3964_v23 = vadd.f32 %v7661_v11, %v3895_v6  ;;  %v4278_v6 = vunpack.c.l.s4 %v5637_v0  ;;  %v4280_v63 = vlaneseq }
 0x5b9   : > { %v3894_v41 = vmul.f32 %v7648_v56, %v3825_v10  ;;  %v3962_v44 = vadd.f32 %v7661_v11, %v3893_v37  ;;  %v4079_v56 = vsel %vm4005_vm6, %v3989_v20, 0 }
 0x5ba   : > { %v3965_v59 = vadd.f32 %v7661_v11, %v3896_v8  ;;  %vm8103_vm11 = vcmp.lt.s32.totalorder %v4280_v63, 512 }
 0x5bb   : > { %v3963_v38 = vadd.f32 %v7661_v11, %v3894_v41  ;;  %v8063_v11 = vpop.permute.xlu0 %4002 }
 0x5bc   : > { %v3997_v18 = vpack.c.bf16 %v3965_v59, %v3964_v23 }
 0x5bd   : > { %v3996_v17 = vpack.c.bf16 %v3963_v38, %v3962_v44  ;;  %v4279_v44 = vunpack.c.0.s8 %v4278_v6  ;;  %v4281_v38 = vshrl.u32 %v4280_v63, 7 }
 0x5bf   : > { %5143 = vmatprep.subr.msk.bf16.mxu0 %vm4005_vm6, %v3996_v17 }
 0x5c0   : > { %4836 = vmatpush3.bf16.xpose.msra.mxu0 %v4076_v21 }
 0x5c1   : > { %5144 = vmatprep.subr.msk.bf16.mxu0 %vm4005_vm6, %v3997_v18 }
 0x5c8   : > { %4838 = vmatpush3.bf16.xpose.msra.mxu0 %v4079_v56 }
 0x5cf   : > { %4840 = vmatmul.mubr.msk.bf16.vlgmr.msra.gmra.mrb[192].mxu0 %vm4005_vm6, %v7844_v35 }
 0x622   : > { %v4139_v43 = vpop.f32.mrb[192].mxu1 }
 0x623   : > { %v4140_v4 = vadd.f32 %v4139_v43, %v8063_v11  ;;  %v4141_v12 = vpop.f32.mrb[193].mxu1 }
 0x624   : > { %v4142_v24 = vadd.f32 %v4141_v12, %v8063_v11  ;;  %v4143_v16 = vpop.f32.mrb[194].mxu1 }
 0x625   : > { %v4187_v51 = vmax.f32 %v4140_v4, 0.0  ;;  %v4144_v5 = vpop.f32.mrb[195].mxu1 }
 0x626   : > { %v4188_v47 = vmax.f32 %v4142_v24, 0.0  ;;  %v4282_v24 = vsub.s32 %v4279_v44, %v4281_v38 }
 0x627   : > { %v4195_v36 = vrot.slane %v4187_v51, 1  ;;  %v4355_v20 = vrot.slane %v4187_v51, 7  ;;  %4263 = vst [vmem:[%s8070_s23] sm:$0x3] %v4187_v51 }
 0x628   : > { %v4196_v35 = vrot.slane %v4188_v47, 1  ;;  %v4356_v31 = vrot.slane %v4188_v47, 7  ;;  %4264 = vst [vmem:[%s8070_s23 + $0x8] sm:$0x3] %v4188_v47 }
 0x629   : > { %v4203_v46 = vmax.f32 %v4187_v51, %v4195_v36  ;;  %vm4363_vm7 = vcmp.gt.f32.partialorder %v4187_v51, %v4355_v20 }
 0x62a   : > { %v4204_v62 = vmax.f32 %v4188_v47, %v4196_v35  ;;  %vm4364_vm8 = vcmp.gt.f32.partialorder %v4188_v47, %v4356_v31  ;;  %v8075_v29 = vsel %vm4363_vm7, 1.0, %v5636_v15 }
 0x62b   : > { %v4207_v60 = vsub.f32 %v4187_v51, %v4203_v46  ;;  %v4223_v2 = vrot.slane %v4203_v46, 7  ;;  %v8078_v19 = vsel %vm4364_vm8, 1.0, %v5636_v15 }
 0x62c   : > { %v4208_v49 = vsub.f32 %v4188_v47, %v4204_v62  ;;  %v4224_v57 = vrot.slane %v4204_v62, 7  ;;  %v4375_v42 = vcombine.low %v8075_v29, %v8078_v19 }
 0x62d   : > { %v4211_v54 = vmul.f32 1.442695, %v4207_v60  ;;  %v4231_v61 = vsub.f32 %v4187_v51, %v4223_v2 }
 0x62e   : > { %v4213_v26 = vmul.f32 1.442695, %v4208_v49  ;;  %v4232_v14 = vsub.f32 %v4188_v47, %v4224_v57  ;;  %v4383_v31 = vrot.slane %v4375_v42, %v4282_v24 }
 0x62f   : > { %5543 = vpow2.f32 %v4211_v54  ;;  %v4235_v55 = vmul.f32 1.442695, %v4231_v61 }
 0x630   : > { %5545 = vpow2.f32 %v4213_v26  ;;  %v4237_v30 = vmul.f32 1.442695, %v4232_v14 }
 0x631   : > { %5547 = vpow2.f32 %v4235_v55 }
 0x632   : > { %5549 = vpow2.f32 %v4237_v30 }
 0x639   : > { %v5544_v40 = vpop.eup %5543 }
 0x63a   : > { %v5546_v33 = vpop.eup %5545 }
 0x63b   : > { %v5548_v45 = vpop.eup %5547 }
 0x63c   : > { %v5550_v50 = vpop.eup %5549  ;;  %v4247_v9 = vrot.slane %v5548_v45, 1 }
 0x63d   : > { %v4248_v53 = vrot.slane %v5550_v50, 1 }
 0x63e   : > { %v4255_v48 = vadd.f32 %v5544_v40, %v4247_v9 }
 0x63f   : > { %v4256_v34 = vadd.f32 %v5546_v33, %v4248_v53 }
 0x640   : > { %5551 = vrcp.f32 %v4255_v48 }
 0x641   : > { %5553 = vrcp.f32 %v4256_v34 }
 0x64a   : > { %v5552_v22 = vpop.eup %5551 }
 0x64b   : > { %v5554_v32 = vpop.eup %5553  ;;  %v8082_v13 = vmul.f32 %v5552_v22, %v5544_v40  ;;  %v4311_v58 = vrot.slane %v5552_v22, 7 }
 0x64c   : > { %v8084_v27 = vmul.f32 %v5554_v32, %v5546_v33  ;;  %v4312_v3 = vrot.slane %v5554_v32, 7 }
 0x64d   : > { %v8086_v52 = vmul.f32 %v5548_v45, %v4311_v58 }
 0x64e   : > { %v4275_v1 = vcombine.low %v8082_v13, %v8084_v27  ;;  %v8090_v28 = vmul.f32 %v5550_v50, %v4312_v3 }
 0x650   : > { %v4327_v25 = vcombine.low %v8086_v52, %v8090_v28  ;;  %v4283_v32 = vrot.slane %v4275_v1, %v4282_v24 }
 0x652   : > { %v4335_v0 = vrot.slane %v4327_v25, %v4282_v24 }
 0x6a2   : > { %v4180_v39 = vpop.f32.mrb[192].mxu0 }
 0x6a3   : > { %v4181_v37 = vadd.f32 %v4180_v39, %v8063_v11  ;;  %v4182_v10 = vpop.f32.mrb[193].mxu0 }
 0x6a4   : > { %v4183_v7 = vadd.f32 %v4182_v10, %v8063_v11  ;;  %v4184_v8 = vpop.f32.mrb[194].mxu0 }
 0x6a5   : > { %v4189_v41 = vmax.f32 %v4181_v37, 0.0  ;;  %v4185_v23 = vpop.f32.mrb[195].mxu0 }
 0x6a6   : > { %v4190_v59 = vmax.f32 %v4183_v7, 0.0 }
 0x6a7   : > { %v4197_v18 = vrot.slane %v4189_v41, 1  ;;  %v4357_v17 = vrot.slane %v4189_v41, 7  ;;  %4265 = vst [vmem:[%s8070_s23 + $0x10] sm:$0x3] %v4189_v41 }
 0x6a8   : > { %v4198_v21 = vrot.slane %v4190_v59, 1  ;;  %v4358_v56 = vrot.slane %v4190_v59, 7  ;;  %4266 = vst [vmem:[%s8070_s23 + $0x18] sm:$0x3] %v4190_v59 }
 0x6a9   : > { %v4205_v43 = vmax.f32 %v4189_v41, %v4197_v18  ;;  %vm4365_vm9 = vcmp.gt.f32.partialorder %v4189_v41, %v4357_v17 }
 0x6aa   : > { %v4206_v4 = vmax.f32 %v4190_v59, %v4198_v21  ;;  %vm4366_vm10 = vcmp.gt.f32.partialorder %v4190_v59, %v4358_v56  ;;  %v4369_v12 = vsel %vm4365_vm9, 1.0, %v5636_v15 }
 0x6ab   : > { %v4209_v11 = vsub.f32 %v4189_v41, %v4205_v43  ;;  %v4225_v16 = vrot.slane %v4205_v43, 7  ;;  %v4370_v51 = vsel %vm4366_vm10, 1.0, %v5636_v15 }
 0x6ac   : > { %v4210_v5 = vsub.f32 %v4190_v59, %v4206_v4  ;;  %v4226_v47 = vrot.slane %v4206_v4, 7  ;;  %v4376_v36 = vcombine.low %v4369_v12, %v4370_v51 }
 0x6ad   : > { %v4233_v20 = vsub.f32 %v4189_v41, %v4225_v16  ;;  %v4215_v62 = vmul.f32 1.442695, %v4209_v11 }
 0x6ae   : > { %v4234_v35 = vsub.f32 %v4190_v59, %v4226_v47  ;;  %v4390_v46 = vrot.slane %v4376_v36, %v4282_v24  ;;  %v4217_v2 = vmul.f32 1.442695, %v4210_v5 }
 0x6af   : > { %v4239_v60 = vmul.f32 1.442695, %v4233_v20 }
 0x6b0   : > { %v4241_v49 = vmul.f32 1.442695, %v4234_v35  ;;  %v4391_v57 = vcombine.high %v4383_v31, %v4390_v46 }
 0x6b1   : > { %5555 = vpow2.f32 %v4239_v60 }
 0x6b2   : > { %5557 = vpow2.f32 %v4241_v49  ;;  %v4398_v15 = vrot.slane %v4391_v57, %v4282_v24 }
 0x6b3   : > { %5559 = vpow2.f32 %v4215_v62 }
 0x6b4   : > { %5561 = vpow2.f32 %v4217_v2  ;;  %4655 = vst.msk [vmem:[%s8070_s23 + $0x4] ss:$8 sm:$0xf] %vm8103_vm11, %v4398_v15 }
 0x6bb   : > { %v5556_v29 = vpop.eup %5555 }
 0x6bc   : > { %v5558_v19 = vpop.eup %5557  ;;  %v4249_v42 = vrot.slane %v5556_v29, 1 }
 0x6bd   : > { %v5560_v61 = vpop.eup %5559  ;;  %v4250_v26 = vrot.slane %v5558_v19, 1 }
 0x6be   : > { %v5562_v14 = vpop.eup %5561  ;;  %v4257_v55 = vadd.f32 %v5560_v61, %v4249_v42 }
 0x6bf   : > { %v4258_v30 = vadd.f32 %v5562_v14, %v4250_v26 }
 0x6c0   : > { %5563 = vrcp.f32 %v4257_v55 }
 0x6c1   : > { %5565 = vrcp.f32 %v4258_v30 }
 0x6ca   : > { %v5564_v40 = vpop.eup %5563 }
 0x6cb   : > { %v5566_v33 = vpop.eup %5565  ;;  %v4269_v45 = vmul.f32 %v5564_v40, %v5560_v61  ;;  %v4313_v50 = vrot.slane %v5564_v40, 7 }
 0x6cc   : > { %v4270_v9 = vmul.f32 %v5566_v33, %v5562_v14  ;;  %v4314_v53 = vrot.slane %v5566_v33, 7 }
 0x6cd   : > { %v4321_v48 = vmul.f32 %v5556_v29, %v4313_v50 }
 0x6ce   : > { %v4276_v34 = vcombine.low %v4269_v45, %v4270_v9  ;;  %v4322_v22 = vmul.f32 %v5558_v19, %v4314_v53 }
 0x6d0   : > { %v4290_v58 = vrot.slane %v4276_v34, %v4282_v24  ;;  %v4328_v3 = vcombine.low %v4321_v48, %v4322_v22 }
 0x6d2   : > { %v4291_v39 = vcombine.low %v4283_v32, %v4290_v58  ;;  %v4342_v6 = vrot.slane %v4328_v3, %v4282_v24 }
 0x6d4   : > { %v4298_v63 = vrot.slane %v4291_v39, %v4282_v24  ;;  %v4343_v37 = vcombine.high %v4335_v0, %v4342_v6 }
 0x6d6   : > { %4653 = vst.msk [vmem:[%s8070_s23 + $0x2] ss:$8 sm:$0xf] %vm8103_vm11, %v4298_v63  ;;  %v4350_v10 = vrot.slane %v4343_v37, %v4282_v24 }
 0x6d8   : > { %4654 = vst.msk [vmem:[%s8070_s23 + $0x3] ss:$8 sm:$0xf] %vm8103_vm11, %v4350_v10 }
 0x6d9   : > { %5581 = shalt.err (!%p5578_p3)
}
 0x6da   : > { %s5582_s20 = scalar_lea.hbm %s8124_s15, 512  ;;  %s5586_s8 = scalar_lea.hbm %s8178_s7, 1024 }
 0x6db   : > { %p5583_p4 = scmp.ne.s32.totalorder %s8124_s15, %s5582_s20  ;;  %p5587_p9 = scmp.lt.u32.totalorder %s8124_s15, %s8178_s7 }
 0x6dc   : > { %p5588_p10 = scmp.lt.u32.totalorder %s5586_s8, %s5582_s20  ;;  %p5590_p12 = scmp.lt.u32.totalorder %s5582_s20, %s8124_s15 }
 0x6dd   : > { %p5584_p7 = pnand %p5583_p4, %p5717_p5 }
 0x6de   : > { %p5589_p11 = por %p5588_p10, %p5587_p9 }
 0x6df   : > { %p5585_p8 = pneg %p5584_p7 }
 0x6e0   : > { %p5591_p13 = por %p5590_p12, %p5589_p11 }
 0x6e2   : > { %p5592_p0 = pnand %p5591_p13, %p5585_p8 }
 0x6e4   : > { %5595 = shalt.err (!%p5592_p0)
}
 0x6e5   : > { %5146 = dma.vmem_to_hbm [thread:$0]  (%p5717_p5), %s8126_s9, 512, %s8124_s15, %s4404_s28  }
 0x6e6 PF: > { %p5152_p1 = scmp.ge.s32.totalorder %s5630_s27, 2  ;;  %s4430_s13 = sand.u32 1, %s5618_s24  }
 0x6e7   : > { %s4431_s14 = scalar_lea.sflag [#allocation3], %s4430_s13 }
 0x6e8   : > { %p5149_p2 = pnand %p5152_p1, %p5721_p6 }
 0x6ea   : > { %5613 = dma.done.wait (!%p5149_p2), %s4431_s14, 512  }
 0x6eb   : > { %5615 = vsyncadd (!%p5149_p2), %s4431_s14, 4294966784  ;;  %p17_p3 = scmp.ge.s32.totalorder %s5704_s30, 4   ;;  %s8363_s24 = smov %s5622_s25 }
 0x6ec   : > { %s8364_s25 = smov %s5626_s26  ;;  %s8365_s26 = smov %s5715_s10 }
 0x6ed   : > { %s8366_s27 = smov %s5704_s30  ;;  %19 = sbr.rel (!%p17_p3) target bundleno = 3 (0x3), region = 86 }
 0x6f4   :  { %4436 = vsyncpa [#allocation3], 1 }
 0x6f5   :  { %4438 = vsyncpa [#allocation3 + $0x1], 1 }

</bundles_post_ra>
